<compile_context>
chip_gen: v7x
topology: tpu7x:2x2x1
jax: 0.10.0
libtpu: 0.0.40
codegen_flags: <defaults>
</compile_context>

<pallas_src>
import functools

import jax
import jax.numpy as jnp
from jax.experimental import pallas as pl
from jax.experimental.pallas import tpu as pltpu

LANE = 128  # channel dims are zero-padded to multiples of this (lane-dense I/O)


def _round_up(x, m):
    return (x + m - 1) // m * m


def _hw_defaults():
    """(max M-tile, vmem_limit_bytes) per TPU generation.

    v5e/v6e have 128 MiB VMEM -> bigger tiles & limit; v7x has 64 MiB per
    TensorCore -> keep the conservative 512 / 48 MiB setting.
    """
    vmem_cap = None
    try:
        info = pltpu.get_tpu_info()
        vmem_cap = getattr(info, "vmem_capacity_bytes", None)
    except Exception:
        vmem_cap = None
    if vmem_cap is not None and vmem_cap >= 96 * 1024 * 1024:
        return 1024, 100 * 1024 * 1024      # v5e / v6e (128 MiB VMEM)
    return 512, 48 * 1024 * 1024            # v7x (64 MiB / TC) or unknown


_TM_MAX, _VMEM_LIMIT = _hw_defaults()


def _compiler_params():
    return pltpu.CompilerParams(
        dimension_semantics=("parallel",),   # independent tiles; megacore-shardable
        vmem_limit_bytes=_VMEM_LIMIT,
    )


def _choose_tm(m):
    """M-tile: as large as the per-generation cap allows, but always >= 2 grid
    steps when possible so v7x keeps both TensorCores busy and input/output
    DMAs overlap with compute."""
    m8 = _round_up(max(m, 8), 8)
    tm = min(_TM_MAX, m8)
    if m8 // tm < 2 and m8 >= 16:
        tm = _round_up((m8 + 1) // 2, 8)
    return tm


def _pad_rows(x2d, mp):
    m = x2d.shape[0]
    return x2d if mp == m else jnp.pad(x2d, ((0, mp - m), (0, 0)))


# ----------------------------------------------------------------------------
# Kernel 1: fused cv0 + cv1 (two 1x1 convs sharing one input read) + SiLU.
# ----------------------------------------------------------------------------
def _cv01_kernel(x_ref, w_ref, b_ref, o0_ref, o1_ref):
    """x (TM, C1p) bf16, w (C1p, 2*Cp) bf16 (BN scale folded), b (1, 2*Cp) f32."""
    acc = jnp.dot(x_ref[...], w_ref[...], preferred_element_type=jnp.float32)
    y = acc + b_ref[...]
    y = y * jax.nn.sigmoid(y)              # SiLU; sigmoid runs on the EUP slot
    cp = o0_ref.shape[-1]
    o0_ref[...] = y[:, :cp].astype(o0_ref.dtype)
    o1_ref[...] = y[:, cp:].astype(o1_ref.dtype)


def cv01_call(x2d, w01, b01):
    M, c1p = x2d.shape
    two_cp = w01.shape[1]
    cp = two_cp // 2
    tm = _choose_tm(M)
    mp = _round_up(M, tm)
    xp = _pad_rows(x2d, mp)
    o0, o1 = pl.pallas_call(
        _cv01_kernel,
        out_shape=(jax.ShapeDtypeStruct((mp, cp), jnp.bfloat16),
                   jax.ShapeDtypeStruct((mp, cp), jnp.bfloat16)),
        grid=(mp // tm,),
        in_specs=[
            pl.BlockSpec((tm, c1p), lambda i: (i, 0)),
            pl.BlockSpec((c1p, two_cp), lambda i: (0, 0)),
            pl.BlockSpec((1, two_cp), lambda i: (0, 0)),
        ],
        out_specs=(pl.BlockSpec((tm, cp), lambda i: (i, 0)),
                   pl.BlockSpec((tm, cp), lambda i: (i, 0))),
        compiler_params=_compiler_params(),
    )(xp, w01, b01)
    return o0[:M], o1[:M]


# ----------------------------------------------------------------------------
# Kernel 2: fused Bottleneck = 3x3 Conv+BN+SiLU -> 3x3 Conv+BN+SiLU.
# One whole zero-halo image per grid step; the padded input and the
# intermediate activation never leave VMEM (no im2col, no HBM round trip).
# ----------------------------------------------------------------------------
def _bottleneck_kernel(x_ref, w1_ref, b1_ref, w2_ref, b2_ref, o_ref,
                       xpad, tpad, *, add_shortcut):
    _, H, W, Cp = o_ref.shape

    # Zero-halo scratch tiles (re-zeroed every step: safe under megacore grid
    # sharding, and trivially cheap next to the 18 MXU dots below).
    xpad[...] = jnp.zeros_like(xpad)
    tpad[...] = jnp.zeros_like(tpad)
    xpad[1:H + 1, 1:W + 1, :] = x_ref[0].astype(xpad.dtype)

    def conv3x3(src_pad, w_ref):       # 9 accumulating MXU dots on shifted views
        acc = None
        for t in range(9):
            kh, kw = divmod(t, 3)
            xv = src_pad[kh:kh + H, kw:kw + W, :]
            xv = xv.reshape(H * W, Cp).astype(jnp.bfloat16)
            d = jnp.dot(xv, w_ref[t], preferred_element_type=jnp.float32)
            acc = d if acc is None else acc + d
        return acc

    y1 = conv3x3(xpad, w1_ref) + b1_ref[...]
    y1 = y1 * jax.nn.sigmoid(y1)
    tpad[1:H + 1, 1:W + 1, :] = y1.reshape(H, W, Cp)

    y2 = conv3x3(tpad, w2_ref) + b2_ref[...]
    y2 = y2 * jax.nn.sigmoid(y2)
    out = y2.reshape(H, W, Cp)
    if add_shortcut:                   # unused in this config (shortcut=False)
        out = out + x_ref[0].astype(jnp.float32)
    o_ref[0] = out.astype(o_ref.dtype)


def bottleneck_call(x_nhwc, w1, b1, w2, b2, shortcut):
    N, H, W, Cp = x_nhwc.shape
    # TODO(synk): for feature maps too large for whole-image VMEM tiles, switch
    # to row tiles with a 2-row halo fetched via pl.ANY + pltpu.make_async_copy.
    kernel = functools.partial(_bottleneck_kernel, add_shortcut=shortcut)
    return pl.pallas_call(
        kernel,
        out_shape=jax.ShapeDtypeStruct((N, H, W, Cp), jnp.bfloat16),
        grid=(N,),
        in_specs=[
            pl.BlockSpec((1, H, W, Cp), lambda n: (n, 0, 0, 0)),
            # Weights/bias have constant index maps (small; default buffering kept).
            pl.BlockSpec((9, Cp, Cp), lambda n: (0, 0, 0)),
            pl.BlockSpec((1, Cp), lambda n: (0, 0)),
            pl.BlockSpec((9, Cp, Cp), lambda n: (0, 0, 0)),
            pl.BlockSpec((1, Cp), lambda n: (0, 0)),
        ],
        out_specs=pl.BlockSpec((1, H, W, Cp), lambda n: (n, 0, 0, 0)),
        scratch_shapes=[
            pltpu.VMEM((H + 2, W + 2, Cp), jnp.float32),   # zero-halo input tile
            pltpu.VMEM((H + 2, W + 2, Cp), jnp.float32),   # zero-halo intermediate
        ],
        compiler_params=_compiler_params(),
    )(x_nhwc, w1, b1, w2, b2)


# ----------------------------------------------------------------------------
# Kernel 3: final cv2 = channel-concat of all branches + 1x1 conv + BN + SiLU,
# fused as a sum of per-branch partial matmuls (no concatenated tensor in HBM).
# ----------------------------------------------------------------------------
def _make_cv2_kernel(nb):
    def kernel(*refs):
        xs = refs[:nb]
        ws = refs[nb:2 * nb]
        b_ref = refs[2 * nb]
        o_ref = refs[2 * nb + 1]
        acc = jnp.dot(xs[0][...], ws[0][...], preferred_element_type=jnp.float32)
        for xr, wr in zip(xs[1:], ws[1:]):
            acc = acc + jnp.dot(xr[...], wr[...], preferred_element_type=jnp.float32)
        y = acc + b_ref[...]
        y = y * jax.nn.sigmoid(y)
        o_ref[...] = y.astype(o_ref.dtype)
    return kernel


def cv2_call(branches, w_parts, b2):
    nb = len(branches)
    M, cp = branches[0].shape
    c2p = w_parts[0].shape[1]
    tm = _choose_tm(M)
    mp = _round_up(M, tm)
    xs = [_pad_rows(x, mp) for x in branches]
    in_specs = ([pl.BlockSpec((tm, cp), lambda i: (i, 0)) for _ in xs]
                + [pl.BlockSpec((cp, c2p), lambda i: (0, 0)) for _ in w_parts]
                + [pl.BlockSpec((1, c2p), lambda i: (0, 0))])
    out = pl.pallas_call(
        _make_cv2_kernel(nb),
        out_shape=jax.ShapeDtypeStruct((mp, c2p), jnp.bfloat16),
        grid=(mp // tm,),
        in_specs=in_specs,
        out_specs=pl.BlockSpec((tm, c2p), lambda i: (i, 0)),
        compiler_params=_compiler_params(),
    )(*xs, *w_parts, b2)
    return out[:M]


# ----------------------------------------------------------------------------
# Parameter construction (deterministic, BN folded) + one-time kernel packing.
# ----------------------------------------------------------------------------
def _fold_bn(gamma, beta, mean, var, eps=1e-3):
    scale = gamma / jnp.sqrt(var + eps)
    bias = beta - mean * scale
    return scale, bias


def _make_conv_params(key, cin, cout, ksize):
    kw, kb, km, kv, kwt = jax.random.split(key, 5)
    if ksize == 1:
        w = 0.2 * jax.random.normal(kwt, (cin, cout), jnp.float32)
    else:  # 3x3: (9, cin, cout), taps ordered kh*3 + kw
        w = 0.1 * jax.random.normal(kwt, (9, cin, cout), jnp.float32)
    gamma = 1.0 + 0.1 * jax.random.normal(kw, (cout,), jnp.float32)
    beta = 0.1 * jax.random.normal(kb, (cout,), jnp.float32)
    mean = 0.1 * jax.random.normal(km, (cout,), jnp.float32)
    var = 0.5 + jax.random.uniform(kv, (cout,), jnp.float32)
    scale, bias = _fold_bn(gamma, beta, mean, var)
    return {"w": w, "scale": scale, "bias": bias}


def make_c2f_v2_params(key, c1, c2, n=1, e=0.5):
    c = int(c2 * e)
    keys = jax.random.split(key, 3 + 2 * n)
    params = {
        "cv0": _make_conv_params(keys[0], c1, c, 1),
        "cv1": _make_conv_params(keys[1], c1, c, 1),
        "cv2": _make_conv_params(keys[2], (2 + n) * c, c2, 1),
        "m": [],
    }
    for i in range(n):
        params["m"].append({
            "cv1": _make_conv_params(keys[3 + 2 * i], c, c, 3),
            "cv2": _make_conv_params(keys[4 + 2 * i], c, c, 3),
        })
    return params


def prepare_c2f_v2_params(params):
    """One-time packing (outside jit): fold BN scale into bf16 weights, zero-pad
    channel dims to LANE multiples, split cv2 into per-branch weight blocks.
    Padded output lanes get zero weights AND zero bias so SiLU(0)=0 keeps them
    zero through the whole chain (required by the cv2 partial-sum fusion)."""
    c1 = params["cv0"]["w"].shape[0]
    c = params["cv0"]["w"].shape[1]
    c2 = params["cv2"]["w"].shape[1]
    n = len(params["m"])
    c1p = _round_up(c1, LANE)
    cp = _round_up(c, LANE)
    c2p = _round_up(c2, LANE)
    f32 = jnp.float32

    def fold_1x1(p, cinp, coutp):
        wf = p["w"] * p["scale"][None, :]
        w = jnp.zeros((cinp, coutp), f32).at[:wf.shape[0], :wf.shape[1]].set(wf)
        return w.astype(jnp.bfloat16)

    def fold_3x3(p, chp):
        wf = p["w"] * p["scale"][None, None, :]
        w = jnp.zeros((9, chp, chp), f32).at[:, :wf.shape[1], :wf.shape[2]].set(wf)
        return w.astype(jnp.bfloat16)

    def pad_bias(b, coutp):
        return jnp.zeros((1, coutp), f32).at[0, :b.shape[0]].set(b)

    packed = {
        "w01": jnp.concatenate([fold_1x1(params["cv0"], c1p, cp),
                                fold_1x1(params["cv1"], c1p, cp)], axis=1),
        "b01": jnp.concatenate([pad_bias(params["cv0"]["bias"], cp),
                                pad_bias(params["cv1"]["bias"], cp)], axis=1),
        "m": [],
        "w_cv2": [],
        "b2": pad_bias(params["cv2"]["bias"], c2p),
    }
    for bp in params["m"]:
        packed["m"].append({
            "w1": fold_3x3(bp["cv1"], cp), "b1": pad_bias(bp["cv1"]["bias"], cp),
            "w2": fold_3x3(bp["cv2"], cp), "b2": pad_bias(bp["cv2"]["bias"], cp),
        })
    w2f = params["cv2"]["w"] * params["cv2"]["scale"][None, :]
    for i in range(2 + n):
        wi = jnp.zeros((cp, c2p), f32).at[:c, :c2].set(w2f[i * c:(i + 1) * c])
        packed["w_cv2"].append(wi.astype(jnp.bfloat16))
    return packed


# ----------------------------------------------------------------------------
# C2f_v2 forward
# ----------------------------------------------------------------------------
@functools.partial(jax.jit, static_argnames=("c2", "shortcut"))
def c2f_v2_forward(x_nchw, packed, c2, shortcut=False):
    N, C1, H, W = x_nchw.shape
    c1p = packed["w01"].shape[0]
    cp = packed["w01"].shape[1] // 2

    # bf16 BEFORE the layout change: halves the transpose/pad HBM traffic.
    x = x_nchw.astype(jnp.bfloat16)
    x = jnp.transpose(x, (0, 2, 3, 1))                         # NCHW -> NHWC
    if c1p > C1:
        x = jnp.pad(x, ((0, 0), (0, 0), (0, 0), (0, c1p - C1)))
    M = N * H * W
    x2d = x.reshape(M, c1p)

    # cv0 + cv1: one kernel, two lane-dense outputs (no post-hoc slice copy).
    y0, y1 = cv01_call(x2d, packed["w01"], packed["b01"])

    branches = [y0, y1]
    cur = y1.reshape(N, H, W, cp)
    for bp in packed["m"]:
        cur = bottleneck_call(cur, bp["w1"], bp["b1"], bp["w2"], bp["b2"], shortcut)
        branches.append(cur.reshape(M, cp))

    # Final cv2: concat + 1x1 conv fused as per-branch partial-matmul sum.
    out2d = cv2_call(branches, packed["w_cv2"], packed["b2"])   # (M, C2p) bf16
    out = out2d[:, :c2].reshape(N, H, W, c2)
    # TODO(synk): when real channel counts are << LANE (demo: c=2), repack
    # spatial positions into lanes instead of zero-padding channels to 128.
    return jnp.transpose(out, (0, 3, 1, 2)).astype(jnp.float32)


# ----------------------------------------------------------------------------
# Pure-JAX (XLA) float32 reference for correctness checking.
# ----------------------------------------------------------------------------
def _ref_conv(x_nhwc, p, ksize):
    if ksize == 1:
        y = jnp.einsum("nhwc,cd->nhwd", x_nhwc, p["w"])
    else:
        w4 = p["w"].reshape(3, 3, p["w"].shape[1], p["w"].shape[2])   # HWIO
        y = jax.lax.conv_general_dilated(
            x_nhwc, w4, window_strides=(1, 1), padding="SAME",
            dimension_numbers=("NHWC", "HWIO", "NHWC"))
    y = y * p["scale"] + p["bias"]
    return y * jax.nn.sigmoid(y)


def c2f_v2_reference(x_nchw, params, shortcut=False):
    x = jnp.transpose(x_nchw, (0, 2, 3, 1)).astype(jnp.float32)
    ys = [_ref_conv(x, params["cv0"], 1), _ref_conv(x, params["cv1"], 1)]
    for bp in params["m"]:
        t = _ref_conv(ys[-1], bp["cv1"], 3)
        out = _ref_conv(t, bp["cv2"], 3)
        ys.append(ys[-1] + out if shortcut else out)
    cat = jnp.concatenate(ys, axis=-1)
    out = _ref_conv(cat, params["cv2"], 1)
    return jnp.transpose(out, (0, 3, 1, 2))


# ----------------------------------------------------------------------------
# Main
# ----------------------------------------------------------------------------
if __name__ == "__main__":
    key = jax.random.PRNGKey(0)
    k_x, k_p = jax.random.split(key)

    # Small, module-consistent shapes: C2f_v2(c1=4, c2=4, n=1) on (2, 4, 16, 16).
    N, C1, H, W = 2, 4, 16, 16
    C2, n = 4, 1

    x = jax.random.normal(k_x, (N, C1, H, W), jnp.float32)
    params = make_c2f_v2_params(k_p, C1, C2, n=n, e=0.5)
    packed = prepare_c2f_v2_params(params)          # one-time packing, outside jit

    out = c2f_v2_forward(x, packed, c2=C2, shortcut=False)
    out = jax.block_until_ready(out)

    assert out.shape == (N, C2, H, W), out.shape
    assert bool(jnp.all(jnp.isfinite(out)))

    # Compare against a float32 XLA reference (input pre-rounded to bf16 to
    # match the kernels' MXU operand precision; bf16 ops => loose tolerance).
    x_bf = x.astype(jnp.bfloat16).astype(jnp.float32)
    ref = c2f_v2_reference(x_bf, params, shortcut=False)
    max_err = float(jnp.max(jnp.abs(out - ref)))
    assert max_err < 5e-2, f"max abs error vs reference: {max_err}"

    print("KERNEL_OK")
</pallas_src>

<mosaic_0001>
module attributes {stable_mosaic.version = 11 : i64} {
  func.func @_cv01_kernel(%arg0: i32, %arg1: memref<256x128xbf16, #tpu.memory_space<vmem>>, %arg2: memref<128x256xbf16, #tpu.memory_space<vmem>>, %arg3: memref<1x256xf32, #tpu.memory_space<vmem>>, %arg4: memref<256x128xbf16, #tpu.memory_space<vmem>>, %arg5: memref<256x128xbf16, #tpu.memory_space<vmem>>) attributes {dimension_semantics = [#tpu.dimension_semantics<parallel>], iteration_bounds = array<i64: 2>, scalar_prefetch = 0 : i64, scratch_operands = 0 : i64, tpu.core_type = #tpu.core_type<tc>, window_params = [{transform_indices = @transform_0, window_bounds = array<i64: 256, 128>}, {pipeline_mode = #tpu.pipeline_mode<synchronous>, transform_indices = @transform_1, window_bounds = array<i64: 128, 256>}, {pipeline_mode = #tpu.pipeline_mode<synchronous>, transform_indices = @transform_2, window_bounds = array<i64: 1, 256>}, {transform_indices = @transform_3, window_bounds = array<i64: 256, 128>}, {transform_indices = @transform_4, window_bounds = array<i64: 256, 128>}]} {
    %c0 = arith.constant 0 : index
    %c0_0 = arith.constant 0 : index
    %0 = vector.load %arg1[%c0, %c0_0] : memref<256x128xbf16, #tpu.memory_space<vmem>>, vector<256x128xbf16>
    %c0_1 = arith.constant 0 : index
    %c0_2 = arith.constant 0 : index
    %1 = vector.load %arg2[%c0_1, %c0_2] : memref<128x256xbf16, #tpu.memory_space<vmem>>, vector<128x256xbf16>
    %cst = arith.constant dense<0.000000e+00> : vector<256x256xf32>
    %2 = tpu.matmul %0, %1, %cst {dimension_numbers = #tpu.dot_dimension_numbers<[1], [0], [0], [1], [0, 0, 1, 1], [], []>} : vector<256x128xbf16>, vector<128x256xbf16>, vector<256x256xf32> -> vector<256x256xf32>
    %c0_3 = arith.constant 0 : index
    %c0_4 = arith.constant 0 : index
    %3 = vector.load %arg3[%c0_3, %c0_4] : memref<1x256xf32, #tpu.memory_space<vmem>>, vector<1x256xf32>
    %4 = vector.broadcast %3 : vector<1x256xf32> to vector<256x256xf32>
    %5 = arith.addf %2, %4 : vector<256x256xf32>
    %6 = arith.negf %5 : vector<256x256xf32>
    %7 = math.exp %6 : vector<256x256xf32>
    %cst_5 = arith.constant 1.000000e+00 : f32
    %8 = vector.broadcast %cst_5 : f32 to vector<256x256xf32>
    %9 = arith.addf %8, %7 : vector<256x256xf32>
    %10 = arith.divf %8, %9 : vector<256x256xf32>
    %11 = arith.mulf %5, %10 : vector<256x256xf32>
    %12 = vector.extract_strided_slice %11 {offsets = [0, 0], sizes = [256, 128], strides = [1, 1]} : vector<256x256xf32> to vector<256x128xf32>
    %13 = arith.truncf %12 : vector<256x128xf32> to vector<256x128xbf16>
    %c0_6 = arith.constant 0 : index
    %c0_7 = arith.constant 0 : index
    %14 = vector.load %arg4[%c0_6, %c0_7] : memref<256x128xbf16, #tpu.memory_space<vmem>>, vector<256x128xbf16>
    tpu.vector_store %arg4[%c0_6, %c0_7], %13 {strides = array<i32>} : memref<256x128xbf16, #tpu.memory_space<vmem>>, vector<256x128xbf16>,
    %15 = vector.extract_strided_slice %11 {offsets = [0, 128], sizes = [256, 128], strides = [1, 1]} : vector<256x256xf32> to vector<256x128xf32>
    %16 = arith.truncf %15 : vector<256x128xf32> to vector<256x128xbf16>
    %c0_8 = arith.constant 0 : index
    %c0_9 = arith.constant 0 : index
    %17 = vector.load %arg5[%c0_8, %c0_9] : memref<256x128xbf16, #tpu.memory_space<vmem>>, vector<256x128xbf16>
    tpu.vector_store %arg5[%c0_8, %c0_9], %16 {strides = array<i32>} : memref<256x128xbf16, #tpu.memory_space<vmem>>, vector<256x128xbf16>,
    return
  }
  func.func @transform_0(%arg0: i32) -> (i32, i32) {
    %c0_i32 = arith.constant 0 : i32
    %c0_i32_0 = arith.constant 0 : i32
    return %arg0, %c0_i32 : i32, i32
  }
  func.func @transform_1(%arg0: i32) -> (i32, i32) {
    %c0_i32 = arith.constant 0 : i32
    %c0_i32_0 = arith.constant 0 : i32
    %c0_i32_1 = arith.constant 0 : i32
    return %c0_i32, %c0_i32_0 : i32, i32
  }
  func.func @transform_2(%arg0: i32) -> (i32, i32) {
    %c0_i32 = arith.constant 0 : i32
    %c0_i32_0 = arith.constant 0 : i32
    %c0_i32_1 = arith.constant 0 : i32
    return %c0_i32, %c0_i32_0 : i32, i32
  }
  func.func @transform_3(%arg0: i32) -> (i32, i32) {
    %c0_i32 = arith.constant 0 : i32
    %c0_i32_0 = arith.constant 0 : i32
    return %arg0, %c0_i32 : i32, i32
  }
  func.func @transform_4(%arg0: i32) -> (i32, i32) {
    %c0_i32 = arith.constant 0 : i32
    %c0_i32_0 = arith.constant 0 : i32
    return %arg0, %c0_i32 : i32, i32
  }
}

module attributes {stable_mosaic.version = 11 : i64} {
  func.func @_bottleneck_kernel(%arg0: i32, %arg1: memref<1x16x16x128xbf16, #tpu.memory_space<vmem>>, %arg2: memref<9x128x128xbf16, #tpu.memory_space<vmem>>, %arg3: memref<1x128xf32, #tpu.memory_space<vmem>>, %arg4: memref<9x128x128xbf16, #tpu.memory_space<vmem>>, %arg5: memref<1x128xf32, #tpu.memory_space<vmem>>, %arg6: memref<1x16x16x128xbf16, #tpu.memory_space<vmem>>, %arg7: memref<18x18x128xf32, #tpu.memory_space<vmem>>, %arg8: memref<18x18x128xf32, #tpu.memory_space<vmem>>) attributes {dimension_semantics = [#tpu.dimension_semantics<parallel>], iteration_bounds = array<i64: 2>, scalar_prefetch = 0 : i64, scratch_operands = 2 : i64, tpu.core_type = #tpu.core_type<tc>, window_params = [{transform_indices = @transform_0, window_bounds = array<i64: 1, 16, 16, 128>}, {pipeline_mode = #tpu.pipeline_mode<synchronous>, transform_indices = @transform_1, window_bounds = array<i64: 9, 128, 128>}, {pipeline_mode = #tpu.pipeline_mode<synchronous>, transform_indices = @transform_2, window_bounds = array<i64: 1, 128>}, {pipeline_mode = #tpu.pipeline_mode<synchronous>, transform_indices = @transform_3, window_bounds = array<i64: 9, 128, 128>}, {pipeline_mode = #tpu.pipeline_mode<synchronous>, transform_indices = @transform_4, window_bounds = array<i64: 1, 128>}, {transform_indices = @transform_5, window_bounds = array<i64: 1, 16, 16, 128>}]} {
    %cst = arith.constant 0.000000e+00 : f32
    %0 = vector.broadcast %cst : f32 to vector<18x18x128xf32>
    %c0 = arith.constant 0 : index
    %c0_0 = arith.constant 0 : index
    %c0_1 = arith.constant 0 : index
    %1 = vector.load %arg7[%c0, %c0_0, %c0_1] : memref<18x18x128xf32, #tpu.memory_space<vmem>>, vector<18x18x128xf32>
    tpu.vector_store %arg7[%c0, %c0_0, %c0_1], %0 {strides = array<i32>} : memref<18x18x128xf32, #tpu.memory_space<vmem>>, vector<18x18x128xf32>,
    %cst_2 = arith.constant 0.000000e+00 : f32
    %2 = vector.broadcast %cst_2 : f32 to vector<18x18x128xf32>
    %c0_3 = arith.constant 0 : index
    %c0_4 = arith.constant 0 : index
    %c0_5 = arith.constant 0 : index
    %3 = vector.load %arg8[%c0_3, %c0_4, %c0_5] : memref<18x18x128xf32, #tpu.memory_space<vmem>>, vector<18x18x128xf32>
    tpu.vector_store %arg8[%c0_3, %c0_4, %c0_5], %2 {strides = array<i32>} : memref<18x18x128xf32, #tpu.memory_space<vmem>>, vector<18x18x128xf32>,
    %c0_6 = arith.constant 0 : index
    %c0_7 = arith.constant 0 : index
    %c0_8 = arith.constant 0 : index
    %c0_9 = arith.constant 0 : index
    %4 = vector.load %arg1[%c0_6, %c0_7, %c0_8, %c0_9] : memref<1x16x16x128xbf16, #tpu.memory_space<vmem>>, vector<1x16x16x128xbf16>
    %5 = vector.shape_cast %4 : vector<1x16x16x128xbf16> to vector<16x16x128xbf16>
    %6 = arith.extf %5 : vector<16x16x128xbf16> to vector<16x16x128xf32>
    %c1 = arith.constant 1 : index
    %c1_10 = arith.constant 1 : index
    %c0_11 = arith.constant 0 : index
    %7 = vector.load %arg7[%c1, %c1_10, %c0_11] : memref<18x18x128xf32, #tpu.memory_space<vmem>>, vector<16x16x128xf32>
    tpu.vector_store %arg7[%c1, %c1_10, %c0_11], %6 {strides = array<i32>} : memref<18x18x128xf32, #tpu.memory_space<vmem>>, vector<16x16x128xf32>,
    %c0_12 = arith.constant 0 : index
    %c0_13 = arith.constant 0 : index
    %c0_14 = arith.constant 0 : index
    %8 = vector.load %arg7[%c0_12, %c0_13, %c0_14] : memref<18x18x128xf32, #tpu.memory_space<vmem>>, vector<16x16x128xf32>
    %9 = vector.shape_cast %8 : vector<16x16x128xf32> to vector<256x128xf32>
    %10 = arith.truncf %9 : vector<256x128xf32> to vector<256x128xbf16>
    %c0_15 = arith.constant 0 : index
    %c0_16 = arith.constant 0 : index
    %c0_17 = arith.constant 0 : index
    %11 = vector.load %arg2[%c0_15, %c0_16, %c0_17] : memref<9x128x128xbf16, #tpu.memory_space<vmem>>, vector<1x128x128xbf16>
    %12 = vector.shape_cast %11 : vector<1x128x128xbf16> to vector<128x128xbf16>
    %cst_18 = arith.constant dense<0.000000e+00> : vector<256x128xf32>
    %13 = tpu.matmul %10, %12, %cst_18 {dimension_numbers = #tpu.dot_dimension_numbers<[1], [0], [0], [1], [0, 0, 1, 1], [], []>} : vector<256x128xbf16>, vector<128x128xbf16>, vector<256x128xf32> -> vector<256x128xf32>
    %c0_19 = arith.constant 0 : index
    %c1_20 = arith.constant 1 : index
    %c0_21 = arith.constant 0 : index
    %14 = vector.load %arg7[%c0_19, %c1_20, %c0_21] : memref<18x18x128xf32, #tpu.memory_space<vmem>>, vector<16x16x128xf32>
    %15 = vector.shape_cast %14 : vector<16x16x128xf32> to vector<256x128xf32>
    %16 = arith.truncf %15 : vector<256x128xf32> to vector<256x128xbf16>
    %c1_22 = arith.constant 1 : index
    %c0_23 = arith.constant 0 : index
    %c0_24 = arith.constant 0 : index
    %17 = vector.load %arg2[%c1_22, %c0_23, %c0_24] : memref<9x128x128xbf16, #tpu.memory_space<vmem>>, vector<1x128x128xbf16>
    %18 = vector.shape_cast %17 : vector<1x128x128xbf16> to vector<128x128xbf16>
    %cst_25 = arith.constant dense<0.000000e+00> : vector<256x128xf32>
    %19 = tpu.matmul %16, %18, %cst_25 {dimension_numbers = #tpu.dot_dimension_numbers<[1], [0], [0], [1], [0, 0, 1, 1], [], []>} : vector<256x128xbf16>, vector<128x128xbf16>, vector<256x128xf32> -> vector<256x128xf32>
    %20 = arith.addf %13, %19 : vector<256x128xf32>
    %c0_26 = arith.constant 0 : index
    %c2 = arith.constant 2 : index
    %c0_27 = arith.constant 0 : index
    %21 = vector.load %arg7[%c0_26, %c2, %c0_27] : memref<18x18x128xf32, #tpu.memory_space<vmem>>, vector<16x16x128xf32>
    %22 = vector.shape_cast %21 : vector<16x16x128xf32> to vector<256x128xf32>
    %23 = arith.truncf %22 : vector<256x128xf32> to vector<256x128xbf16>
    %c2_28 = arith.constant 2 : index
    %c0_29 = arith.constant 0 : index
    %c0_30 = arith.constant 0 : index
    %24 = vector.load %arg2[%c2_28, %c0_29, %c0_30] : memref<9x128x128xbf16, #tpu.memory_space<vmem>>, vector<1x128x128xbf16>
    %25 = vector.shape_cast %24 : vector<1x128x128xbf16> to vector<128x128xbf16>
    %cst_31 = arith.constant dense<0.000000e+00> : vector<256x128xf32>
    %26 = tpu.matmul %23, %25, %cst_31 {dimension_numbers = #tpu.dot_dimension_numbers<[1], [0], [0], [1], [0, 0, 1, 1], [], []>} : vector<256x128xbf16>, vector<128x128xbf16>, vector<256x128xf32> -> vector<256x128xf32>
    %27 = arith.addf %20, %26 : vector<256x128xf32>
    %c1_32 = arith.constant 1 : index
    %c0_33 = arith.constant 0 : index
    %c0_34 = arith.constant 0 : index
    %28 = vector.load %arg7[%c1_32, %c0_33, %c0_34] : memref<18x18x128xf32, #tpu.memory_space<vmem>>, vector<16x16x128xf32>
    %29 = vector.shape_cast %28 : vector<16x16x128xf32> to vector<256x128xf32>
    %30 = arith.truncf %29 : vector<256x128xf32> to vector<256x128xbf16>
    %c3 = arith.constant 3 : index
    %c0_35 = arith.constant 0 : index
    %c0_36 = arith.constant 0 : index
    %31 = vector.load %arg2[%c3, %c0_35, %c0_36] : memref<9x128x128xbf16, #tpu.memory_space<vmem>>, vector<1x128x128xbf16>
    %32 = vector.shape_cast %31 : vector<1x128x128xbf16> to vector<128x128xbf16>
    %cst_37 = arith.constant dense<0.000000e+00> : vector<256x128xf32>
    %33 = tpu.matmul %30, %32, %cst_37 {dimension_numbers = #tpu.dot_dimension_numbers<[1], [0], [0], [1], [0, 0, 1, 1], [], []>} : vector<256x128xbf16>, vector<128x128xbf16>, vector<256x128xf32> -> vector<256x128xf32>
    %34 = arith.addf %27, %33 : vector<256x128xf32>
    %c1_38 = arith.constant 1 : index
    %c1_39 = arith.constant 1 : index
    %c0_40 = arith.constant 0 : index
    %35 = vector.load %arg7[%c1_38, %c1_39, %c0_40] : memref<18x18x128xf32, #tpu.memory_space<vmem>>, vector<16x16x128xf32>
    %36 = vector.shape_cast %35 : vector<16x16x128xf32> to vector<256x128xf32>
    %37 = arith.truncf %36 : vector<256x128xf32> to vector<256x128xbf16>
    %c4 = arith.constant 4 : index
    %c0_41 = arith.constant 0 : index
    %c0_42 = arith.constant 0 : index
    %38 = vector.load %arg2[%c4, %c0_41, %c0_42] : memref<9x128x128xbf16, #tpu.memory_space<vmem>>, vector<1x128x128xbf16>
    %39 = vector.shape_cast %38 : vector<1x128x128xbf16> to vector<128x128xbf16>
    %cst_43 = arith.constant dense<0.000000e+00> : vector<256x128xf32>
    %40 = tpu.matmul %37, %39, %cst_43 {dimension_numbers = #tpu.dot_dimension_numbers<[1], [0], [0], [1], [0, 0, 1, 1], [], []>} : vector<256x128xbf16>, vector<128x128xbf16>, vector<256x128xf32> -> vector<256x128xf32>
    %41 = arith.addf %34, %40 : vector<256x128xf32>
    %c1_44 = arith.constant 1 : index
    %c2_45 = arith.constant 2 : index
    %c0_46 = arith.constant 0 : index
    %42 = vector.load %arg7[%c1_44, %c2_45, %c0_46] : memref<18x18x128xf32, #tpu.memory_space<vmem>>, vector<16x16x128xf32>
    %43 = vector.shape_cast %42 : vector<16x16x128xf32> to vector<256x128xf32>
    %44 = arith.truncf %43 : vector<256x128xf32> to vector<256x128xbf16>
    %c5 = arith.constant 5 : index
    %c0_47 = arith.constant 0 : index
    %c0_48 = arith.constant 0 : index
    %45 = vector.load %arg2[%c5, %c0_47, %c0_48] : memref<9x128x128xbf16, #tpu.memory_space<vmem>>, vector<1x128x128xbf16>
    %46 = vector.shape_cast %45 : vector<1x128x128xbf16> to vector<128x128xbf16>
    %cst_49 = arith.constant dense<0.000000e+00> : vector<256x128xf32>
    %47 = tpu.matmul %44, %46, %cst_49 {dimension_numbers = #tpu.dot_dimension_numbers<[1], [0], [0], [1], [0, 0, 1, 1], [], []>} : vector<256x128xbf16>, vector<128x128xbf16>, vector<256x128xf32> -> vector<256x128xf32>
    %48 = arith.addf %41, %47 : vector<256x128xf32>
    %c2_50 = arith.constant 2 : index
    %c0_51 = arith.constant 0 : index
    %c0_52 = arith.constant 0 : index
    %49 = vector.load %arg7[%c2_50, %c0_51, %c0_52] : memref<18x18x128xf32, #tpu.memory_space<vmem>>, vector<16x16x128xf32>
    %50 = vector.shape_cast %49 : vector<16x16x128xf32> to vector<256x128xf32>
    %51 = arith.truncf %50 : vector<256x128xf32> to vector<256x128xbf16>
    %c6 = arith.constant 6 : index
    %c0_53 = arith.constant 0 : index
    %c0_54 = arith.constant 0 : index
    %52 = vector.load %arg2[%c6, %c0_53, %c0_54] : memref<9x128x128xbf16, #tpu.memory_space<vmem>>, vector<1x128x128xbf16>
    %53 = vector.shape_cast %52 : vector<1x128x128xbf16> to vector<128x128xbf16>
    %cst_55 = arith.constant dense<0.000000e+00> : vector<256x128xf32>
    %54 = tpu.matmul %51, %53, %cst_55 {dimension_numbers = #tpu.dot_dimension_numbers<[1], [0], [0], [1], [0, 0, 1, 1], [], []>} : vector<256x128xbf16>, vector<128x128xbf16>, vector<256x128xf32> -> vector<256x128xf32>
    %55 = arith.addf %48, %54 : vector<256x128xf32>
    %c2_56 = arith.constant 2 : index
    %c1_57 = arith.constant 1 : index
    %c0_58 = arith.constant 0 : index
    %56 = vector.load %arg7[%c2_56, %c1_57, %c0_58] : memref<18x18x128xf32, #tpu.memory_space<vmem>>, vector<16x16x128xf32>
    %57 = vector.shape_cast %56 : vector<16x16x128xf32> to vector<256x128xf32>
    %58 = arith.truncf %57 : vector<256x128xf32> to vector<256x128xbf16>
    %c7 = arith.constant 7 : index
    %c0_59 = arith.constant 0 : index
    %c0_60 = arith.constant 0 : index
    %59 = vector.load %arg2[%c7, %c0_59, %c0_60] : memref<9x128x128xbf16, #tpu.memory_space<vmem>>, vector<1x128x128xbf16>
    %60 = vector.shape_cast %59 : vector<1x128x128xbf16> to vector<128x128xbf16>
    %cst_61 = arith.constant dense<0.000000e+00> : vector<256x128xf32>
    %61 = tpu.matmul %58, %60, %cst_61 {dimension_numbers = #tpu.dot_dimension_numbers<[1], [0], [0], [1], [0, 0, 1, 1], [], []>} : vector<256x128xbf16>, vector<128x128xbf16>, vector<256x128xf32> -> vector<256x128xf32>
    %62 = arith.addf %55, %61 : vector<256x128xf32>
    %c2_62 = arith.constant 2 : index
    %c2_63 = arith.constant 2 : index
    %c0_64 = arith.constant 0 : index
    %63 = vector.load %arg7[%c2_62, %c2_63, %c0_64] : memref<18x18x128xf32, #tpu.memory_space<vmem>>, vector<16x16x128xf32>
    %64 = vector.shape_cast %63 : vector<16x16x128xf32> to vector<256x128xf32>
    %65 = arith.truncf %64 : vector<256x128xf32> to vector<256x128xbf16>
    %c8 = arith.constant 8 : index
    %c0_65 = arith.constant 0 : index
    %c0_66 = arith.constant 0 : index
    %66 = vector.load %arg2[%c8, %c0_65, %c0_66] : memref<9x128x128xbf16, #tpu.memory_space<vmem>>, vector<1x128x128xbf16>
    %67 = vector.shape_cast %66 : vector<1x128x128xbf16> to vector<128x128xbf16>
    %cst_67 = arith.constant dense<0.000000e+00> : vector<256x128xf32>
    %68 = tpu.matmul %65, %67, %cst_67 {dimension_numbers = #tpu.dot_dimension_numbers<[1], [0], [0], [1], [0, 0, 1, 1], [], []>} : vector<256x128xbf16>, vector<128x128xbf16>, vector<256x128xf32> -> vector<256x128xf32>
    %69 = arith.addf %62, %68 : vector<256x128xf32>
    %c0_68 = arith.constant 0 : index
    %c0_69 = arith.constant 0 : index
    %70 = vector.load %arg3[%c0_68, %c0_69] : memref<1x128xf32, #tpu.memory_space<vmem>>, vector<1x128xf32>
    %71 = vector.broadcast %70 : vector<1x128xf32> to vector<256x128xf32>
    %72 = arith.addf %69, %71 : vector<256x128xf32>
    %73 = arith.negf %72 : vector<256x128xf32>
    %74 = math.exp %73 : vector<256x128xf32>
    %cst_70 = arith.constant 1.000000e+00 : f32
    %75 = vector.broadcast %cst_70 : f32 to vector<256x128xf32>
    %76 = arith.addf %75, %74 : vector<256x128xf32>
    %77 = arith.divf %75, %76 : vector<256x128xf32>
    %78 = arith.mulf %72, %77 : vector<256x128xf32>
    %79 = vector.shape_cast %78 : vector<256x128xf32> to vector<16x16x128xf32>
    %c1_71 = arith.constant 1 : index
    %c1_72 = arith.constant 1 : index
    %c0_73 = arith.constant 0 : index
    %80 = vector.load %arg8[%c1_71, %c1_72, %c0_73] : memref<18x18x128xf32, #tpu.memory_space<vmem>>, vector<16x16x128xf32>
    tpu.vector_store %arg8[%c1_71, %c1_72, %c0_73], %79 {strides = array<i32>} : memref<18x18x128xf32, #tpu.memory_space<vmem>>, vector<16x16x128xf32>,
    %c0_74 = arith.constant 0 : index
    %c0_75 = arith.constant 0 : index
    %c0_76 = arith.constant 0 : index
    %81 = vector.load %arg8[%c0_74, %c0_75, %c0_76] : memref<18x18x128xf32, #tpu.memory_space<vmem>>, vector<16x16x128xf32>
    %82 = vector.shape_cast %81 : vector<16x16x128xf32> to vector<256x128xf32>
    %83 = arith.truncf %82 : vector<256x128xf32> to vector<256x128xbf16>
    %c0_77 = arith.constant 0 : index
    %c0_78 = arith.constant 0 : index
    %c0_79 = arith.constant 0 : index
    %84 = vector.load %arg4[%c0_77, %c0_78, %c0_79] : memref<9x128x128xbf16, #tpu.memory_space<vmem>>, vector<1x128x128xbf16>
    %85 = vector.shape_cast %84 : vector<1x128x128xbf16> to vector<128x128xbf16>
    %cst_80 = arith.constant dense<0.000000e+00> : vector<256x128xf32>
    %86 = tpu.matmul %83, %85, %cst_80 {dimension_numbers = #tpu.dot_dimension_numbers<[1], [0], [0], [1], [0, 0, 1, 1], [], []>} : vector<256x128xbf16>, vector<128x128xbf16>, vector<256x128xf32> -> vector<256x128xf32>
    %c0_81 = arith.constant 0 : index
    %c1_82 = arith.constant 1 : index
    %c0_83 = arith.constant 0 : index
    %87 = vector.load %arg8[%c0_81, %c1_82, %c0_83] : memref<18x18x128xf32, #tpu.memory_space<vmem>>, vector<16x16x128xf32>
    %88 = vector.shape_cast %87 : vector<16x16x128xf32> to vector<256x128xf32>
    %89 = arith.truncf %88 : vector<256x128xf32> to vector<256x128xbf16>
    %c1_84 = arith.constant 1 : index
    %c0_85 = arith.constant 0 : index
    %c0_86 = arith.constant 0 : index
    %90 = vector.load %arg4[%c1_84, %c0_85, %c0_86] : memref<9x128x128xbf16, #tpu.memory_space<vmem>>, vector<1x128x128xbf16>
    %91 = vector.shape_cast %90 : vector<1x128x128xbf16> to vector<128x128xbf16>
    %cst_87 = arith.constant dense<0.000000e+00> : vector<256x128xf32>
    %92 = tpu.matmul %89, %91, %cst_87 {dimension_numbers = #tpu.dot_dimension_numbers<[1], [0], [0], [1], [0, 0, 1, 1], [], []>} : vector<256x128xbf16>, vector<128x128xbf16>, vector<256x128xf32> -> vector<256x128xf32>
    %93 = arith.addf %86, %92 : vector<256x128xf32>
    %c0_88 = arith.constant 0 : index
    %c2_89 = arith.constant 2 : index
    %c0_90 = arith.constant 0 : index
    %94 = vector.load %arg8[%c0_88, %c2_89, %c0_90] : memref<18x18x128xf32, #tpu.memory_space<vmem>>, vector<16x16x128xf32>
    %95 = vector.shape_cast %94 : vector<16x16x128xf32> to vector<256x128xf32>
    %96 = arith.truncf %95 : vector<256x128xf32> to vector<256x128xbf16>
    %c2_91 = arith.constant 2 : index
    %c0_92 = arith.constant 0 : index
    %c0_93 = arith.constant 0 : index
    %97 = vector.load %arg4[%c2_91, %c0_92, %c0_93] : memref<9x128x128xbf16, #tpu.memory_space<vmem>>, vector<1x128x128xbf16>
    %98 = vector.shape_cast %97 : vector<1x128x128xbf16> to vector<128x128xbf16>
    %cst_94 = arith.constant dense<0.000000e+00> : vector<256x128xf32>
    %99 = tpu.matmul %96, %98, %cst_94 {dimension_numbers = #tpu.dot_dimension_numbers<[1], [0], [0], [1], [0, 0, 1, 1], [], []>} : vector<256x128xbf16>, vector<128x128xbf16>, vector<256x128xf32> -> vector<256x128xf32>
    %100 = arith.addf %93, %99 : vector<256x128xf32>
    %c1_95 = arith.constant 1 : index
    %c0_96 = arith.constant 0 : index
    %c0_97 = arith.constant 0 : index
    %101 = vector.load %arg8[%c1_95, %c0_96, %c0_97] : memref<18x18x128xf32, #tpu.memory_space<vmem>>, vector<16x16x128xf32>
    %102 = vector.shape_cast %101 : vector<16x16x128xf32> to vector<256x128xf32>
    %103 = arith.truncf %102 : vector<256x128xf32> to vector<256x128xbf16>
    %c3_98 = arith.constant 3 : index
    %c0_99 = arith.constant 0 : index
    %c0_100 = arith.constant 0 : index
    %104 = vector.load %arg4[%c3_98, %c0_99, %c0_100] : memref<9x128x128xbf16, #tpu.memory_space<vmem>>, vector<1x128x128xbf16>
    %105 = vector.shape_cast %104 : vector<1x128x128xbf16> to vector<128x128xbf16>
    %cst_101 = arith.constant dense<0.000000e+00> : vector<256x128xf32>
    %106 = tpu.matmul %103, %105, %cst_101 {dimension_numbers = #tpu.dot_dimension_numbers<[1], [0], [0], [1], [0, 0, 1, 1], [], []>} : vector<256x128xbf16>, vector<128x128xbf16>, vector<256x128xf32> -> vector<256x128xf32>
    %107 = arith.addf %100, %106 : vector<256x128xf32>
    %c1_102 = arith.constant 1 : index
    %c1_103 = arith.constant 1 : index
    %c0_104 = arith.constant 0 : index
    %108 = vector.load %arg8[%c1_102, %c1_103, %c0_104] : memref<18x18x128xf32, #tpu.memory_space<vmem>>, vector<16x16x128xf32>
    %109 = vector.shape_cast %108 : vector<16x16x128xf32> to vector<256x128xf32>
    %110 = arith.truncf %109 : vector<256x128xf32> to vector<256x128xbf16>
    %c4_105 = arith.constant 4 : index
    %c0_106 = arith.constant 0 : index
    %c0_107 = arith.constant 0 : index
    %111 = vector.load %arg4[%c4_105, %c0_106, %c0_107] : memref<9x128x128xbf16, #tpu.memory_space<vmem>>, vector<1x128x128xbf16>
    %112 = vector.shape_cast %111 : vector<1x128x128xbf16> to vector<128x128xbf16>
    %cst_108 = arith.constant dense<0.000000e+00> : vector<256x128xf32>
    %113 = tpu.matmul %110, %112, %cst_108 {dimension_numbers = #tpu.dot_dimension_numbers<[1], [0], [0], [1], [0, 0, 1, 1], [], []>} : vector<256x128xbf16>, vector<128x128xbf16>, vector<256x128xf32> -> vector<256x128xf32>
    %114 = arith.addf %107, %113 : vector<256x128xf32>
    %c1_109 = arith.constant 1 : index
    %c2_110 = arith.constant 2 : index
    %c0_111 = arith.constant 0 : index
    %115 = vector.load %arg8[%c1_109, %c2_110, %c0_111] : memref<18x18x128xf32, #tpu.memory_space<vmem>>, vector<16x16x128xf32>
    %116 = vector.shape_cast %115 : vector<16x16x128xf32> to vector<256x128xf32>
    %117 = arith.truncf %116 : vector<256x128xf32> to vector<256x128xbf16>
    %c5_112 = arith.constant 5 : index
    %c0_113 = arith.constant 0 : index
    %c0_114 = arith.constant 0 : index
    %118 = vector.load %arg4[%c5_112, %c0_113, %c0_114] : memref<9x128x128xbf16, #tpu.memory_space<vmem>>, vector<1x128x128xbf16>
    %119 = vector.shape_cast %118 : vector<1x128x128xbf16> to vector<128x128xbf16>
    %cst_115 = arith.constant dense<0.000000e+00> : vector<256x128xf32>
    %120 = tpu.matmul %117, %119, %cst_115 {dimension_numbers = #tpu.dot_dimension_numbers<[1], [0], [0], [1], [0, 0, 1, 1], [], []>} : vector<256x128xbf16>, vector<128x128xbf16>, vector<256x128xf32> -> vector<256x128xf32>
    %121 = arith.addf %114, %120 : vector<256x128xf32>
    %c2_116 = arith.constant 2 : index
    %c0_117 = arith.constant 0 : index
    %c0_118 = arith.constant 0 : index
    %122 = vector.load %arg8[%c2_116, %c0_117, %c0_118] : memref<18x18x128xf32, #tpu.memory_space<vmem>>, vector<16x16x128xf32>
    %123 = vector.shape_cast %122 : vector<16x16x128xf32> to vector<256x128xf32>
    %124 = arith.truncf %123 : vector<256x128xf32> to vector<256x128xbf16>
    %c6_119 = arith.constant 6 : index
    %c0_120 = arith.constant 0 : index
    %c0_121 = arith.constant 0 : index
    %125 = vector.load %arg4[%c6_119, %c0_120, %c0_121] : memref<9x128x128xbf16, #tpu.memory_space<vmem>>, vector<1x128x128xbf16>
    %126 = vector.shape_cast %125 : vector<1x128x128xbf16> to vector<128x128xbf16>
    %cst_122 = arith.constant dense<0.000000e+00> : vector<256x128xf32>
    %127 = tpu.matmul %124, %126, %cst_122 {dimension_numbers = #tpu.dot_dimension_numbers<[1], [0], [0], [1], [0, 0, 1, 1], [], []>} : vector<256x128xbf16>, vector<128x128xbf16>, vector<256x128xf32> -> vector<256x128xf32>
    %128 = arith.addf %121, %127 : vector<256x128xf32>
    %c2_123 = arith.constant 2 : index
    %c1_124 = arith.constant 1 : index
    %c0_125 = arith.constant 0 : index
    %129 = vector.load %arg8[%c2_123, %c1_124, %c0_125] : memref<18x18x128xf32, #tpu.memory_space<vmem>>, vector<16x16x128xf32>
    %130 = vector.shape_cast %129 : vector<16x16x128xf32> to vector<256x128xf32>
    %131 = arith.truncf %130 : vector<256x128xf32> to vector<256x128xbf16>
    %c7_126 = arith.constant 7 : index
    %c0_127 = arith.constant 0 : index
    %c0_128 = arith.constant 0 : index
    %132 = vector.load %arg4[%c7_126, %c0_127, %c0_128] : memref<9x128x128xbf16, #tpu.memory_space<vmem>>, vector<1x128x128xbf16>
    %133 = vector.shape_cast %132 : vector<1x128x128xbf16> to vector<128x128xbf16>
    %cst_129 = arith.constant dense<0.000000e+00> : vector<256x128xf32>
    %134 = tpu.matmul %131, %133, %cst_129 {dimension_numbers = #tpu.dot_dimension_numbers<[1], [0], [0], [1], [0, 0, 1, 1], [], []>} : vector<256x128xbf16>, vector<128x128xbf16>, vector<256x128xf32> -> vector<256x128xf32>
    %135 = arith.addf %128, %134 : vector<256x128xf32>
    %c2_130 = arith.constant 2 : index
    %c2_131 = arith.constant 2 : index
    %c0_132 = arith.constant 0 : index
    %136 = vector.load %arg8[%c2_130, %c2_131, %c0_132] : memref<18x18x128xf32, #tpu.memory_space<vmem>>, vector<16x16x128xf32>
    %137 = vector.shape_cast %136 : vector<16x16x128xf32> to vector<256x128xf32>
    %138 = arith.truncf %137 : vector<256x128xf32> to vector<256x128xbf16>
    %c8_133 = arith.constant 8 : index
    %c0_134 = arith.constant 0 : index
    %c0_135 = arith.constant 0 : index
    %139 = vector.load %arg4[%c8_133, %c0_134, %c0_135] : memref<9x128x128xbf16, #tpu.memory_space<vmem>>, vector<1x128x128xbf16>
    %140 = vector.shape_cast %139 : vector<1x128x128xbf16> to vector<128x128xbf16>
    %cst_136 = arith.constant dense<0.000000e+00> : vector<256x128xf32>
    %141 = tpu.matmul %138, %140, %cst_136 {dimension_numbers = #tpu.dot_dimension_numbers<[1], [0], [0], [1], [0, 0, 1, 1], [], []>} : vector<256x128xbf16>, vector<128x128xbf16>, vector<256x128xf32> -> vector<256x128xf32>
    %142 = arith.addf %135, %141 : vector<256x128xf32>
    %c0_137 = arith.constant 0 : index
    %c0_138 = arith.constant 0 : index
    %143 = vector.load %arg5[%c0_137, %c0_138] : memref<1x128xf32, #tpu.memory_space<vmem>>, vector<1x128xf32>
    %144 = vector.broadcast %143 : vector<1x128xf32> to vector<256x128xf32>
    %145 = arith.addf %142, %144 : vector<256x128xf32>
    %146 = arith.negf %145 : vector<256x128xf32>
    %147 = math.exp %146 : vector<256x128xf32>
    %cst_139 = arith.constant 1.000000e+00 : f32
    %148 = vector.broadcast %cst_139 : f32 to vector<256x128xf32>
    %149 = arith.addf %148, %147 : vector<256x128xf32>
    %150 = arith.divf %148, %149 : vector<256x128xf32>
    %151 = arith.mulf %145, %150 : vector<256x128xf32>
    %152 = vector.shape_cast %151 : vector<256x128xf32> to vector<16x16x128xf32>
    %153 = arith.truncf %152 : vector<16x16x128xf32> to vector<16x16x128xbf16>
    %c0_140 = arith.constant 0 : index
    %c0_141 = arith.constant 0 : index
    %c0_142 = arith.constant 0 : index
    %c0_143 = arith.constant 0 : index
    %154 = vector.load %arg6[%c0_140, %c0_141, %c0_142, %c0_143] : memref<1x16x16x128xbf16, #tpu.memory_space<vmem>>, vector<1x16x16x128xbf16>
    %155 = vector.shape_cast %154 : vector<1x16x16x128xbf16> to vector<16x16x128xbf16>
    %156 = vector.shape_cast %153 : vector<16x16x128xbf16> to vector<1x16x16x128xbf16>
    tpu.vector_store %arg6[%c0_140, %c0_141, %c0_142, %c0_143], %156 {strides = array<i32>} : memref<1x16x16x128xbf16, #tpu.memory_space<vmem>>, vector<1x16x16x128xbf16>,
    return
  }
  func.func @transform_0(%arg0: i32) -> (i32, i32, i32, i32) {
    %c0_i32 = arith.constant 0 : i32
    %c0_i32_0 = arith.constant 0 : i32
    %c0_i32_1 = arith.constant 0 : i32
    %c0_i32_2 = arith.constant 0 : i32
    return %arg0, %c0_i32, %c0_i32_0, %c0_i32_1 : i32, i32, i32, i32
  }
  func.func @transform_1(%arg0: i32) -> (i32, i32, i32) {
    %c0_i32 = arith.constant 0 : i32
    %c0_i32_0 = arith.constant 0 : i32
    %c0_i32_1 = arith.constant 0 : i32
    %c0_i32_2 = arith.constant 0 : i32
    return %c0_i32, %c0_i32_0, %c0_i32_1 : i32, i32, i32
  }
  func.func @transform_2(%arg0: i32) -> (i32, i32) {
    %c0_i32 = arith.constant 0 : i32
    %c0_i32_0 = arith.constant 0 : i32
    %c0_i32_1 = arith.constant 0 : i32
    return %c0_i32, %c0_i32_0 : i32, i32
  }
  func.func @transform_3(%arg0: i32) -> (i32, i32, i32) {
    %c0_i32 = arith.constant 0 : i32
    %c0_i32_0 = arith.constant 0 : i32
    %c0_i32_1 = arith.constant 0 : i32
    %c0_i32_2 = arith.constant 0 : i32
    return %c0_i32, %c0_i32_0, %c0_i32_1 : i32, i32, i32
  }
  func.func @transform_4(%arg0: i32) -> (i32, i32) {
    %c0_i32 = arith.constant 0 : i32
    %c0_i32_0 = arith.constant 0 : i32
    %c0_i32_1 = arith.constant 0 : i32
    return %c0_i32, %c0_i32_0 : i32, i32
  }
  func.func @transform_5(%arg0: i32) -> (i32, i32, i32, i32) {
    %c0_i32 = arith.constant 0 : i32
    %c0_i32_0 = arith.constant 0 : i32
    %c0_i32_1 = arith.constant 0 : i32
    %c0_i32_2 = arith.constant 0 : i32
    return %arg0, %c0_i32, %c0_i32_0, %c0_i32_1 : i32, i32, i32, i32
  }
}

module attributes {stable_mosaic.version = 11 : i64} {
  func.func @kernel(%arg0: i32, %arg1: memref<256x128xbf16, #tpu.memory_space<vmem>>, %arg2: memref<256x128xbf16, #tpu.memory_space<vmem>>, %arg3: memref<256x128xbf16, #tpu.memory_space<vmem>>, %arg4: memref<128x128xbf16, #tpu.memory_space<vmem>>, %arg5: memref<128x128xbf16, #tpu.memory_space<vmem>>, %arg6: memref<128x128xbf16, #tpu.memory_space<vmem>>, %arg7: memref<1x128xf32, #tpu.memory_space<vmem>>, %arg8: memref<256x128xbf16, #tpu.memory_space<vmem>>) attributes {dimension_semantics = [#tpu.dimension_semantics<parallel>], iteration_bounds = array<i64: 2>, scalar_prefetch = 0 : i64, scratch_operands = 0 : i64, tpu.core_type = #tpu.core_type<tc>, window_params = [{transform_indices = @transform_0, window_bounds = array<i64: 256, 128>}, {transform_indices = @transform_1, window_bounds = array<i64: 256, 128>}, {transform_indices = @transform_2, window_bounds = array<i64: 256, 128>}, {pipeline_mode = #tpu.pipeline_mode<synchronous>, transform_indices = @transform_3, window_bounds = array<i64: 128, 128>}, {pipeline_mode = #tpu.pipeline_mode<synchronous>, transform_indices = @transform_4, window_bounds = array<i64: 128, 128>}, {pipeline_mode = #tpu.pipeline_mode<synchronous>, transform_indices = @transform_5, window_bounds = array<i64: 128, 128>}, {pipeline_mode = #tpu.pipeline_mode<synchronous>, transform_indices = @transform_6, window_bounds = array<i64: 1, 128>}, {transform_indices = @transform_7, window_bounds = array<i64: 256, 128>}]} {
    %c0 = arith.constant 0 : index
    %c0_0 = arith.constant 0 : index
    %0 = vector.load %arg1[%c0, %c0_0] : memref<256x128xbf16, #tpu.memory_space<vmem>>, vector<256x128xbf16>
    %c0_1 = arith.constant 0 : index
    %c0_2 = arith.constant 0 : index
    %1 = vector.load %arg4[%c0_1, %c0_2] : memref<128x128xbf16, #tpu.memory_space<vmem>>, vector<128x128xbf16>
    %cst = arith.constant dense<0.000000e+00> : vector<256x128xf32>
    %2 = tpu.matmul %0, %1, %cst {dimension_numbers = #tpu.dot_dimension_numbers<[1], [0], [0], [1], [0, 0, 1, 1], [], []>} : vector<256x128xbf16>, vector<128x128xbf16>, vector<256x128xf32> -> vector<256x128xf32>
    %c0_3 = arith.constant 0 : index
    %c0_4 = arith.constant 0 : index
    %3 = vector.load %arg2[%c0_3, %c0_4] : memref<256x128xbf16, #tpu.memory_space<vmem>>, vector<256x128xbf16>
    %c0_5 = arith.constant 0 : index
    %c0_6 = arith.constant 0 : index
    %4 = vector.load %arg5[%c0_5, %c0_6] : memref<128x128xbf16, #tpu.memory_space<vmem>>, vector<128x128xbf16>
    %cst_7 = arith.constant dense<0.000000e+00> : vector<256x128xf32>
    %5 = tpu.matmul %3, %4, %cst_7 {dimension_numbers = #tpu.dot_dimension_numbers<[1], [0], [0], [1], [0, 0, 1, 1], [], []>} : vector<256x128xbf16>, vector<128x128xbf16>, vector<256x128xf32> -> vector<256x128xf32>
    %6 = arith.addf %2, %5 : vector<256x128xf32>
    %c0_8 = arith.constant 0 : index
    %c0_9 = arith.constant 0 : index
    %7 = vector.load %arg3[%c0_8, %c0_9] : memref<256x128xbf16, #tpu.memory_space<vmem>>, vector<256x128xbf16>
    %c0_10 = arith.constant 0 : index
    %c0_11 = arith.constant 0 : index
    %8 = vector.load %arg6[%c0_10, %c0_11] : memref<128x128xbf16, #tpu.memory_space<vmem>>, vector<128x128xbf16>
    %cst_12 = arith.constant dense<0.000000e+00> : vector<256x128xf32>
    %9 = tpu.matmul %7, %8, %cst_12 {dimension_numbers = #tpu.dot_dimension_numbers<[1], [0], [0], [1], [0, 0, 1, 1], [], []>} : vector<256x128xbf16>, vector<128x128xbf16>, vector<256x128xf32> -> vector<256x128xf32>
    %10 = arith.addf %6, %9 : vector<256x128xf32>
    %c0_13 = arith.constant 0 : index
    %c0_14 = arith.constant 0 : index
    %11 = vector.load %arg7[%c0_13, %c0_14] : memref<1x128xf32, #tpu.memory_space<vmem>>, vector<1x128xf32>
    %12 = vector.broadcast %11 : vector<1x128xf32> to vector<256x128xf32>
    %13 = arith.addf %10, %12 : vector<256x128xf32>
    %14 = arith.negf %13 : vector<256x128xf32>
    %15 = math.exp %14 : vector<256x128xf32>
    %cst_15 = arith.constant 1.000000e+00 : f32
    %16 = vector.broadcast %cst_15 : f32 to vector<256x128xf32>
    %17 = arith.addf %16, %15 : vector<256x128xf32>
    %18 = arith.divf %16, %17 : vector<256x128xf32>
    %19 = arith.mulf %13, %18 : vector<256x128xf32>
    %20 = arith.truncf %19 : vector<256x128xf32> to vector<256x128xbf16>
    %c0_16 = arith.constant 0 : index
    %c0_17 = arith.constant 0 : index
    %21 = vector.load %arg8[%c0_16, %c0_17] : memref<256x128xbf16, #tpu.memory_space<vmem>>, vector<256x128xbf16>
    tpu.vector_store %arg8[%c0_16, %c0_17], %20 {strides = array<i32>} : memref<256x128xbf16, #tpu.memory_space<vmem>>, vector<256x128xbf16>,
    return
  }
  func.func @transform_0(%arg0: i32) -> (i32, i32) {
    %c0_i32 = arith.constant 0 : i32
    %c0_i32_0 = arith.constant 0 : i32
    return %arg0, %c0_i32 : i32, i32
  }
  func.func @transform_1(%arg0: i32) -> (i32, i32) {
    %c0_i32 = arith.constant 0 : i32
    %c0_i32_0 = arith.constant 0 : i32
    return %arg0, %c0_i32 : i32, i32
  }
  func.func @transform_2(%arg0: i32) -> (i32, i32) {
    %c0_i32 = arith.constant 0 : i32
    %c0_i32_0 = arith.constant 0 : i32
    return %arg0, %c0_i32 : i32, i32
  }
  func.func @transform_3(%arg0: i32) -> (i32, i32) {
    %c0_i32 = arith.constant 0 : i32
    %c0_i32_0 = arith.constant 0 : i32
    %c0_i32_1 = arith.constant 0 : i32
    return %c0_i32, %c0_i32_0 : i32, i32
  }
  func.func @transform_4(%arg0: i32) -> (i32, i32) {
    %c0_i32 = arith.constant 0 : i32
    %c0_i32_0 = arith.constant 0 : i32
    %c0_i32_1 = arith.constant 0 : i32
    return %c0_i32, %c0_i32_0 : i32, i32
  }
  func.func @transform_5(%arg0: i32) -> (i32, i32) {
    %c0_i32 = arith.constant 0 : i32
    %c0_i32_0 = arith.constant 0 : i32
    %c0_i32_1 = arith.constant 0 : i32
    return %c0_i32, %c0_i32_0 : i32, i32
  }
  func.func @transform_6(%arg0: i32) -> (i32, i32) {
    %c0_i32 = arith.constant 0 : i32
    %c0_i32_0 = arith.constant 0 : i32
    %c0_i32_1 = arith.constant 0 : i32
    return %c0_i32, %c0_i32_0 : i32, i32
  }
  func.func @transform_7(%arg0: i32) -> (i32, i32) {
    %c0_i32 = arith.constant 0 : i32
    %c0_i32_0 = arith.constant 0 : i32
    return %arg0, %c0_i32 : i32, i32
  }
}

</mosaic_0001>

<bundles_post_ra>
// kernel: c2f_v2_forward.3
= control target key start
LH: loop header
LB: loop body
LE: loop exit
PB: predicated region body
PF: predicated region fallthrough
CT: control target
= control target key end

     0   :  { %s2285_s15 = smov 0   ;;  %s2887_s0 = inlined_call_operand.vmem [shape: bf16[512,128], index: 0, kind: input, shape index: {}]   ;;  %s2888_s1 = inlined_call_operand.vmem [shape: bf16[128,256], index: 1, kind: input, shape index: {}]   ;;  %s2889_s2 = inlined_call_operand.vmem [shape: f32[1,256], index: 2, kind: input, shape index: {}]   ;;  %s2890_s3 = inlined_call_operand.vmem [shape: bf16[512,128], index: 3, kind: output, shape index: {0}]   ;;  %s2891_s4 = inlined_call_operand.vmem [shape: bf16[512,128], index: 4, kind: output, shape index: {1}]  }
   0x1 LB: > { %s1503_s16 = sadd.s32 4294967295, %s2257_s15   ;;  %p1507_p0 = scmp.ge.s32.totalorder %s2257_s15, 1  ;;  %s2257_s15 = sphi %s2285_s15, %s15_s15  }
   0x2   : > { %p166_p1 = scmp.lt.s32.totalorder %s2257_s15, 3 }
   0x4   : > { %p167_p2 = pnand %p1507_p0, %p166_p1 }
   0x6   : > { %170 = sbr.rel (%p167_p2) target bundleno = 409 (0x199), region = 32 }
   0xd   : > { %v1955_v0 = vld [vmem:[%s2888_s1 + $0x4] ss:$8 sps:$4 sm:$0xff]   ;;  %s1508_s19 = sshll.u32 %s1503_s16, 5  ;;  %v1957_v1 = vld [vmem:[%s2888_s1] ss:$8 sps:$4 sm:$0xff]   ;;  %v2259_v2 = vmov 0   ;;  %v266_v33 = vlaneseq }
   0xe   : > { %484 = vmatprep.mubr.bf16.mxu0 %v2259_v2  ;;  %564 = vmatprep.mubr.bf16.mxu1 %v2259_v2  ;;  %p198_p3 = scmp.lt.s32.totalorder %s1508_s19, 63  ;;  %v1958_v3 = vld [vmem:[%s2888_s1 + $0x14] ss:$8 sps:$4 sm:$0xff]   ;;  %v1960_v4 = vld [vmem:[%s2888_s1 + $0x10] ss:$8 sps:$4 sm:$0xff]  }
   0xf   : > { %452 = vmatprep.subr.bf16.mxu0 %v1955_v0  ;;  %1930 = vmatprep.subr.bf16.mxu1 %v1955_v0  ;;  %v1961_v5 = vld [vmem:[%s2888_s1 + $0x24] ss:$8 sps:$4 sm:$0xff]   ;;  %v1963_v6 = vld [vmem:[%s2888_s1 + $0x20] ss:$8 sps:$4 sm:$0xff]   ;;  %v1964_v7 = vld [vmem:[%s2888_s1 + $0x34] ss:$8 sps:$4 sm:$0xff]  }
  0x10   : > { %453 = vmatpush1.bf16.msra.mxu0 %v1957_v1  ;;  %1938 = vmatpush1.bf16.msra.mxu1 %v1957_v1  ;;  %s2909_s19 = smov (!%p198_p3, %s1508_s19), 63  ;;  %v1966_v8 = vld [vmem:[%s2888_s1 + $0x30] ss:$8 sps:$4 sm:$0xff]   ;;  %v1967_v9 = vld [vmem:[%s2888_s1 + $0x44] ss:$8 sps:$4 sm:$0xff]   ;;  %v267_v34 = vshrl.u32 %v266_v33, 7 }
  0x11   : > { %454 = vmatprep.subr.bf16.mxu0 %v1958_v3  ;;  %1931 = vmatprep.subr.bf16.mxu1 %v1958_v3  ;;  %s2310_s28 = sshll.u32 %s2909_s19, 2  ;;  %v1969_v10 = vld [vmem:[%s2888_s1 + $0x40] ss:$8 sps:$4 sm:$0xff]   ;;  %v1970_v11 = vld [vmem:[%s2888_s1 + $0x54] ss:$8 sps:$4 sm:$0xff]  }
  0x12   : > { %s2322_s9 = scalar_lea.vmem %s2887_s0, %s2310_s28  ;;  %v1972_v12 = vld [vmem:[%s2888_s1 + $0x50] ss:$8 sps:$4 sm:$0xff]   ;;  %v1973_v13 = vld [vmem:[%s2888_s1 + $0x64] ss:$8 sps:$4 sm:$0xff]   ;;  %v1975_v14 = vld [vmem:[%s2888_s1 + $0x60] ss:$8 sps:$4 sm:$0xff]   ;;  %s2513_s8 = scalar_lea.vmem %s2890_s3, %s2310_s28 }
  0x13   : > { %v1976_v15 = vld [vmem:[%s2888_s1 + $0x74] ss:$8 sps:$4 sm:$0xff]   ;;  %v1978_v16 = vld [vmem:[%s2888_s1 + $0x70] ss:$8 sps:$4 sm:$0xff]   ;;  %v1979_v17 = vld [vmem:[%s2322_s9] sm:$0xff]   ;;  %v268_v35 = vsub.s32 0, %v267_v34  ;;  %s2534_s11 = scalar_lea.vmem %s2891_s4, %s2310_s28 }
  0x14   : > { %455 = vmatpush1.bf16.msra.mxu0 %v1960_v4  ;;  %1939 = vmatpush1.bf16.msra.mxu1 %v1960_v4  ;;  %v1980_v18 = vld [vmem:[%s2322_s9 + $0x40] sm:$0xff]   ;;  %v1981_v19 = vld [vmem:[%s2322_s9 + $0x8] sm:$0xff]   ;;  %v1983_v21 = vld [vmem:[%s2322_s9 + $0x10] sm:$0xff]   ;;  %v272_v37 = vsub.s32 1, %v267_v34 }
  0x15   : > { %456 = vmatprep.subr.bf16.mxu0 %v1961_v5  ;;  %1932 = vmatprep.subr.bf16.mxu1 %v1961_v5  ;;  %v1982_v20 = vld [vmem:[%s2322_s9 + $0x48] sm:$0xff]   ;;  %v1984_v22 = vld [vmem:[%s2322_s9 + $0x50] sm:$0xff]   ;;  %v1985_v23 = vld [vmem:[%s2322_s9 + $0x18] sm:$0xff]  }
  0x16   : > { %v1986_v24 = vld [vmem:[%s2322_s9 + $0x58] sm:$0xff]   ;;  %v1987_v25 = vld [vmem:[%s2322_s9 + $0x20] sm:$0xff]   ;;  %v1989_v27 = vld [vmem:[%s2322_s9 + $0x28] sm:$0xff]  }
  0x17   : > { %v1988_v26 = vld [vmem:[%s2322_s9 + $0x60] sm:$0xff]   ;;  %v1990_v28 = vld [vmem:[%s2322_s9 + $0x68] sm:$0xff]   ;;  %v1991_v29 = vld [vmem:[%s2322_s9 + $0x30] sm:$0xff]  }
  0x18   : > { %457 = vmatpush1.bf16.msra.mxu0 %v1963_v6  ;;  %1940 = vmatpush1.bf16.msra.mxu1 %v1963_v6  ;;  %v1992_v30 = vld [vmem:[%s2322_s9 + $0x70] sm:$0xff]   ;;  %v1993_v31 = vld [vmem:[%s2322_s9 + $0x38] sm:$0xff]   ;;  %v264_v36 = vld [vmem:[%s2889_s2] sm:$0x3] }
  0x19   : > { %458 = vmatprep.subr.bf16.mxu0 %v1964_v7  ;;  %1933 = vmatprep.subr.bf16.mxu1 %v1964_v7  ;;  %v1994_v32 = vld [vmem:[%s2322_s9 + $0x78] sm:$0xff]   ;;  %v2384_v38 = vrot.slane %v264_v36, %v268_v35  ;;  %v2386_v39 = vrot.slane %v264_v36, %v272_v37 }
  0x1c   : > { %459 = vmatpush1.bf16.msra.mxu0 %v1966_v8  ;;  %1941 = vmatpush1.bf16.msra.mxu1 %v1966_v8 }
  0x1d   : > { %460 = vmatprep.subr.bf16.mxu0 %v1967_v9  ;;  %1934 = vmatprep.subr.bf16.mxu1 %v1967_v9 }
  0x20   : > { %461 = vmatpush1.bf16.msra.mxu0 %v1969_v10  ;;  %1942 = vmatpush1.bf16.msra.mxu1 %v1969_v10 }
  0x21   : > { %462 = vmatprep.subr.bf16.mxu0 %v1970_v11  ;;  %1935 = vmatprep.subr.bf16.mxu1 %v1970_v11 }
  0x24   : > { %463 = vmatpush1.bf16.msra.mxu0 %v1972_v12  ;;  %1943 = vmatpush1.bf16.msra.mxu1 %v1972_v12 }
  0x25   : > { %464 = vmatprep.subr.bf16.mxu0 %v1973_v13  ;;  %1936 = vmatprep.subr.bf16.mxu1 %v1973_v13 }
  0x28   : > { %465 = vmatpush1.bf16.msra.mxu0 %v1975_v14  ;;  %1944 = vmatpush1.bf16.msra.mxu1 %v1975_v14 }
  0x29   : > { %466 = vmatprep.subr.bf16.mxu0 %v1976_v15  ;;  %1937 = vmatprep.subr.bf16.mxu1 %v1976_v15 }
  0x2c   : > { %467 = vmatpush1.bf16.msra.mxu0 %v1978_v16  ;;  %1945 = vmatpush1.bf16.msra.mxu1 %v1978_v16 }
  0x2f   : > { %485 = vmatmul.mubr.bf16.vlgmr.msra.gmra.mrb[0].mxu0 %v1979_v17  ;;  %565 = vmatmul.mubr.bf16.vlgmr.msra.gmra.mrb[0].mxu1 %v1980_v18 }
  0x30   : > { %494 = vmatprep.mubr.bf16.mxu0 %v2259_v2  ;;  %574 = vmatprep.mubr.bf16.mxu1 %v2259_v2 }
  0x37   : > { %495 = vmatmul.mubr.bf16.gmra.mrb[4].mxu0 %v1981_v19  ;;  %575 = vmatmul.mubr.bf16.gmra.mrb[4].mxu1 %v1982_v20 }
  0x38   : > { %504 = vmatprep.mubr.bf16.mxu0 %v2259_v2  ;;  %584 = vmatprep.mubr.bf16.mxu1 %v2259_v2 }
  0x3f   : > { %505 = vmatmul.mubr.bf16.gmra.mrb[8].mxu0 %v1983_v21  ;;  %585 = vmatmul.mubr.bf16.gmra.mrb[8].mxu1 %v1984_v22 }
  0x40   : > { %514 = vmatprep.mubr.bf16.mxu0 %v2259_v2  ;;  %594 = vmatprep.mubr.bf16.mxu1 %v2259_v2 }
  0x47   : > { %515 = vmatmul.mubr.bf16.gmra.mrb[12].mxu0 %v1985_v23  ;;  %595 = vmatmul.mubr.bf16.gmra.mrb[12].mxu1 %v1986_v24 }
  0x48   : > { %524 = vmatprep.mubr.bf16.mxu0 %v2259_v2  ;;  %604 = vmatprep.mubr.bf16.mxu1 %v2259_v2 }
  0x4f   : > { %525 = vmatmul.mubr.bf16.gmra.mrb[16].mxu0 %v1987_v25  ;;  %605 = vmatmul.mubr.bf16.gmra.mrb[16].mxu1 %v1988_v26 }
  0x50   : > { %534 = vmatprep.mubr.bf16.mxu0 %v2259_v2  ;;  %614 = vmatprep.mubr.bf16.mxu1 %v2259_v2 }
  0x57   : > { %535 = vmatmul.mubr.bf16.gmra.mrb[20].mxu0 %v1989_v27  ;;  %615 = vmatmul.mubr.bf16.gmra.mrb[20].mxu1 %v1990_v28 }
  0x58   : > { %544 = vmatprep.mubr.bf16.mxu0 %v2259_v2  ;;  %624 = vmatprep.mubr.bf16.mxu1 %v2259_v2 }
  0x5f   : > { %545 = vmatmul.mubr.bf16.gmra.mrb[24].mxu0 %v1991_v29  ;;  %625 = vmatmul.mubr.bf16.gmra.mrb[24].mxu1 %v1992_v30 }
  0x60   : > { %554 = vmatprep.mubr.bf16.mxu0 %v2259_v2  ;;  %634 = vmatprep.mubr.bf16.mxu1 %v2259_v2 }
  0x67   : > { %555 = vmatmul.mubr.bf16.gmra.mrb[28].mxu0 %v1993_v31  ;;  %635 = vmatmul.mubr.bf16.gmra.mrb[28].mxu1 %v1994_v32 }
 0x102   : > { %v486_v40 = vpop.f32.mrb[0].mxu0  ;;  %v566_v41 = vpop.f32.mrb[0].mxu1 }
 0x103   : > { %v2389_v42 = vadd.f32 %v486_v40, %v2384_v38  ;;  %v2392_v43 = vadd.f32 %v566_v41, %v2384_v38  ;;  %v488_v44 = vpop.f32.mrb[1].mxu0  ;;  %v568_v45 = vpop.f32.mrb[1].mxu1 }
 0x104   : > { %v2395_v46 = vadd.f32 %v488_v44, %v2386_v39  ;;  %v2398_v47 = vadd.f32 %v568_v45, %v2386_v39  ;;  %v490_v48 = vpop.f32.mrb[2].mxu0  ;;  %v570_v49 = vpop.f32.mrb[2].mxu1 }
 0x105   : > { %v1546_v50 = vmul.f32 -1.442695, %v2389_v42  ;;  %v1578_v51 = vmul.f32 -1.442695, %v2392_v43  ;;  %v2403_v52 = vadd.f32 %v490_v48, %v2384_v38  ;;  %v2406_v53 = vadd.f32 %v570_v49, %v2384_v38  ;;  %v492_v54 = vpop.f32.mrb[3].mxu0  ;;  %v572_v55 = vpop.f32.mrb[3].mxu1 }
 0x106   : > { %v1547_v56 = vmul.f32 -1.442695, %v2395_v46  ;;  %v1579_v57 = vmul.f32 -1.442695, %v2398_v47  ;;  %v2411_v58 = vadd.f32 %v492_v54, %v2386_v39  ;;  %v2414_v59 = vadd.f32 %v572_v55, %v2386_v39 }
 0x107   : > { %1995 = vpow2.f32 %v1546_v50  ;;  %v1548_v60 = vmul.f32 -1.442695, %v2403_v52  ;;  %v1580_v61 = vmul.f32 -1.442695, %v2406_v53 }
 0x108   : > { %1997 = vpow2.f32 %v1578_v51  ;;  %v1549_v62 = vmul.f32 -1.442695, %v2411_v58  ;;  %v1581_v63 = vmul.f32 -1.442695, %v2414_v59 }
 0x109   : > { %1999 = vpow2.f32 %v1547_v56 }
 0x10a   : > { %2001 = vpow2.f32 %v1579_v57  ;;  %v496_v0 = vpop.f32.mrb[4].mxu0  ;;  %v576_v1 = vpop.f32.mrb[4].mxu1 }
 0x10b   : > { %2003 = vpow2.f32 %v1548_v60  ;;  %v2421_v2 = vadd.f32 %v496_v0, %v2384_v38  ;;  %v2424_v3 = vadd.f32 %v576_v1, %v2384_v38  ;;  %v498_v4 = vpop.f32.mrb[5].mxu0  ;;  %v578_v5 = vpop.f32.mrb[5].mxu1 }
 0x10c   : > { %2005 = vpow2.f32 %v1580_v61  ;;  %v2427_v6 = vadd.f32 %v498_v4, %v2386_v39  ;;  %v2430_v7 = vadd.f32 %v578_v5, %v2386_v39  ;;  %v500_v8 = vpop.f32.mrb[6].mxu0  ;;  %v580_v9 = vpop.f32.mrb[6].mxu1 }
 0x10d   : > { %2007 = vpow2.f32 %v1549_v62  ;;  %v1550_v10 = vmul.f32 -1.442695, %v2421_v2  ;;  %v1582_v11 = vmul.f32 -1.442695, %v2424_v3  ;;  %v2435_v12 = vadd.f32 %v500_v8, %v2384_v38  ;;  %v502_v13 = vpop.f32.mrb[7].mxu0  ;;  %v582_v14 = vpop.f32.mrb[7].mxu1 }
 0x10e   : > { %2009 = vpow2.f32 %v1581_v63  ;;  %v1551_v15 = vmul.f32 -1.442695, %v2427_v6  ;;  %v1583_v16 = vmul.f32 -1.442695, %v2430_v7  ;;  %v2441_v36 = vadd.f32 %v580_v9, %v2384_v38 }
 0x10f   : > { %2011 = vpow2.f32 %v1550_v10  ;;  %v1552_v17 = vmul.f32 -1.442695, %v2435_v12  ;;  %v2444_v44 = vadd.f32 %v502_v13, %v2386_v39  ;;  %v2448_v56 = vadd.f32 %v582_v14, %v2386_v39 }
 0x110   : > { %2013 = vpow2.f32 %v1582_v11  ;;  %v1584_v55 = vmul.f32 -1.442695, %v2441_v36 }
 0x111   : > { %v1996_v18 = vpop.eup %1995  ;;  %2015 = vpow2.f32 %v1551_v15  ;;  %v1553_v62 = vmul.f32 -1.442695, %v2444_v44 }
 0x112   : > { %v1998_v19 = vpop.eup %1997  ;;  %v837_v20 = vadd.f32 1.0, %v1996_v18  ;;  %2017 = vpow2.f32 %v1583_v16  ;;  %v506_v21 = vpop.f32.mrb[8].mxu0 }
 0x113   : > { %v586_v22 = vpop.f32.mrb[8].mxu1  ;;  %v2000_v23 = vpop.eup %1999  ;;  %v869_v24 = vadd.f32 1.0, %v1998_v19  ;;  %2019 = vpow2.f32 %v1552_v17  ;;  %v2452_v63 = vadd.f32 %v506_v21, %v2384_v38 }
 0x114   : > { %v508_v25 = vpop.f32.mrb[9].mxu0  ;;  %v588_v26 = vpop.f32.mrb[9].mxu1  ;;  %2021 = vrcp.f32 %v837_v20  ;;  %v838_v28 = vadd.f32 1.0, %v2000_v23  ;;  %v2457_v8 = vadd.f32 %v586_v22, %v2384_v38 }
 0x115   : > { %v2002_v27 = vpop.eup %2001  ;;  %v510_v29 = vpop.f32.mrb[10].mxu0  ;;  %2023 = vrcp.f32 %v869_v24  ;;  %v2460_v9 = vadd.f32 %v508_v25, %v2386_v39  ;;  %v2467_v15 = vadd.f32 %v588_v26, %v2386_v39  ;;  %v1585_v25 = vmul.f32 -1.442695, %v2448_v56 }
 0x116   : > { %v590_v30 = vpop.f32.mrb[10].mxu1  ;;  %v2004_v31 = vpop.eup %2003  ;;  %v870_v32 = vadd.f32 1.0, %v2002_v27  ;;  %2025 = vrcp.f32 %v838_v28  ;;  %v2470_v16 = vadd.f32 %v510_v29, %v2384_v38  ;;  %v1554_v27 = vmul.f32 -1.442695, %v2452_v63 }
 0x117   : > { %v512_v33 = vpop.f32.mrb[11].mxu0  ;;  %v2006_v34 = vpop.eup %2005  ;;  %v839_v35 = vadd.f32 1.0, %v2004_v31  ;;  %v2477_v21 = vadd.f32 %v590_v30, %v2384_v38  ;;  %v1586_v28 = vmul.f32 -1.442695, %v2457_v8  ;;  %v1555_v30 = vmul.f32 -1.442695, %v2460_v9 }
 0x118   : > { %v592_v37 = vpop.f32.mrb[11].mxu1  ;;  %v2008_v40 = vpop.eup %2007  ;;  %2027 = vrcp.f32 %v870_v32  ;;  %v871_v41 = vadd.f32 1.0, %v2006_v34  ;;  %v2480_v22 = vadd.f32 %v512_v33, %v2386_v39  ;;  %v1587_v31 = vmul.f32 -1.442695, %v2467_v15 }
 0x119   : > { %v2010_v45 = vpop.eup %2009  ;;  %2029 = vrcp.f32 %v839_v35  ;;  %v840_v48 = vadd.f32 1.0, %v2008_v40  ;;  %v1556_v32 = vmul.f32 -1.442695, %v2470_v16  ;;  %v1588_v34 = vmul.f32 -1.442695, %v2477_v21 }
 0x11a   : > { %v2012_v49 = vpop.eup %2011  ;;  %2031 = vrcp.f32 %v871_v41  ;;  %v872_v50 = vadd.f32 1.0, %v2010_v45  ;;  %v516_v57 = vpop.f32.mrb[12].mxu0  ;;  %v1557_v35 = vmul.f32 -1.442695, %v2480_v22  ;;  %v2493_v40 = vadd.f32 %v592_v37, %v2386_v39 }
 0x11b   : > { %v2014_v51 = vpop.eup %2013  ;;  %2033 = vrcp.f32 %v840_v48  ;;  %v841_v54 = vadd.f32 1.0, %v2012_v49  ;;  %v596_v0 = vpop.f32.mrb[12].mxu1 }
 0x11c   : > { %v2016_v60 = vpop.eup %2015  ;;  %2035 = vrcp.f32 %v872_v50  ;;  %v873_v61 = vadd.f32 1.0, %v2014_v51  ;;  %v2454_v1 = vpop.f32.mrb[13].mxu0  ;;  %v2502_v51 = vadd.f32 %v516_v57, %v2384_v38 }
 0x11d   : > { %v2018_v4 = vpop.eup %2017  ;;  %2037 = vrcp.f32 %v841_v54  ;;  %v842_v5 = vadd.f32 1.0, %v2016_v60  ;;  %v2462_v10 = vpop.f32.mrb[13].mxu1 }
 0x11e   : > { %v2464_v11 = vpop.f32.mrb[14].mxu0  ;;  %v2020_v13 = vpop.eup %2019  ;;  %2039 = vrcp.f32 %v873_v61  ;;  %v874_v14 = vadd.f32 1.0, %v2018_v4 }
 0x11f   : > { %v2472_v17 = vpop.f32.mrb[14].mxu1  ;;  %v2474_v18 = vpop.f32.mrb[15].mxu0  ;;  %2041 = vrcp.f32 %v842_v5  ;;  %v843_v20 = vadd.f32 1.0, %v2020_v13 }
 0x120   : > { %v2022_v19 = vpop.eup %2021  ;;  %v2482_v23 = vpop.f32.mrb[15].mxu1  ;;  %2043 = vrcp.f32 %v874_v14 }
 0x121   : > { %v2024_v24 = vpop.eup %2023  ;;  %2045 = vrcp.f32 %v843_v20  ;;  %v1029_v49 = vmul.f32 %v2022_v19, %v2389_v42 }
 0x122   : > { %v2026_v26 = vpop.eup %2025  ;;  %2047 = vpow2.f32 %v1584_v55  ;;  %v2495_v41 = vpop.f32.mrb[16].mxu0  ;;  %v1061_v37 = vmul.f32 %v2024_v24, %v2392_v43  ;;  %v1589_v24 = vmul.f32 -1.442695, %v2493_v40 }
 0x123   : > { %v2028_v29 = vpop.eup %2027  ;;  %2049 = vpow2.f32 %v1553_v62  ;;  %v2497_v45 = vpop.f32.mrb[16].mxu1  ;;  %v1030_v43 = vmul.f32 %v2026_v26, %v2395_v46  ;;  %v1558_v26 = vmul.f32 -1.442695, %v2502_v51 }
 0x124   : > { %v2030_v33 = vpop.eup %2029  ;;  %2051 = vpow2.f32 %v1585_v25  ;;  %v2504_v54 = vpop.f32.mrb[17].mxu0 }
 0x125   : > { %v2032_v48 = vpop.eup %2031  ;;  %v1031_v50 = vmul.f32 %v2030_v33, %v2403_v52  ;;  %v2506_v55 = vpop.f32.mrb[17].mxu1  ;;  %2053 = vpow2.f32 %v1554_v27  ;;  %v2517_v52 = vadd.f32 %v596_v0, %v2384_v38  ;;  %v1062_v0 = vmul.f32 %v2028_v29, %v2398_v47 }
 0x126   : > { %v2034_v60 = vpop.eup %2033  ;;  %v1063_v42 = vmul.f32 %v2032_v48, %v2406_v53  ;;  %v2519_v57 = vpop.f32.mrb[18].mxu0  ;;  %2055 = vpow2.f32 %v1586_v28 }
 0x127   : > { %v2521_v61 = vpop.f32.mrb[18].mxu1  ;;  %v2036_v62 = vpop.eup %2035  ;;  %v1743_v4 = vpack.c.bf16 %v1031_v50, %v1029_v49  ;;  %v1032_v5 = vmul.f32 %v2034_v60, %v2411_v58  ;;  %2057 = vpow2.f32 %v1555_v30 }
 0x128   : > { %v2525_v13 = vpop.f32.mrb[19].mxu0  ;;  %v2527_v53 = vpop.f32.mrb[19].mxu1  ;;  %v1783_v19 = vpack.c.bf16 %v1063_v42, %v1061_v37  ;;  %v1064_v46 = vmul.f32 %v2036_v62, %v2414_v59  ;;  %2059 = vpow2.f32 %v1587_v31  ;;  %v1590_v59 = vmul.f32 -1.442695, %v2517_v52 }
 0x129   : > { %v2038_v14 = vpop.eup %2037  ;;  %1744 = vst [vmem:[%s2513_s8] sm:$0xff] %v1743_v4   ;;  %v1823_v20 = vpack.c.bf16 %v1032_v5, %v1030_v43  ;;  %2061 = vpow2.f32 %v1556_v32 }
 0x12a   : > { %v2537_v58 = vpop.eup %2039  ;;  %1907 = vst [vmem:[%s2513_s8 + $0x40] sm:$0xff] %v1783_v19   ;;  %v1863_v47 = vpack.c.bf16 %v1064_v46, %v1062_v0  ;;  %2063 = vpow2.f32 %v1588_v34  ;;  %v2550_v29 = vpop.f32.mrb[20].mxu0  ;;  %v1033_v33 = vmul.f32 %v2038_v14, %v2421_v2  ;;  %v2571_v0 = vadd.f32 %v2454_v1, %v2386_v39 }
 0x12b   : > { %v2541_v25 = vpop.eup %2041  ;;  %1824 = vst [vmem:[%s2534_s11] sm:$0xff] %v1823_v20   ;;  %2065 = vpow2.f32 %v1557_v35  ;;  %v2552_v30 = vpop.f32.mrb[20].mxu1  ;;  %v2575_v20 = vadd.f32 %v2462_v10, %v2386_v39  ;;  %v2583_v1 = vadd.f32 %v2472_v17, %v2384_v38 }
 0x12c   : > { %v2545_v27 = vpop.eup %2043  ;;  %1922 = vst [vmem:[%s2534_s11 + $0x40] sm:$0xff] %v1863_v47   ;;  %2067 = vpow2.f32 %v1589_v24  ;;  %v2556_v48 = vpop.f32.mrb[21].mxu0 }
 0x12d   : > { %v2046_v28 = vpop.eup %2045  ;;  %v2558_v49 = vpop.f32.mrb[21].mxu1  ;;  %2069 = vpow2.f32 %v1558_v26  ;;  %v2579_v26 = vadd.f32 %v2464_v11, %v2384_v38  ;;  %v2592_v11 = vadd.f32 %v2474_v18, %v2386_v39 }
 0x12e   : > { %v2048_v31 = vpop.eup %2047  ;;  %v1035_v32 = vmul.f32 %v2046_v28, %v2435_v12  ;;  %v2560_v60 = vpop.f32.mrb[22].mxu0  ;;  %2071 = vpow2.f32 %v1590_v59 }
 0x12f   : > { %v2050_v34 = vpop.eup %2049  ;;  %v875_v50 = vadd.f32 1.0, %v2048_v31  ;;  %v2562_v35 = vpop.f32.mrb[22].mxu1 }
 0x130   : > { %v2052_v37 = vpop.eup %2051  ;;  %v1748_v42 = vpack.c.bf16 %v1035_v32, %v1033_v33  ;;  %v844_v62 = vadd.f32 1.0, %v2050_v34  ;;  %v2564_v2 = vpop.f32.mrb[23].mxu0  ;;  %v1559_v34 = vmul.f32 -1.442695, %v2571_v0 }
 0x131   : > { %v2566_v12 = vpop.f32.mrb[23].mxu1  ;;  %v2054_v43 = vpop.eup %2053  ;;  %2073 = vrcp.f32 %v875_v50  ;;  %v876_v4 = vadd.f32 1.0, %v2052_v37 }
 0x132   : > { %v2056_v5 = vpop.eup %2055  ;;  %1900 = vst [vmem:[%s2513_s8 + $0x8] sm:$0xff] %v1748_v42   ;;  %2075 = vrcp.f32 %v844_v62  ;;  %v845_v14 = vadd.f32 1.0, %v2054_v43  ;;  %v2585_v31 = vpop.f32.mrb[24].mxu0  ;;  %v1591_v62 = vmul.f32 -1.442695, %v2575_v20 }
 0x133   : > { %v2058_v19 = vpop.eup %2057  ;;  %2077 = vrcp.f32 %v876_v4  ;;  %v877_v46 = vadd.f32 1.0, %v2056_v5  ;;  %v2587_v33 = vpop.f32.mrb[24].mxu1 }
 0x134   : > { %v2060_v24 = vpop.eup %2059  ;;  %2079 = vrcp.f32 %v845_v14  ;;  %v846_v47 = vadd.f32 1.0, %v2058_v19  ;;  %v2594_v50 = vpop.f32.mrb[25].mxu0  ;;  %v1560_v19 = vmul.f32 -1.442695, %v2579_v26 }
 0x135   : > { %v2062_v59 = vpop.eup %2061  ;;  %2081 = vrcp.f32 %v877_v46  ;;  %v878_v28 = vadd.f32 1.0, %v2060_v24  ;;  %v2596_v37 = vpop.f32.mrb[25].mxu1 }
 0x136   : > { %v2064_v10 = vpop.eup %2063  ;;  %2083 = vrcp.f32 %v846_v47  ;;  %v847_v32 = vadd.f32 1.0, %v2062_v59  ;;  %v2599_v43 = vpop.f32.mrb[26].mxu0  ;;  %v1592_v59 = vmul.f32 -1.442695, %v2583_v1 }
 0x137   : > { %v2066_v42 = vpop.eup %2065  ;;  %2085 = vrcp.f32 %v878_v28  ;;  %v879_v17 = vadd.f32 1.0, %v2064_v10  ;;  %2892 = vst [vmem:[#allocation2_spill] sm:$0xff] %v2599_v43  ;;  %v2601_v4 = vpop.f32.mrb[26].mxu1  ;;  %v2611_v28 = vadd.f32 %v2482_v23, %v2386_v39  ;;  %v2624_v23 = vadd.f32 %v2504_v54, %v2386_v39 }
 0x138   : > { %2893 = vst [vmem:[#allocation3_spill] sm:$0xff] %v2601_v4  ;;  %v2068_v5 = vpop.eup %2067  ;;  %2087 = vrcp.f32 %v847_v32  ;;  %v848_v14 = vadd.f32 1.0, %v2066_v42  ;;  %v2604_v18 = vpop.f32.mrb[27].mxu0  ;;  %v1561_v32 = vmul.f32 -1.442695, %v2592_v11  ;;  %v2616_v42 = vadd.f32 %v2495_v41, %v2384_v38 }
 0x139   : > { %2894 = vst [vmem:[#allocation4_spill] sm:$0xff] %v2604_v18  ;;  %v2606_v46 = vpop.f32.mrb[27].mxu1  ;;  %v2070_v24 = vpop.eup %2069  ;;  %2089 = vrcp.f32 %v879_v17  ;;  %v880_v47 = vadd.f32 1.0, %v2068_v5  ;;  %v2620_v17 = vadd.f32 %v2497_v45, %v2384_v38  ;;  %v2631_v41 = vadd.f32 %v2506_v55, %v2386_v39 }
 0x13a   : > { %2895 = vst [vmem:[#allocation5_spill] sm:$0xff] %v2606_v46  ;;  %v2072_v10 = vpop.eup %2071  ;;  %2091 = vrcp.f32 %v848_v14  ;;  %v849_v4 = vadd.f32 1.0, %v2070_v24  ;;  %v1065_v14 = vmul.f32 %v2537_v58, %v2424_v3  ;;  %v1034_v45 = vmul.f32 %v2541_v25, %v2427_v6  ;;  %v2640_v43 = vpop.f32.mrb[28].mxu0 }
 0x13b   : > { %v2074_v18 = vpop.eup %2073  ;;  %2093 = vrcp.f32 %v880_v47  ;;  %v881_v46 = vadd.f32 1.0, %v2072_v10  ;;  %v2638_v54 = vadd.f32 %v2519_v57, %v2384_v38  ;;  %v2642_v3 = vpop.f32.mrb[28].mxu1  ;;  %v1066_v55 = vmul.f32 %v2545_v27, %v2430_v7 }
 0x13c   : > { %v2076_v5 = vpop.eup %2075  ;;  %v1067_v24 = vmul.f32 %v2074_v18, %v2441_v36  ;;  %2095 = vrcp.f32 %v849_v4  ;;  %v2647_v6 = vpop.f32.mrb[29].mxu0  ;;  %v1593_v18 = vmul.f32 -1.442695, %v2611_v28 }
 0x13d   : > { %v2078_v47 = vpop.eup %2077  ;;  %v1036_v10 = vmul.f32 %v2076_v5, %v2444_v44  ;;  %2097 = vrcp.f32 %v881_v46  ;;  %v2649_v44 = vpop.f32.mrb[29].mxu1  ;;  %v2654_v46 = vadd.f32 %v2521_v61, %v2384_v38  ;;  %v1562_v5 = vmul.f32 -1.442695, %v2616_v42 }
 0x13e   : > { %v2080_v36 = vpop.eup %2079  ;;  %v1788_v58 = vpack.c.bf16 %v1067_v24, %v1065_v14  ;;  %v1068_v4 = vmul.f32 %v2078_v47, %v2448_v56  ;;  %2099 = vpow2.f32 %v1559_v34  ;;  %v2656_v7 = vpop.f32.mrb[30].mxu0  ;;  %v1594_v47 = vmul.f32 -1.442695, %v2620_v17 }
 0x13f   : > { %v2082_v25 = vpop.eup %2081  ;;  %v1828_v57 = vpack.c.bf16 %v1036_v10, %v1034_v45  ;;  %2101 = vpow2.f32 %v1591_v62  ;;  %2896 = vst [vmem:[#allocation6_spill] sm:$0xff] %v2656_v7  ;;  %v2658_v27 = vpop.f32.mrb[30].mxu1  ;;  %v2664_v62 = vadd.f32 %v2525_v13, %v2386_v39  ;;  %v1595_v10 = vmul.f32 -1.442695, %v2631_v41 }
 0x140   : > { %2897 = vst [vmem:[#allocation7_spill] sm:$0xff] %v2658_v27  ;;  %v2084_v56 = vpop.eup %2083  ;;  %1908 = vst [vmem:[%s2513_s8 + $0x48] sm:$0xff] %v1788_v58   ;;  %v1868_v34 = vpack.c.bf16 %v1068_v4, %v1066_v55  ;;  %2103 = vpow2.f32 %v1560_v19  ;;  %v2666_v14 = vpop.f32.mrb[31].mxu0  ;;  %v1563_v19 = vmul.f32 -1.442695, %v2624_v23  ;;  %v1037_v58 = vmul.f32 %v2080_v36, %v2452_v63 }
 0x141   : > { %2898 = vst [vmem:[#allocation8_spill] sm:$0xff] %v2666_v14  ;;  %v2668_v24 = vpop.f32.mrb[31].mxu1  ;;  %v2086_v61 = vpop.eup %2085  ;;  %1915 = vst [vmem:[%s2534_s11 + $0x8] sm:$0xff] %v1828_v57   ;;  %2105 = vpow2.f32 %v1592_v59  ;;  %v1564_v55 = vmul.f32 -1.442695, %v2638_v54  ;;  %v1038_v27 = vmul.f32 %v2084_v56, %v2460_v9 }
 0x142   : > { %2899 = vst [vmem:[#allocation9_spill] sm:$0xff] %v2668_v24  ;;  %v2088_v45 = vpop.eup %2087  ;;  %1923 = vst [vmem:[%s2534_s11 + $0x48] sm:$0xff] %v1868_v34   ;;  %2107 = vpow2.f32 %v1561_v32  ;;  %v1596_v57 = vmul.f32 -1.442695, %v2654_v46  ;;  %v1069_v24 = vmul.f32 %v2082_v25, %v2457_v8  ;;  %v1565_v34 = vmul.f32 -1.442695, %v2664_v62 }
 0x143   : > { %v2090_v13 = vpop.eup %2089  ;;  %v1039_v4 = vmul.f32 %v2088_v45, %v2470_v16  ;;  %2109 = vpow2.f32 %v1593_v18  ;;  %v1070_v36 = vmul.f32 %v2086_v61, %v2467_v15 }
 0x144   : > { %v2092_v59 = vpop.eup %2091  ;;  %v1071_v32 = vmul.f32 %v2090_v13, %v2477_v21  ;;  %2111 = vpow2.f32 %v1562_v5  ;;  %v2696_v13 = vadd.f32 %v2527_v53, %v2386_v39  ;;  %v2712_v53 = vadd.f32 %v2558_v49, %v2386_v39 }
 0x145   : > { %v2094_v14 = vpop.eup %2093  ;;  %v1753_v7 = vpack.c.bf16 %v1039_v4, %v1037_v58  ;;  %v1040_v63 = vmul.f32 %v2092_v59, %v2480_v22  ;;  %2113 = vpow2.f32 %v1594_v47  ;;  %v2704_v59 = vadd.f32 %v2552_v30, %v2384_v38 }
 0x146   : > { %v2684_v16 = vpop.eup %2095  ;;  %v1793_v18 = vpack.c.bf16 %v1071_v32, %v1069_v24  ;;  %v1072_v8 = vmul.f32 %v2094_v14, %v2493_v40  ;;  %2115 = vpow2.f32 %v1563_v19  ;;  %v2720_v30 = vadd.f32 %v2562_v35, %v2384_v38 }
 0x147   : > { %v2688_v21 = vpop.eup %2097  ;;  %1901 = vst [vmem:[%s2513_s8 + $0x10] sm:$0xff] %v1753_v7   ;;  %v1833_v25 = vpack.c.bf16 %v1040_v63, %v1038_v27  ;;  %2117 = vpow2.f32 %v1595_v10  ;;  %v2708_v63 = vadd.f32 %v2556_v48, %v2386_v39  ;;  %v2724_v48 = vadd.f32 %v2564_v2, %v2386_v39 }
 0x148   : > { %v2100_v9 = vpop.eup %2099  ;;  %1909 = vst [vmem:[%s2513_s8 + $0x50] sm:$0xff] %v1793_v18   ;;  %v1873_v56 = vpack.c.bf16 %v1072_v8, %v1070_v36  ;;  %2119 = vpow2.f32 %v1564_v55  ;;  %v1598_v35 = vmul.f32 -1.442695, %v2704_v59 }
 0x149   : > { %v2102_v22 = vpop.eup %2101  ;;  %1916 = vst [vmem:[%s2534_s11 + $0x10] sm:$0xff] %v1833_v25   ;;  %v850_v5 = vadd.f32 1.0, %v2100_v9  ;;  %2121 = vpow2.f32 %v1596_v57  ;;  %v2700_v57 = vadd.f32 %v2550_v29, %v2384_v38  ;;  %v2716_v29 = vadd.f32 %v2560_v60, %v2384_v38 }
 0x14a   : > { %v2104_v47 = vpop.eup %2103  ;;  %1924 = vst [vmem:[%s2534_s11 + $0x50] sm:$0xff] %v1873_v56   ;;  %v882_v15 = vadd.f32 1.0, %v2102_v22  ;;  %2123 = vpow2.f32 %v1565_v34  ;;  %v1597_v56 = vmul.f32 -1.442695, %v2696_v13 }
 0x14b   : > { %v2106_v24 = vpop.eup %2105  ;;  %2125 = vrcp.f32 %v850_v5  ;;  %v851_v40 = vadd.f32 1.0, %v2104_v47  ;;  %v1566_v22 = vmul.f32 -1.442695, %v2700_v57  ;;  %v1567_v47 = vmul.f32 -1.442695, %v2708_v63 }
 0x14c   : > { %v2108_v14 = vpop.eup %2107  ;;  %2127 = vrcp.f32 %v882_v15  ;;  %v883_v7 = vadd.f32 1.0, %v2106_v24  ;;  %v1599_v24 = vmul.f32 -1.442695, %v2712_v53  ;;  %v1568_v2 = vmul.f32 -1.442695, %v2716_v29 }
 0x14d   : > { %v2110_v27 = vpop.eup %2109  ;;  %2129 = vrcp.f32 %v851_v40  ;;  %v852_v61 = vadd.f32 1.0, %v2108_v14  ;;  %v1600_v40 = vmul.f32 -1.442695, %v2720_v30 }
 0x14e   : > { %v2112_v45 = vpop.eup %2111  ;;  %2131 = vrcp.f32 %v883_v7  ;;  %v884_v19 = vadd.f32 1.0, %v2110_v27  ;;  %v1569_v7 = vmul.f32 -1.442695, %v2724_v48  ;;  %v2736_v27 = vadd.f32 %v2566_v12, %v2386_v39 }
 0x14f   : > { %v2114_v10 = vpop.eup %2113  ;;  %2133 = vrcp.f32 %v852_v61  ;;  %v853_v55 = vadd.f32 1.0, %v2112_v45  ;;  %v2740_v61 = vadd.f32 %v2585_v31, %v2384_v38  ;;  %v1073_v12 = vmul.f32 %v2688_v21, %v2517_v52 }
 0x150   : > { %v2116_v58 = vpop.eup %2115  ;;  %2135 = vrcp.f32 %v884_v19  ;;  %v885_v4 = vadd.f32 1.0, %v2114_v10  ;;  %v1041_v19 = vmul.f32 %v2684_v16, %v2502_v51  ;;  %v2754_v31 = vadd.f32 %v2594_v50, %v2386_v39 }
 0x151   : > { %v2118_v32 = vpop.eup %2117  ;;  %2137 = vrcp.f32 %v853_v55  ;;  %v854_v34 = vadd.f32 1.0, %v2116_v58  ;;  %v2747_v55 = vadd.f32 %v2587_v33, %v2384_v38 }
 0x152   : > { %v2120_v36 = vpop.eup %2119  ;;  %2139 = vrcp.f32 %v885_v4  ;;  %v886_v18 = vadd.f32 1.0, %v2118_v32 }
 0x153   : > { %v2122_v8 = vpop.eup %2121  ;;  %2141 = vrcp.f32 %v854_v34  ;;  %v855_v25 = vadd.f32 1.0, %v2120_v36  ;;  %v2764_v36 = vadd.f32 %v2596_v37, %v2386_v39 }
 0x154   : > { %v2124_v49 = vpop.eup %2123  ;;  %2143 = vrcp.f32 %v886_v18  ;;  %v887_v9 = vadd.f32 1.0, %v2122_v8 }
 0x155   : > { %v2126_v60 = vpop.eup %2125  ;;  %2145 = vrcp.f32 %v855_v25  ;;  %v856_v5 = vadd.f32 1.0, %v2124_v49  ;;  %v1571_v49 = vmul.f32 -1.442695, %v2754_v31 }
 0x156   : > { %v2128_v15 = vpop.eup %2127  ;;  %2147 = vrcp.f32 %v887_v9 }
 0x157   : > { %v2130_v14 = vpop.eup %2129  ;;  %2149 = vrcp.f32 %v856_v5  ;;  %v1074_v34 = vmul.f32 %v2128_v15, %v2575_v20  ;;  %v1570_v20 = vmul.f32 -1.442695, %v2740_v61 }
 0x158   : > { %v2132_v45 = vpop.eup %2131  ;;  %v1043_v10 = vmul.f32 %v2130_v14, %v2579_v26  ;;  %2151 = vpow2.f32 %v1597_v56  ;;  %v1042_v26 = vmul.f32 %v2126_v60, %v2571_v0  ;;  %v1601_v0 = vmul.f32 -1.442695, %v2736_v27 }
 0x159   : > { %v2134_v58 = vpop.eup %2133  ;;  %v1075_v4 = vmul.f32 %v2132_v45, %v2583_v1  ;;  %2153 = vpow2.f32 %v1566_v22  ;;  %v1603_v22 = vmul.f32 -1.442695, %v2764_v36 }
 0x15a   : > { %v2136_v51 = vpop.eup %2135  ;;  %v1758_v16 = vpack.c.bf16 %v1043_v10, %v1041_v19  ;;  %v1044_v33 = vmul.f32 %v2134_v58, %v2592_v11  ;;  %2155 = vpow2.f32 %v1598_v35 }
 0x15b   : > { %v2138_v32 = vpop.eup %2137  ;;  %v1798_v52 = vpack.c.bf16 %v1075_v4, %v1073_v12  ;;  %v1076_v1 = vmul.f32 %v2136_v51, %v2611_v28  ;;  %2157 = vpow2.f32 %v1567_v47  ;;  %v1602_v28 = vmul.f32 -1.442695, %v2747_v55 }
 0x15c   : > { %v2140_v21 = vpop.eup %2139  ;;  %1902 = vst [vmem:[%s2513_s8 + $0x18] sm:$0xff] %v1758_v16   ;;  %v1838_v50 = vpack.c.bf16 %v1044_v33, %v1042_v26  ;;  %2159 = vpow2.f32 %v1599_v24  ;;  %v1045_v37 = vmul.f32 %v2138_v32, %v2616_v42  ;;  %v2900_v26 = vld [vmem:[#allocation2_spill] sm:$0xff] }
 0x15d   : > { %v2142_v11 = vpop.eup %2141  ;;  %1910 = vst [vmem:[%s2513_s8 + $0x58] sm:$0xff] %v1798_v52   ;;  %v1878_v18 = vpack.c.bf16 %v1076_v1, %v1074_v34  ;;  %2161 = vpow2.f32 %v1568_v2  ;;  %v1077_v5 = vmul.f32 %v2140_v21, %v2620_v17  ;;  %v2786_v16 = vadd.f32 %v2900_v26, %v2384_v38  ;;  %v2901_v34 = vld [vmem:[#allocation3_spill] sm:$0xff]  ;;  %v2902_v1 = vld [vmem:[#allocation4_spill] sm:$0xff] }
 0x15e   : > { %v2768_v8 = vpop.eup %2143  ;;  %1917 = vst [vmem:[%s2534_s11 + $0x18] sm:$0xff] %v1838_v50   ;;  %2163 = vpow2.f32 %v1600_v40  ;;  %v1046_v15 = vmul.f32 %v2142_v11, %v2624_v23  ;;  %v2790_v52 = vadd.f32 %v2901_v34, %v2384_v38  ;;  %v2794_v21 = vadd.f32 %v2902_v1, %v2386_v39 }
 0x15f   : > { %v2146_v25 = vpop.eup %2145  ;;  %1925 = vst [vmem:[%s2534_s11 + $0x58] sm:$0xff] %v1878_v18   ;;  %2165 = vpow2.f32 %v1569_v7 }
 0x160   : > { %v2148_v9 = vpop.eup %2147  ;;  %v1047_v56 = vmul.f32 %v2146_v25, %v2638_v54  ;;  %2167 = vpow2.f32 %v1601_v0  ;;  %v1572_v25 = vmul.f32 -1.442695, %v2786_v16 }
 0x161   : > { %v2150_v60 = vpop.eup %2149  ;;  %v1079_v35 = vmul.f32 %v2148_v9, %v2654_v46  ;;  %2169 = vpow2.f32 %v1570_v20 }
 0x162   : > { %v2152_v47 = vpop.eup %2151  ;;  %v1763_v24 = vpack.c.bf16 %v1047_v56, %v1045_v37  ;;  %v1048_v2 = vmul.f32 %v2150_v60, %v2664_v62  ;;  %2171 = vpow2.f32 %v1602_v28  ;;  %v1573_v60 = vmul.f32 -1.442695, %v2794_v21 }
 0x163   : > { %v2154_v42 = vpop.eup %2153  ;;  %v1803_v54 = vpack.c.bf16 %v1079_v35, %v1077_v5  ;;  %v888_v40 = vadd.f32 1.0, %v2152_v47  ;;  %2173 = vpow2.f32 %v1571_v49  ;;  %v2903_v49 = vld [vmem:[#allocation5_spill] sm:$0xff]  ;;  %v2805_v5 = vadd.f32 %v2640_v43, %v2384_v38 }
 0x164   : > { %v2156_v14 = vpop.eup %2155  ;;  %1903 = vst [vmem:[%s2513_s8 + $0x20] sm:$0xff] %v1763_v24   ;;  %v1843_v7 = vpack.c.bf16 %v1048_v2, %v1046_v15  ;;  %v857_v17 = vadd.f32 1.0, %v2154_v42  ;;  %2175 = vpow2.f32 %v1603_v22  ;;  %v2799_v9 = vadd.f32 %v2903_v49, %v2386_v39 }
 0x165   : > { %v2158_v46 = vpop.eup %2157  ;;  %1911 = vst [vmem:[%s2513_s8 + $0x60] sm:$0xff] %v1803_v54   ;;  %2177 = vrcp.f32 %v888_v40  ;;  %v889_v45 = vadd.f32 1.0, %v2156_v14  ;;  %v1604_v22 = vmul.f32 -1.442695, %v2790_v52  ;;  %v2809_v47 = vadd.f32 %v2642_v3, %v2384_v38  ;;  %v2904_v54 = vld [vmem:[#allocation6_spill] sm:$0xff]  ;;  %v2905_v14 = vld [vmem:[#allocation7_spill] sm:$0xff] }
 0x166   : > { %v2160_v19 = vpop.eup %2159  ;;  %1918 = vst [vmem:[%s2534_s11 + $0x20] sm:$0xff] %v1843_v7   ;;  %2179 = vrcp.f32 %v857_v17  ;;  %v858_v23 = vadd.f32 1.0, %v2158_v46  ;;  %v2813_v15 = vadd.f32 %v2647_v6, %v2386_v39  ;;  %v2817_v24 = vadd.f32 %v2649_v44, %v2386_v39 }
 0x167   : > { %v2162_v62 = vpop.eup %2161  ;;  %2181 = vrcp.f32 %v889_v45  ;;  %v890_v10 = vadd.f32 1.0, %v2160_v19  ;;  %v1078_v42 = vmul.f32 %v2768_v8, %v2631_v41  ;;  %v2824_v3 = vadd.f32 %v2904_v54, %v2384_v38 }
 0x168   : > { %v2164_v58 = vpop.eup %2163  ;;  %2183 = vrcp.f32 %v858_v23  ;;  %v859_v12 = vadd.f32 1.0, %v2162_v62  ;;  %v1605_v6 = vmul.f32 -1.442695, %v2799_v9  ;;  %v2829_v44 = vadd.f32 %v2905_v14, %v2384_v38 }
 0x169   : > { %v2166_v4 = vpop.eup %2165  ;;  %2185 = vrcp.f32 %v890_v10  ;;  %v891_v51 = vadd.f32 1.0, %v2164_v58  ;;  %v1574_v41 = vmul.f32 -1.442695, %v2805_v5  ;;  %v1606_v45 = vmul.f32 -1.442695, %v2809_v47  ;;  %v2907_v10 = vld [vmem:[#allocation9_spill] sm:$0xff] }
 0x16a   : > { %v2168_v33 = vpop.eup %2167  ;;  %2187 = vrcp.f32 %v859_v12  ;;  %v860_v32 = vadd.f32 1.0, %v2166_v4  ;;  %v1575_v19 = vmul.f32 -1.442695, %v2813_v15  ;;  %v1607_v38 = vmul.f32 -1.442695, %v2817_v24 }
 0x16b   : > { %v2170_v50 = vpop.eup %2169  ;;  %2189 = vrcp.f32 %v891_v51  ;;  %v892_v0 = vadd.f32 1.0, %v2168_v33  ;;  %v1576_v62 = vmul.f32 -1.442695, %v2824_v3  ;;  %v2843_v58 = vadd.f32 %v2907_v10, %v2386_v39 }
 0x16c   : > { %v2172_v11 = vpop.eup %2171  ;;  %2191 = vrcp.f32 %v860_v32  ;;  %v861_v18 = vadd.f32 1.0, %v2170_v50  ;;  %v1608_v26 = vmul.f32 -1.442695, %v2829_v44 }
 0x16d   : > { %v2174_v20 = vpop.eup %2173  ;;  %2193 = vrcp.f32 %v892_v0  ;;  %v893_v28 = vadd.f32 1.0, %v2172_v11 }
 0x16e   : > { %v2176_v37 = vpop.eup %2175  ;;  %v862_v56 = vadd.f32 1.0, %v2174_v20  ;;  %2195 = vrcp.f32 %v861_v18  ;;  %v1609_v20 = vmul.f32 -1.442695, %v2843_v58 }
 0x16f   : > { %v2178_v35 = vpop.eup %2177  ;;  %2197 = vrcp.f32 %v893_v28 }
 0x170   : > { %v2180_v2 = vpop.eup %2179  ;;  %v1080_v43 = vmul.f32 %v2178_v35, %v2696_v13  ;;  %2199 = vrcp.f32 %v862_v56  ;;  %v2906_v13 = vld [vmem:[#allocation8_spill] sm:$0xff] }
 0x171   : > { %v2182_v40 = vpop.eup %2181  ;;  %2201 = vpow2.f32 %v1572_v25  ;;  %v2834_v8 = vadd.f32 %v2906_v13, %v2386_v39  ;;  %v1049_v4 = vmul.f32 %v2180_v2, %v2700_v57  ;;  %v894_v25 = vadd.f32 1.0, %v2176_v37 }
 0x172   : > { %v2184_v7 = vpop.eup %2183  ;;  %v1883_v17 = vpack.c.bf16 %v1080_v43, %v1078_v42  ;;  %2203 = vpow2.f32 %v1604_v22  ;;  %v1081_v32 = vmul.f32 %v2182_v40, %v2704_v59 }
 0x173   : > { %v2186_v46 = vpop.eup %2185  ;;  %2205 = vpow2.f32 %v1573_v60  ;;  %v1577_v1 = vmul.f32 -1.442695, %v2834_v8  ;;  %v1050_v50 = vmul.f32 %v2184_v7, %v2708_v63 }
 0x174   : > { %v2188_v23 = vpop.eup %2187  ;;  %1926 = vst [vmem:[%s2534_s11 + $0x60] sm:$0xff] %v1883_v17   ;;  %2207 = vpow2.f32 %v1605_v6 }
 0x175   : > { %v2190_v12 = vpop.eup %2189  ;;  %v1051_v51 = vmul.f32 %v2188_v23, %v2716_v29  ;;  %2209 = vpow2.f32 %v1574_v41  ;;  %v1082_v29 = vmul.f32 %v2186_v46, %v2712_v53 }
 0x176   : > { %v2192_v33 = vpop.eup %2191  ;;  %v1083_v34 = vmul.f32 %v2190_v12, %v2720_v30  ;;  %2211 = vpow2.f32 %v1606_v45 }
 0x177   : > { %v2194_v39 = vpop.eup %2193  ;;  %v1768_v0 = vpack.c.bf16 %v1051_v51, %v1049_v4  ;;  %v1052_v57 = vmul.f32 %v2192_v33, %v2724_v48  ;;  %2213 = vpow2.f32 %v1575_v19 }
 0x178   : > { %v1808_v11 = vpack.c.bf16 %v1083_v34, %v1081_v32  ;;  %v1084_v18 = vmul.f32 %v2194_v39, %v2736_v27  ;;  %v2196_v59 = vpop.eup %2195  ;;  %2215 = vpow2.f32 %v1607_v38 }
 0x179   : > { %1904 = vst [vmem:[%s2513_s8 + $0x28] sm:$0xff] %v1768_v0   ;;  %v1848_v30 = vpack.c.bf16 %v1052_v57, %v1050_v50  ;;  %v2198_v28 = vpop.eup %2197  ;;  %2217 = vpow2.f32 %v1576_v62  ;;  %v1053_v4 = vmul.f32 %v2196_v59, %v2740_v61 }
 0x17a   : > { %1912 = vst [vmem:[%s2513_s8 + $0x68] sm:$0xff] %v1808_v11   ;;  %v1888_v63 = vpack.c.bf16 %v1084_v18, %v1082_v29  ;;  %v2200_v48 = vpop.eup %2199  ;;  %2219 = vpow2.f32 %v1608_v26  ;;  %v1085_v33 = vmul.f32 %v2198_v28, %v2747_v55 }
 0x17b   : > { %1919 = vst [vmem:[%s2534_s11 + $0x28] sm:$0xff] %v1848_v30   ;;  %v2202_v53 = vpop.eup %2201  ;;  %2221 = vpow2.f32 %v1577_v1  ;;  %v1054_v1 = vmul.f32 %v2200_v48, %v2754_v31 }
 0x17c   : > { %1927 = vst [vmem:[%s2534_s11 + $0x68] sm:$0xff] %v1888_v63   ;;  %v2204_v27 = vpop.eup %2203  ;;  %v863_v49 = vadd.f32 1.0, %v2202_v53  ;;  %2223 = vpow2.f32 %v1609_v20 }
 0x17d   : > { %v2206_v56 = vpop.eup %2205  ;;  %2225 = vrcp.f32 %v894_v25  ;;  %v895_v22 = vadd.f32 1.0, %v2204_v27 }
 0x17e   : > { %v2208_v60 = vpop.eup %2207  ;;  %2227 = vrcp.f32 %v863_v49  ;;  %v864_v35 = vadd.f32 1.0, %v2206_v56 }
 0x17f   : > { %v2210_v2 = vpop.eup %2209  ;;  %2229 = vrcp.f32 %v895_v22  ;;  %v896_v42 = vadd.f32 1.0, %v2208_v60 }
 0x180   : > { %v2212_v37 = vpop.eup %2211  ;;  %2231 = vrcp.f32 %v864_v35  ;;  %v865_v43 = vadd.f32 1.0, %v2210_v2 }
 0x181   : > { %v2214_v54 = vpop.eup %2213  ;;  %2233 = vrcp.f32 %v896_v42  ;;  %v897_v40 = vadd.f32 1.0, %v2212_v37 }
 0x182   : > { %v2216_v6 = vpop.eup %2215  ;;  %2235 = vrcp.f32 %v865_v43  ;;  %v866_v14 = vadd.f32 1.0, %v2214_v54 }
 0x183   : > { %v2218_v7 = vpop.eup %2217  ;;  %2237 = vrcp.f32 %v897_v40  ;;  %v898_v17 = vadd.f32 1.0, %v2216_v6 }
 0x184   : > { %v2220_v41 = vpop.eup %2219  ;;  %2239 = vrcp.f32 %v866_v14  ;;  %v867_v13 = vadd.f32 1.0, %v2218_v7 }
 0x185   : > { %v2222_v46 = vpop.eup %2221  ;;  %2241 = vrcp.f32 %v898_v17  ;;  %v899_v45 = vadd.f32 1.0, %v2220_v41 }
 0x186   : > { %v2224_v19 = vpop.eup %2223  ;;  %2243 = vrcp.f32 %v867_v13  ;;  %v868_v23 = vadd.f32 1.0, %v2222_v46 }
 0x187   : > { %v2226_v38 = vpop.eup %2225  ;;  %2245 = vrcp.f32 %v899_v45  ;;  %v900_v62 = vadd.f32 1.0, %v2224_v19 }
 0x188   : > { %v2228_v10 = vpop.eup %2227  ;;  %2247 = vrcp.f32 %v868_v23  ;;  %v1086_v61 = vmul.f32 %v2226_v38, %v2764_v36 }
 0x189   : > { %v2230_v12 = vpop.eup %2229  ;;  %v1055_v51 = vmul.f32 %v2228_v10, %v2786_v16  ;;  %2249 = vrcp.f32 %v900_v62 }
 0x18a   : > { %v2232_v26 = vpop.eup %2231  ;;  %v1087_v32 = vmul.f32 %v2230_v12, %v2790_v52 }
 0x18b   : > { %v2234_v34 = vpop.eup %2233  ;;  %v1773_v39 = vpack.c.bf16 %v1055_v51, %v1053_v4  ;;  %v1056_v50 = vmul.f32 %v2232_v26, %v2794_v21 }
 0x18c   : > { %v2236_v0 = vpop.eup %2235  ;;  %v1813_v57 = vpack.c.bf16 %v1087_v32, %v1085_v33  ;;  %v1088_v16 = vmul.f32 %v2234_v34, %v2799_v9 }
 0x18d   : > { %v2238_v29 = vpop.eup %2237  ;;  %1905 = vst [vmem:[%s2513_s8 + $0x30] sm:$0xff] %v1773_v39   ;;  %v1853_v11 = vpack.c.bf16 %v1056_v50, %v1054_v1  ;;  %v1057_v21 = vmul.f32 %v2236_v0, %v2805_v5 }
 0x18e   : > { %v2240_v55 = vpop.eup %2239  ;;  %1913 = vst [vmem:[%s2513_s8 + $0x70] sm:$0xff] %v1813_v57   ;;  %v1893_v52 = vpack.c.bf16 %v1088_v16, %v1086_v61  ;;  %v1089_v30 = vmul.f32 %v2238_v29, %v2809_v47 }
 0x18f   : > { %v2242_v18 = vpop.eup %2241  ;;  %1920 = vst [vmem:[%s2534_s11 + $0x30] sm:$0xff] %v1853_v11   ;;  %v1058_v63 = vmul.f32 %v2240_v55, %v2813_v15 }
 0x190   : > { %v2244_v31 = vpop.eup %2243  ;;  %1928 = vst [vmem:[%s2534_s11 + $0x70] sm:$0xff] %v1893_v52   ;;  %v1090_v53 = vmul.f32 %v2242_v18, %v2817_v24 }
 0x191   : > { %v2246_v59 = vpop.eup %2245  ;;  %v1059_v36 = vmul.f32 %v2244_v31, %v2824_v3 }
 0x192   : > { %v2248_v9 = vpop.eup %2247  ;;  %v1091_v20 = vmul.f32 %v2246_v59, %v2829_v44 }
 0x193   : > { %v2250_v28 = vpop.eup %2249  ;;  %v1778_v25 = vpack.c.bf16 %v1059_v36, %v1057_v21  ;;  %v1060_v48 = vmul.f32 %v2248_v9, %v2834_v8 }
 0x194   : > { %v1818_v27 = vpack.c.bf16 %v1091_v20, %v1089_v30  ;;  %v1092_v5 = vmul.f32 %v2250_v28, %v2843_v58 }
 0x195   : > { %1906 = vst [vmem:[%s2513_s8 + $0x38] sm:$0xff] %v1778_v25   ;;  %v1858_v49 = vpack.c.bf16 %v1060_v48, %v1058_v63 }
 0x196   : > { %1914 = vst [vmem:[%s2513_s8 + $0x78] sm:$0xff] %v1818_v27   ;;  %v1898_v3 = vpack.c.bf16 %v1092_v5, %v1090_v53 }
 0x197   : > { %1921 = vst [vmem:[%s2534_s11 + $0x38] sm:$0xff] %v1858_v49  }
 0x198   : > { %1929 = vst [vmem:[%s2534_s11 + $0x78] sm:$0xff] %v1898_v3  }
 0x199 PF: > { %s15_s15 = sadd.s32 1, %s2257_s15  }
 0x19a   : > { %p12_p4 = scmp.ge.s32.totalorder %s15_s15, 4  }
 0x19c   :  { %14 = sbr.rel (!%p12_p4) target bundleno = 1 (0x1), region = 74 }

// kernel: c2f_v2_forward.5
= control target key start
LH: loop header
LB: loop body
LE: loop exit
PB: predicated region body
PF: predicated region fallthrough
CT: control target
= control target key end

     0   :  { %s2752_s24 = smov 0   ;;  %s3153_s0 = inlined_call_operand.vmem [shape: bf16[512,128], index: 0, kind: input, shape index: {}]   ;;  %s3154_s1 = inlined_call_operand.vmem [shape: bf16[512,128], index: 1, kind: input, shape index: {}]   ;;  %s3155_s2 = inlined_call_operand.vmem [shape: bf16[512,128], index: 2, kind: input, shape index: {}]   ;;  %s3156_s3 = inlined_call_operand.vmem [shape: bf16[128,128], index: 3, kind: input, shape index: {}]   ;;  %s3157_s4 = inlined_call_operand.vmem [shape: bf16[128,128], index: 4, kind: input, shape index: {}]   ;;  %s3158_s5 = inlined_call_operand.vmem [shape: bf16[128,128], index: 5, kind: input, shape index: {}]   ;;  %s3159_s6 = inlined_call_operand.vmem [shape: f32[1,128], index: 6, kind: input, shape index: {}]   ;;  %s3160_s7 = inlined_call_operand.vmem [shape: bf16[512,128], index: 7, kind: output, shape index: {}]  }
   0x1 LB: > { %s1921_s25 = sadd.s32 4294967295, %s2710_s24   ;;  %p1925_p0 = scmp.ge.s32.totalorder %s2710_s24, 1  ;;  %s2710_s24 = sphi %s2752_s24, %s17_s24  }
   0x2   : > { %p260_p1 = scmp.lt.s32.totalorder %s2710_s24, 3 }
   0x4   : > { %p261_p2 = pnand %p1925_p0, %p260_p1 }
   0x5   : > { %v2504_v0 = vld [vmem:[%s3157_s4] sm:$0xff] (!%p261_p2)   ;;  %s1926_s28 = sshll.u32 (!%p261_p2), %s1921_s25, 5  ;;  %v2506_v2 = vld [vmem:[%s3157_s4 + $0x8] sm:$0xff] (!%p261_p2)   ;;  %v2508_v4 = vld [vmem:[%s3157_s4 + $0x10] sm:$0xff] (!%p261_p2)  }
   0x6   : > { %264 = sbr.rel (%p261_p2) target bundleno = 382 (0x17e), region = 48  ;;  %v2766_v1 = vld [vmem:[%s3156_s3] sm:$0xff] (!%p261_p2)   ;;  %2272 = vmatprep.subr.bf16.mxu1 (!%p261_p2), %v2504_v0  ;;  %p303_p3 = scmp.lt.s32.totalorder (!%p261_p2), %s1926_s28, 63  ;;  %v2775_v3 = vld [vmem:[%s3156_s3 + $0x8] sm:$0xff] (!%p261_p2)   ;;  %v2785_v5 = vld [vmem:[%s3156_s3 + $0x10] sm:$0xff] (!%p261_p2)  }
   0x7   : > { %2320 = vmatprep.subr.bf16.mxu0 (!%p261_p2), %v2766_v1  ;;  %2273 = vmatpush3.bf16.msra.mxu1 (!%p261_p2), %v2504_v0  ;;  %v2510_v6 = vld [vmem:[%s3157_s4 + $0x18] sm:$0xff] (!%p261_p2)   ;;  %v2512_v8 = vld [vmem:[%s3157_s4 + $0x20] sm:$0xff] (!%p261_p2)   ;;  %v2514_v10 = vld [vmem:[%s3157_s4 + $0x28] sm:$0xff] (!%p261_p2)  }
   0x8   : > { %2321 = vmatpush3.bf16.msra.mxu0 (!%p261_p2), %v2766_v1  ;;  %2274 = vmatprep.subr.bf16.mxu1 (!%p261_p2), %v2506_v2  ;;  %v2795_v7 = vld [vmem:[%s3156_s3 + $0x18] sm:$0xff] (!%p261_p2)   ;;  %v2807_v9 = vld [vmem:[%s3156_s3 + $0x20] sm:$0xff] (!%p261_p2)   ;;  %v2827_v11 = vld [vmem:[%s3156_s3 + $0x28] sm:$0xff] (!%p261_p2)  }
   0x9   : > { %2322 = vmatprep.subr.bf16.mxu0 (!%p261_p2), %v2775_v3  ;;  %v2516_v14 = vld [vmem:[%s3157_s4 + $0x30] sm:$0xff] (!%p261_p2)   ;;  %v2518_v16 = vld [vmem:[%s3157_s4 + $0x38] sm:$0xff] (!%p261_p2)   ;;  %v2524_v19 = vld [vmem:[%s3158_s5] sm:$0xff] (!%p261_p2)  }
   0xa   : > { %v2841_v15 = vld [vmem:[%s3156_s3 + $0x30] sm:$0xff] (!%p261_p2)   ;;  %v2851_v17 = vld [vmem:[%s3156_s3 + $0x38] sm:$0xff] (!%p261_p2)   ;;  %v2525_v21 = vld [vmem:[%s3158_s5 + $0x8] sm:$0xff] (!%p261_p2)  }
   0xb   : > { %2275 = vmatpush3.bf16.msra.mxu1 (!%p261_p2), %v2506_v2  ;;  %v2530_v25 = vld [vmem:[%s3158_s5 + $0x10] sm:$0xff] (!%p261_p2)   ;;  %v2531_v29 = vld [vmem:[%s3158_s5 + $0x18] sm:$0xff] (!%p261_p2)   ;;  %v2536_v31 = vld [vmem:[%s3158_s5 + $0x20] sm:$0xff] (!%p261_p2)  }
   0xc   : > { %2323 = vmatpush3.bf16.msra.mxu0 (!%p261_p2), %v2775_v3  ;;  %2276 = vmatprep.subr.bf16.mxu1 (!%p261_p2), %v2508_v4  ;;  %v2537_v35 = vld [vmem:[%s3158_s5 + $0x28] sm:$0xff] (!%p261_p2)   ;;  %v2542_v37 = vld [vmem:[%s3158_s5 + $0x30] sm:$0xff] (!%p261_p2)   ;;  %v2543_v41 = vld [vmem:[%s3158_s5 + $0x38] sm:$0xff] (!%p261_p2)  }
   0xd   : > { %s3162_s28 = smov (!%p303_p3, %s1926_s28), 63  ;;  %2324 = vmatprep.subr.bf16.mxu0 %v2785_v5 }
   0xe   : > { %s2797_s20 = sshll.u32 %s3162_s28, 2 }
   0xf   : > { %2277 = vmatpush3.bf16.msra.mxu1 %v2508_v4  ;;  %s2813_s28 = scalar_lea.vmem %s3154_s1, %s2797_s20  ;;  %s2822_s10 = scalar_lea.vmem %s3153_s0, %s2797_s20 }
  0x10   : > { %2325 = vmatpush3.bf16.msra.mxu0 %v2785_v5  ;;  %2278 = vmatprep.subr.bf16.mxu1 %v2510_v6  ;;  %v2520_v12 = vld [vmem:[%s2813_s28] sm:$0xff]   ;;  %v2522_v18 = vld [vmem:[%s2813_s28 + $0x8] sm:$0xff]   ;;  %v2526_v22 = vld [vmem:[%s2813_s28 + $0x10] sm:$0xff]   ;;  %s2882_s9 = scalar_lea.vmem %s3155_s2, %s2797_s20  ;;  %s3039_s25 = scalar_lea.vmem %s3160_s7, %s2797_s20 }
  0x11   : > { %2326 = vmatprep.subr.bf16.mxu0 %v2795_v7  ;;  %v2521_v13 = vld [vmem:[%s2822_s10] sm:$0xff]   ;;  %2288 = vmatprep.mubr.bf16.mxu1 %v2520_v12  ;;  %v2523_v20 = vld [vmem:[%s2822_s10 + $0x8] sm:$0xff]   ;;  %v2527_v23 = vld [vmem:[%s2822_s10 + $0x10] sm:$0xff]  }
  0x12   : > { %2336 = vmatprep.mubr.bf16.mxu0 %v2521_v13  ;;  %v2528_v24 = vld [vmem:[%s2813_s28 + $0x18] sm:$0xff]   ;;  %v2532_v27 = vld [vmem:[%s2813_s28 + $0x20] sm:$0xff]   ;;  %v2534_v30 = vld [vmem:[%s2813_s28 + $0x28] sm:$0xff]  }
  0x13   : > { %2279 = vmatpush3.bf16.msra.mxu1 %v2510_v6  ;;  %v2529_v26 = vld [vmem:[%s2822_s10 + $0x18] sm:$0xff]   ;;  %v2533_v28 = vld [vmem:[%s2822_s10 + $0x20] sm:$0xff]   ;;  %v2535_v32 = vld [vmem:[%s2822_s10 + $0x28] sm:$0xff]  }
  0x14   : > { %2327 = vmatpush3.bf16.msra.mxu0 %v2795_v7  ;;  %2280 = vmatprep.subr.bf16.mxu1 %v2512_v8  ;;  %v2538_v33 = vld [vmem:[%s2813_s28 + $0x30] sm:$0xff]   ;;  %v2540_v36 = vld [vmem:[%s2813_s28 + $0x38] sm:$0xff]   ;;  %v2544_v39 = vld [vmem:[%s2813_s28 + $0x40] sm:$0xff]  }
  0x15   : > { %2328 = vmatprep.subr.bf16.mxu0 %v2807_v9  ;;  %v2539_v34 = vld [vmem:[%s2822_s10 + $0x30] sm:$0xff]   ;;  %v2541_v38 = vld [vmem:[%s2822_s10 + $0x38] sm:$0xff]   ;;  %v2545_v40 = vld [vmem:[%s2882_s9] sm:$0xff]  }
  0x16   : > { %v2546_v42 = vld [vmem:[%s2813_s28 + $0x48] sm:$0xff]   ;;  %v2548_v44 = vld [vmem:[%s2813_s28 + $0x50] sm:$0xff]   ;;  %v2550_v46 = vld [vmem:[%s2813_s28 + $0x58] sm:$0xff]  }
  0x17   : > { %2281 = vmatpush3.bf16.msra.mxu1 %v2512_v8  ;;  %v2547_v43 = vld [vmem:[%s2882_s9 + $0x8] sm:$0xff]   ;;  %v2549_v45 = vld [vmem:[%s2882_s9 + $0x10] sm:$0xff]   ;;  %v2551_v47 = vld [vmem:[%s2882_s9 + $0x18] sm:$0xff]  }
  0x18   : > { %2329 = vmatpush3.bf16.msra.mxu0 %v2807_v9  ;;  %2282 = vmatprep.subr.bf16.mxu1 %v2514_v10  ;;  %v2552_v48 = vld [vmem:[%s2813_s28 + $0x60] sm:$0xff]   ;;  %v2554_v50 = vld [vmem:[%s2813_s28 + $0x68] sm:$0xff]   ;;  %v2556_v52 = vld [vmem:[%s2813_s28 + $0x70] sm:$0xff]  }
  0x19   : > { %2330 = vmatprep.subr.bf16.mxu0 %v2827_v11  ;;  %v2553_v49 = vld [vmem:[%s2882_s9 + $0x20] sm:$0xff]   ;;  %v2555_v51 = vld [vmem:[%s2882_s9 + $0x28] sm:$0xff]   ;;  %v2557_v53 = vld [vmem:[%s2882_s9 + $0x30] sm:$0xff]  }
  0x1a   : > { %v2558_v54 = vld [vmem:[%s2813_s28 + $0x78] sm:$0xff]   ;;  %v2560_v56 = vld [vmem:[%s2822_s10 + $0x40] sm:$0xff]   ;;  %v2562_v58 = vld [vmem:[%s2822_s10 + $0x48] sm:$0xff]  }
  0x1b   : > { %2283 = vmatpush3.bf16.msra.mxu1 %v2514_v10  ;;  %v2559_v55 = vld [vmem:[%s2882_s9 + $0x38] sm:$0xff]   ;;  %v2561_v57 = vld [vmem:[%s2882_s9 + $0x40] sm:$0xff]   ;;  %v2563_v59 = vld [vmem:[%s2882_s9 + $0x48] sm:$0xff]  }
  0x1c   : > { %2331 = vmatpush3.bf16.msra.mxu0 %v2827_v11  ;;  %2284 = vmatprep.subr.bf16.mxu1 %v2516_v14  ;;  %v2564_v60 = vld [vmem:[%s2822_s10 + $0x50] sm:$0xff]   ;;  %v2566_v62 = vld [vmem:[%s2822_s10 + $0x58] sm:$0xff]   ;;  %v2568_v0 = vld [vmem:[%s2822_s10 + $0x60] sm:$0xff]  }
  0x1d   : > { %2332 = vmatprep.subr.bf16.mxu0 %v2841_v15  ;;  %v2565_v61 = vld [vmem:[%s2882_s9 + $0x50] sm:$0xff]   ;;  %v2567_v63 = vld [vmem:[%s2882_s9 + $0x58] sm:$0xff]   ;;  %v2570_v2 = vld [vmem:[%s2822_s10 + $0x68] sm:$0xff]  }
  0x1e   : > { %v2572_v4 = vld [vmem:[%s2822_s10 + $0x70] sm:$0xff]   ;;  %v2574_v6 = vld [vmem:[%s2822_s10 + $0x78] sm:$0xff]  }
  0x1f   : > { %2285 = vmatpush3.bf16.msra.mxu1 %v2516_v14 }
  0x20   : > { %2333 = vmatpush3.bf16.msra.mxu0 %v2841_v15  ;;  %2286 = vmatprep.subr.bf16.mxu1 %v2518_v16 }
  0x21   : > { %2334 = vmatprep.subr.bf16.mxu0 %v2851_v17 }
  0x23   : > { %2287 = vmatpush3.bf16.msra.mxu1 %v2518_v16 }
  0x24   : > { %2335 = vmatpush3.bf16.msra.mxu0 %v2851_v17  ;;  %2416 = vmatprep.subr.bf16.mxu1 %v2766_v1 }
  0x25   : > { %2368 = vmatprep.subr.bf16.mxu0 %v2524_v19 }
  0x26   : > { %2289 = vmatmul.mubr.bf16.vlgmr.msra.gmra.mrb[0].mxu1 %v2522_v18 }
  0x27   : > { %2337 = vmatmul.mubr.bf16.vlgmr.msra.gmra.mrb[0].mxu0 %v2523_v20  ;;  %2424 = vmatpush3.bf16.msra.mxu1 %v2766_v1  ;;  %v2569_v1 = vld [vmem:[%s2882_s9 + $0x60] sm:$0xff]  }
  0x28   : > { %2369 = vmatpush3.bf16.msra.mxu0 %v2524_v19  ;;  %2292 = vmatprep.mubr.bf16.mxu1 %v2526_v22 }
  0x29   : > { %2370 = vmatprep.subr.bf16.mxu0 %v2525_v21  ;;  %2340 = vmatprep.mubr.bf16.mxu0 %v2527_v23 }
  0x2a   : > { %2417 = vmatprep.subr.bf16.mxu1 %v2775_v3 }
  0x2b   : > { %2425 = vmatpush3.bf16.msra.mxu1 %v2775_v3  ;;  %v2571_v3 = vld [vmem:[%s2882_s9 + $0x68] sm:$0xff]  }
  0x2c   : > { %2371 = vmatpush3.bf16.msra.mxu0 %v2525_v21  ;;  %2418 = vmatprep.subr.bf16.mxu1 %v2785_v5 }
  0x2d   : > { %2372 = vmatprep.subr.bf16.mxu0 %v2530_v25 }
  0x2e   : > { %2293 = vmatmul.mubr.bf16.gmra.mrb[4].mxu1 %v2528_v24 }
  0x2f   : > { %2341 = vmatmul.mubr.bf16.gmra.mrb[4].mxu0 %v2529_v26  ;;  %2296 = vmatprep.mubr.bf16.mxu1 %v2532_v27 }
  0x30   : > { %2373 = vmatpush3.bf16.msra.mxu0 %v2530_v25  ;;  %2344 = vmatprep.mubr.bf16.mxu0 %v2533_v28  ;;  %v2961_v25 = vld [vmem:[%s3159_s6] ss:$0 sm:$0xff] }
  0x31   : > { %2374 = vmatprep.subr.bf16.mxu0 %v2531_v29  ;;  %2426 = vmatpush3.bf16.msra.mxu1 %v2785_v5  ;;  %v2573_v5 = vld [vmem:[%s2882_s9 + $0x70] sm:$0xff]  }
  0x32   : > { %2419 = vmatprep.subr.bf16.mxu1 %v2795_v7 }
  0x34   : > { %2375 = vmatpush3.bf16.msra.mxu0 %v2531_v29 }
  0x35   : > { %2376 = vmatprep.subr.bf16.mxu0 %v2536_v31  ;;  %2427 = vmatpush3.bf16.msra.mxu1 %v2795_v7  ;;  %v2575_v7 = vld [vmem:[%s2882_s9 + $0x78] sm:$0xff]  }
  0x36   : > { %2297 = vmatmul.mubr.bf16.gmra.mrb[8].mxu1 %v2534_v30  ;;  %2420 = vmatprep.subr.bf16.mxu1 %v2807_v9 }
  0x37   : > { %2345 = vmatmul.mubr.bf16.gmra.mrb[8].mxu0 %v2535_v32  ;;  %2300 = vmatprep.mubr.bf16.mxu1 %v2538_v33 }
  0x38   : > { %2377 = vmatpush3.bf16.msra.mxu0 %v2536_v31  ;;  %2348 = vmatprep.mubr.bf16.mxu0 %v2539_v34 }
  0x39   : > { %2378 = vmatprep.subr.bf16.mxu0 %v2537_v35  ;;  %2428 = vmatpush3.bf16.msra.mxu1 %v2807_v9 }
  0x3a   : > { %2421 = vmatprep.subr.bf16.mxu1 %v2827_v11 }
  0x3c   : > { %2379 = vmatpush3.bf16.msra.mxu0 %v2537_v35 }
  0x3d   : > { %2380 = vmatprep.subr.bf16.mxu0 %v2542_v37  ;;  %2429 = vmatpush3.bf16.msra.mxu1 %v2827_v11 }
  0x3e   : > { %2301 = vmatmul.mubr.bf16.gmra.mrb[12].mxu1 %v2540_v36  ;;  %2422 = vmatprep.subr.bf16.mxu1 %v2841_v15 }
  0x3f   : > { %2349 = vmatmul.mubr.bf16.gmra.mrb[12].mxu0 %v2541_v38  ;;  %2304 = vmatprep.mubr.bf16.mxu1 %v2544_v39 }
  0x40   : > { %2381 = vmatpush3.bf16.msra.mxu0 %v2542_v37  ;;  %2384 = vmatprep.mubr.bf16.mxu0 %v2545_v40 }
  0x41   : > { %2382 = vmatprep.subr.bf16.mxu0 %v2543_v41  ;;  %2430 = vmatpush3.bf16.msra.mxu1 %v2841_v15 }
  0x42   : > { %2423 = vmatprep.subr.bf16.mxu1 %v2851_v17 }
  0x44   : > { %2383 = vmatpush3.bf16.msra.mxu0 %v2543_v41 }
  0x45   : > { %2431 = vmatpush3.bf16.msra.mxu1 %v2851_v17 }
  0x46   : > { %2305 = vmatmul.mubr.bf16.gmra.mrb[16].mxu1 %v2546_v42 }
  0x47   : > { %2385 = vmatmul.mubr.bf16.vlgmr.msra.gmra.mrb[0].mxu0 %v2547_v43  ;;  %2308 = vmatprep.mubr.bf16.mxu1 %v2548_v44 }
  0x48   : > { %2388 = vmatprep.mubr.bf16.mxu0 %v2549_v45 }
  0x4e   : > { %2309 = vmatmul.mubr.bf16.gmra.mrb[20].mxu1 %v2550_v46 }
  0x4f   : > { %2389 = vmatmul.mubr.bf16.gmra.mrb[4].mxu0 %v2551_v47  ;;  %2312 = vmatprep.mubr.bf16.mxu1 %v2552_v48 }
  0x50   : > { %2392 = vmatprep.mubr.bf16.mxu0 %v2553_v49 }
  0x56   : > { %2313 = vmatmul.mubr.bf16.gmra.mrb[24].mxu1 %v2554_v50 }
  0x57   : > { %2393 = vmatmul.mubr.bf16.gmra.mrb[8].mxu0 %v2555_v51  ;;  %2316 = vmatprep.mubr.bf16.mxu1 %v2556_v52 }
  0x58   : > { %2396 = vmatprep.mubr.bf16.mxu0 %v2557_v53 }
  0x5e   : > { %2317 = vmatmul.mubr.bf16.gmra.mrb[28].mxu1 %v2558_v54 }
  0x5f   : > { %2397 = vmatmul.mubr.bf16.gmra.mrb[12].mxu0 %v2559_v55  ;;  %2352 = vmatprep.mubr.bf16.mxu1 %v2560_v56 }
  0x60   : > { %2400 = vmatprep.mubr.bf16.mxu0 %v2561_v57 }
  0x66   : > { %2353 = vmatmul.mubr.bf16.vlgmr.msra.gmra.mrb[16].mxu1 %v2562_v58 }
  0x67   : > { %2401 = vmatmul.mubr.bf16.gmra.mrb[16].mxu0 %v2563_v59  ;;  %2356 = vmatprep.mubr.bf16.mxu1 %v2564_v60 }
  0x68   : > { %2404 = vmatprep.mubr.bf16.mxu0 %v2565_v61 }
  0x6e   : > { %2357 = vmatmul.mubr.bf16.gmra.mrb[20].mxu1 %v2566_v62 }
  0x6f   : > { %2405 = vmatmul.mubr.bf16.gmra.mrb[20].mxu0 %v2567_v63  ;;  %2360 = vmatprep.mubr.bf16.mxu1 %v2568_v0 }
  0x70   : > { %2408 = vmatprep.mubr.bf16.mxu0 %v2569_v1 }
  0x76   : > { %2361 = vmatmul.mubr.bf16.gmra.mrb[24].mxu1 %v2570_v2 }
  0x77   : > { %2409 = vmatmul.mubr.bf16.gmra.mrb[24].mxu0 %v2571_v3  ;;  %2364 = vmatprep.mubr.bf16.mxu1 %v2572_v4 }
  0x78   : > { %2412 = vmatprep.mubr.bf16.mxu0 %v2573_v5 }
  0x7e   : > { %2365 = vmatmul.mubr.bf16.gmra.mrb[28].mxu1 %v2574_v6 }
  0x7f   : > { %2413 = vmatmul.mubr.bf16.gmra.mrb[28].mxu0 %v2575_v7 }
  0xf9   : > { %v2290_v8 = vpop.f32.mrb[0].mxu1 }
  0xfa   : > { %v601_v9 = vpop.f32.mrb[1].mxu1 }
  0xfb   : > { %v2291_v10 = vpop.f32.mrb[2].mxu1 }
  0xfc   : > { %v604_v11 = vpop.f32.mrb[3].mxu1 }
 0x101   : > { %v2294_v12 = vpop.f32.mrb[4].mxu1 }
 0x102   : > { %v617_v13 = vpop.f32.mrb[5].mxu1 }
 0x103   : > { %v2295_v14 = vpop.f32.mrb[6].mxu1 }
 0x104   : > { %v620_v15 = vpop.f32.mrb[7].mxu1 }
 0x109   : > { %v2298_v16 = vpop.f32.mrb[8].mxu1 }
 0x10a   : > { %v633_v17 = vpop.f32.mrb[9].mxu1 }
 0x10b   : > { %v2299_v18 = vpop.f32.mrb[10].mxu1 }
 0x10c   : > { %v2948_v19 = vpop.f32.mrb[11].mxu1 }
 0x111   : > { %v2950_v20 = vpop.f32.mrb[12].mxu1 }
 0x112   : > { %v2952_v21 = vpop.f32.mrb[13].mxu1 }
 0x113   : > { %v2954_v22 = vpop.f32.mrb[14].mxu1 }
 0x114   : > { %v2956_v23 = vpop.f32.mrb[15].mxu1 }
 0x11a   : > { %v2386_v24 = vpop.f32.mrb[0].mxu0 }
 0x11b   : > { %v2432_v26 = vadd.f32 %v2386_v24, %v2290_v8  ;;  %v1259_v27 = vpop.f32.mrb[1].mxu0 }
 0x11c   : > { %v2433_v28 = vadd.f32 %v1259_v27, %v601_v9  ;;  %v2387_v29 = vpop.f32.mrb[2].mxu0 }
 0x11d   : > { %v2964_v30 = vadd.f32 %v2432_v26, %v2961_v25  ;;  %v2434_v31 = vadd.f32 %v2387_v29, %v2291_v10  ;;  %v1262_v32 = vpop.f32.mrb[3].mxu0 }
 0x11e   : > { %v2967_v33 = vadd.f32 %v2433_v28, %v2961_v25  ;;  %v2435_v34 = vadd.f32 %v1262_v32, %v604_v11 }
 0x11f   : > { %v2009_v35 = vmul.f32 -1.442695, %v2964_v30  ;;  %v2971_v36 = vadd.f32 %v2434_v31, %v2961_v25 }
 0x120   : > { %v2007_v37 = vmul.f32 -1.442695, %v2967_v33  ;;  %v2975_v38 = vadd.f32 %v2435_v34, %v2961_v25 }
 0x121   : > { %2576 = vpow2.f32 %v2009_v35  ;;  %v2010_v39 = vmul.f32 -1.442695, %v2971_v36 }
 0x122   : > { %2578 = vpow2.f32 %v2007_v37  ;;  %v2008_v40 = vmul.f32 -1.442695, %v2975_v38  ;;  %v2390_v41 = vpop.f32.mrb[4].mxu0 }
 0x123   : > { %2580 = vpow2.f32 %v2010_v39  ;;  %v2436_v42 = vadd.f32 %v2390_v41, %v2294_v12  ;;  %v1275_v43 = vpop.f32.mrb[5].mxu0 }
 0x124   : > { %2582 = vpow2.f32 %v2008_v40  ;;  %v2437_v44 = vadd.f32 %v1275_v43, %v617_v13  ;;  %v2391_v45 = vpop.f32.mrb[6].mxu0 }
 0x125   : > { %v2980_v46 = vadd.f32 %v2436_v42, %v2961_v25  ;;  %v2438_v47 = vadd.f32 %v2391_v45, %v2295_v14  ;;  %v1278_v48 = vpop.f32.mrb[7].mxu0 }
 0x126   : > { %v2983_v49 = vadd.f32 %v2437_v44, %v2961_v25  ;;  %v2439_v50 = vadd.f32 %v1278_v48, %v620_v15 }
 0x127   : > { %v2013_v51 = vmul.f32 -1.442695, %v2980_v46  ;;  %v2987_v52 = vadd.f32 %v2438_v47, %v2961_v25 }
 0x128   : > { %v2011_v53 = vmul.f32 -1.442695, %v2983_v49  ;;  %v2991_v54 = vadd.f32 %v2439_v50, %v2961_v25 }
 0x129   : > { %2584 = vpow2.f32 %v2013_v51  ;;  %v2014_v55 = vmul.f32 -1.442695, %v2987_v52 }
 0x12a   : > { %2586 = vpow2.f32 %v2011_v53  ;;  %v2012_v56 = vmul.f32 -1.442695, %v2991_v54  ;;  %v2394_v57 = vpop.f32.mrb[8].mxu0 }
 0x12b   : > { %v2577_v58 = vpop.eup %2576  ;;  %2588 = vpow2.f32 %v2014_v55  ;;  %v2440_v59 = vadd.f32 %v2394_v57, %v2298_v16  ;;  %v1291_v60 = vpop.f32.mrb[9].mxu0 }
 0x12c   : > { %v2579_v61 = vpop.eup %2578  ;;  %v1555_v62 = vadd.f32 1.0, %v2577_v58  ;;  %2590 = vpow2.f32 %v2012_v56  ;;  %v2441_v63 = vadd.f32 %v1291_v60, %v633_v17  ;;  %v2395_v0 = vpop.f32.mrb[10].mxu0 }
 0x12d   : > { %v2581_v1 = vpop.eup %2580  ;;  %v1553_v2 = vadd.f32 1.0, %v2579_v61  ;;  %v2996_v3 = vadd.f32 %v2440_v59, %v2961_v25  ;;  %v2442_v4 = vadd.f32 %v2395_v0, %v2299_v18  ;;  %v1294_v5 = vpop.f32.mrb[11].mxu0 }
 0x12e   : > { %v2583_v6 = vpop.eup %2582  ;;  %2592 = vrcp.f32 %v1555_v62  ;;  %v1556_v7 = vadd.f32 1.0, %v2581_v1  ;;  %v2999_v8 = vadd.f32 %v2441_v63, %v2961_v25  ;;  %v2443_v9 = vadd.f32 %v1294_v5, %v2948_v19 }
 0x12f   : > { %2594 = vrcp.f32 %v1553_v2  ;;  %v1554_v10 = vadd.f32 1.0, %v2583_v6  ;;  %v2017_v11 = vmul.f32 -1.442695, %v2996_v3  ;;  %v3004_v12 = vadd.f32 %v2442_v4, %v2961_v25 }
 0x130   : > { %2596 = vrcp.f32 %v1556_v7  ;;  %v2015_v13 = vmul.f32 -1.442695, %v2999_v8  ;;  %v3008_v14 = vadd.f32 %v2443_v9, %v2961_v25 }
 0x131   : > { %2598 = vrcp.f32 %v1554_v10  ;;  %v2018_v15 = vmul.f32 -1.442695, %v3004_v12 }
 0x132   : > { %2600 = vpow2.f32 %v2017_v11  ;;  %v2016_v16 = vmul.f32 -1.442695, %v3008_v14  ;;  %v2398_v17 = vpop.f32.mrb[12].mxu0 }
 0x133   : > { %v2585_v18 = vpop.eup %2584  ;;  %2602 = vpow2.f32 %v2015_v13  ;;  %v2444_v19 = vadd.f32 %v2398_v17, %v2950_v20  ;;  %v1307_v24 = vpop.f32.mrb[13].mxu0 }
 0x134   : > { %v2587_v26 = vpop.eup %2586  ;;  %v1559_v27 = vadd.f32 1.0, %v2585_v18  ;;  %2604 = vpow2.f32 %v2018_v15  ;;  %v2445_v28 = vadd.f32 %v1307_v24, %v2952_v21  ;;  %v2399_v29 = vpop.f32.mrb[14].mxu0 }
 0x135   : > { %v2589_v31 = vpop.eup %2588  ;;  %v1557_v32 = vadd.f32 1.0, %v2587_v26  ;;  %2606 = vpow2.f32 %v2016_v16  ;;  %v3015_v34 = vadd.f32 %v2444_v19, %v2961_v25  ;;  %v2446_v35 = vadd.f32 %v2399_v29, %v2954_v22  ;;  %v1310_v37 = vpop.f32.mrb[15].mxu0 }
 0x136   : > { %v2591_v39 = vpop.eup %2590  ;;  %2608 = vrcp.f32 %v1559_v27  ;;  %v1560_v40 = vadd.f32 1.0, %v2589_v31  ;;  %v3019_v20 = vadd.f32 %v2445_v28, %v2961_v25  ;;  %v2447_v41 = vadd.f32 %v1310_v37, %v2956_v23 }
 0x137   : > { %2610 = vrcp.f32 %v1557_v32  ;;  %v1558_v21 = vadd.f32 1.0, %v2591_v39  ;;  %v2021_v42 = vmul.f32 -1.442695, %v3015_v34  ;;  %v3024_v43 = vadd.f32 %v2446_v35, %v2961_v25 }
 0x138   : > { %v2593_v44 = vpop.eup %2592  ;;  %2612 = vrcp.f32 %v1560_v40  ;;  %v2019_v22 = vmul.f32 -1.442695, %v3019_v20  ;;  %v3028_v45 = vadd.f32 %v2447_v41, %v2961_v25 }
 0x139   : > { %v2595_v47 = vpop.eup %2594  ;;  %2614 = vrcp.f32 %v1558_v21  ;;  %v2022_v48 = vmul.f32 -1.442695, %v3024_v43  ;;  %v2354_v23 = vpop.f32.mrb[16].mxu1  ;;  %v1651_v57 = vmul.f32 %v2593_v44, %v2964_v30 }
 0x13a   : > { %v2597_v50 = vpop.eup %2596  ;;  %2616 = vpow2.f32 %v2021_v42  ;;  %v2020_v51 = vmul.f32 -1.442695, %v3028_v45  ;;  %v2402_v53 = vpop.f32.mrb[16].mxu0  ;;  %v1649_v63 = vmul.f32 %v2595_v47, %v2967_v33 }
 0x13b   : > { %v970_v55 = vpop.f32.mrb[17].mxu1  ;;  %v2599_v56 = vpop.eup %2598  ;;  %v1652_v58 = vmul.f32 %v2597_v50, %v2971_v36  ;;  %2618 = vpow2.f32 %v2019_v22  ;;  %v2448_v59 = vadd.f32 %v2402_v53, %v2354_v23 }
 0x13c   : > { %v1323_v60 = vpop.f32.mrb[17].mxu0  ;;  %v2355_v61 = vpop.f32.mrb[18].mxu1  ;;  %v1650_v0 = vmul.f32 %v2599_v56, %v2975_v38  ;;  %2620 = vpow2.f32 %v2022_v48 }
 0x13d   : > { %v2601_v62 = vpop.eup %2600  ;;  %v2449_v1 = vadd.f32 %v1323_v60, %v970_v55  ;;  %v2403_v30 = vpop.f32.mrb[18].mxu0  ;;  %v2113_v4 = vpack.c.bf16 %v1652_v58, %v1651_v57  ;;  %2622 = vpow2.f32 %v2020_v51  ;;  %v3043_v6 = vadd.f32 %v2448_v59, %v2961_v25 }
 0x13e   : > { %v973_v2 = vpop.f32.mrb[19].mxu1  ;;  %v2603_v36 = vpop.eup %2602  ;;  %v1563_v5 = vadd.f32 1.0, %v2601_v62  ;;  %v2108_v9 = vpack.c.bf16 %v1650_v0, %v1649_v63  ;;  %v2450_v38 = vadd.f32 %v2403_v30, %v2355_v61 }
 0x13f   : > { %v1326_v33 = vpop.f32.mrb[19].mxu0  ;;  %v2605_v7 = vpop.eup %2604  ;;  %v1561_v10 = vadd.f32 1.0, %v2603_v36  ;;  %v3046_v11 = vadd.f32 %v2449_v1, %v2961_v25  ;;  %2185 = vst [vmem:[%s3039_s25 + $0x8] sm:$0xff] %v2113_v4   ;;  %v2025_v16 = vmul.f32 -1.442695, %v3043_v6 }
 0x140   : > { %v2607_v13 = vpop.eup %2606  ;;  %2624 = vrcp.f32 %v1563_v5  ;;  %v1564_v15 = vadd.f32 1.0, %v2605_v7  ;;  %v2451_v17 = vadd.f32 %v1326_v33, %v973_v2  ;;  %2109 = vst [vmem:[%s3039_s25] sm:$0xff] %v2108_v9   ;;  %v3053_v26 = vadd.f32 %v2450_v38, %v2961_v25 }
 0x141   : > { %v2609_v18 = vpop.eup %2608  ;;  %2626 = vrcp.f32 %v1561_v10  ;;  %v1562_v19 = vadd.f32 1.0, %v2607_v13  ;;  %v2023_v24 = vmul.f32 -1.442695, %v3046_v11  ;;  %v2358_v29 = vpop.f32.mrb[20].mxu1 }
 0x142   : > { %v2611_v27 = vpop.eup %2610  ;;  %2628 = vrcp.f32 %v1564_v15  ;;  %v3056_v28 = vadd.f32 %v2451_v17, %v2961_v25  ;;  %v1655_v32 = vmul.f32 %v2609_v18, %v2980_v46  ;;  %v2026_v35 = vmul.f32 -1.442695, %v3053_v26  ;;  %v2406_v37 = vpop.f32.mrb[20].mxu0 }
 0x143   : > { %v2613_v31 = vpop.eup %2612  ;;  %2630 = vrcp.f32 %v1562_v19  ;;  %v986_v39 = vpop.f32.mrb[21].mxu1  ;;  %v2452_v42 = vadd.f32 %v2406_v37, %v2358_v29  ;;  %v1653_v48 = vmul.f32 %v2611_v27, %v2983_v49 }
 0x144   : > { %v2615_v40 = vpop.eup %2614  ;;  %v1656_v41 = vmul.f32 %v2613_v31, %v2987_v52  ;;  %2632 = vpow2.f32 %v2025_v16  ;;  %v2024_v21 = vmul.f32 -1.442695, %v3056_v28  ;;  %v1339_v44 = vpop.f32.mrb[21].mxu0 }
 0x145   : > { %v2359_v22 = vpop.f32.mrb[22].mxu1  ;;  %v2617_v47 = vpop.eup %2616  ;;  %v1654_v23 = vmul.f32 %v2615_v40, %v2991_v54  ;;  %2634 = vpow2.f32 %v2023_v24  ;;  %v2453_v46 = vadd.f32 %v1339_v44, %v986_v39  ;;  %v3065_v56 = vadd.f32 %v2452_v42, %v2961_v25 }
 0x146   : > { %v2407_v50 = vpop.f32.mrb[22].mxu0  ;;  %v989_v51 = vpop.f32.mrb[23].mxu1  ;;  %v2123_v55 = vpack.c.bf16 %v1656_v41, %v1655_v32  ;;  %v1567_v52 = vadd.f32 1.0, %v2617_v47  ;;  %2636 = vpow2.f32 %v2026_v35 }
 0x147   : > { %v2619_v53 = vpop.eup %2618  ;;  %v1342_v57 = vpop.f32.mrb[23].mxu0  ;;  %v2118_v59 = vpack.c.bf16 %v1654_v23, %v1653_v48  ;;  %2638 = vpow2.f32 %v2024_v21  ;;  %v3068_v49 = vadd.f32 %v2453_v46, %v2961_v25  ;;  %v2029_v62 = vmul.f32 -1.442695, %v3065_v56 }
 0x148   : > { %v2621_v58 = vpop.eup %2620  ;;  %v1565_v60 = vadd.f32 1.0, %v2619_v53  ;;  %2187 = vst [vmem:[%s3039_s25 + $0x18] sm:$0xff] %v2123_v55   ;;  %2640 = vrcp.f32 %v1567_v52  ;;  %v2454_v63 = vadd.f32 %v2407_v50, %v2359_v22  ;;  %v2455_v30 = vadd.f32 %v1342_v57, %v989_v51 }
 0x149   : > { %v2623_v54 = vpop.eup %2622  ;;  %v1568_v61 = vadd.f32 1.0, %v2621_v58  ;;  %2186 = vst [vmem:[%s3039_s25 + $0x10] sm:$0xff] %v2118_v59   ;;  %v2027_v1 = vmul.f32 -1.442695, %v3068_v49  ;;  %v2362_v4 = vpop.f32.mrb[24].mxu1 }
 0x14a   : > { %2642 = vrcp.f32 %v1565_v60  ;;  %v1566_v0 = vadd.f32 1.0, %v2623_v54  ;;  %v2625_v2 = vpop.eup %2624  ;;  %v3075_v36 = vadd.f32 %v2454_v63, %v2961_v25  ;;  %v3079_v7 = vadd.f32 %v2455_v30, %v2961_v25  ;;  %v2410_v9 = vpop.f32.mrb[24].mxu0 }
 0x14b   : > { %2644 = vrcp.f32 %v1568_v61  ;;  %v2627_v5 = vpop.eup %2626  ;;  %v1659_v33 = vmul.f32 %v2625_v2, %v2996_v3  ;;  %v1002_v10 = vpop.f32.mrb[25].mxu1  ;;  %v2456_v16 = vadd.f32 %v2410_v9, %v2362_v4 }
 0x14c   : > { %2646 = vrcp.f32 %v1566_v0  ;;  %v2629_v38 = vpop.eup %2628  ;;  %v1657_v13 = vmul.f32 %v2627_v5, %v2999_v8  ;;  %v2030_v15 = vmul.f32 -1.442695, %v3075_v36  ;;  %v1355_v17 = vpop.f32.mrb[25].mxu0  ;;  %v2028_v3 = vmul.f32 -1.442695, %v3079_v7 }
 0x14d   : > { %2648 = vpow2.f32 %v2029_v62  ;;  %v2363_v18 = vpop.f32.mrb[26].mxu1  ;;  %v2631_v19 = vpop.eup %2630  ;;  %v1660_v24 = vmul.f32 %v2629_v38, %v3004_v12  ;;  %v2457_v27 = vadd.f32 %v1355_v17, %v1002_v10  ;;  %v3087_v8 = vadd.f32 %v2456_v16, %v2961_v25 }
 0x14e   : > { %2650 = vpow2.f32 %v2027_v1  ;;  %v2411_v29 = vpop.f32.mrb[26].mxu0  ;;  %v1005_v31 = vpop.f32.mrb[27].mxu1  ;;  %v1658_v35 = vmul.f32 %v2631_v19, %v3008_v14 }
 0x14f   : > { %v2633_v32 = vpop.eup %2632  ;;  %2652 = vpow2.f32 %v2030_v15  ;;  %v2458_v37 = vadd.f32 %v2411_v29, %v2363_v18  ;;  %v1358_v39 = vpop.f32.mrb[27].mxu0  ;;  %v2133_v41 = vpack.c.bf16 %v1660_v24, %v1659_v33  ;;  %v3090_v21 = vadd.f32 %v2457_v27, %v2961_v25 }
 0x150   : > { %v2635_v40 = vpop.eup %2634  ;;  %v1571_v12 = vadd.f32 1.0, %v2633_v32  ;;  %2654 = vpow2.f32 %v2028_v3  ;;  %v2128_v44 = vpack.c.bf16 %v1658_v35, %v1657_v13  ;;  %v2033_v23 = vmul.f32 -1.442695, %v3087_v8 }
 0x151   : > { %v2637_v42 = vpop.eup %2636  ;;  %v1569_v22 = vadd.f32 1.0, %v2635_v40  ;;  %v3093_v47 = vadd.f32 %v2458_v37, %v2961_v25  ;;  %2189 = vst [vmem:[%s3039_s25 + $0x28] sm:$0xff] %v2133_v41   ;;  %v2459_v46 = vadd.f32 %v1358_v39, %v1005_v31  ;;  %v2031_v53 = vmul.f32 -1.442695, %v3090_v21  ;;  %v2366_v55 = vpop.f32.mrb[28].mxu1 }
 0x152   : > { %v2639_v14 = vpop.eup %2638  ;;  %2656 = vrcp.f32 %v1571_v12  ;;  %v1572_v48 = vadd.f32 1.0, %v2637_v42  ;;  %2188 = vst [vmem:[%s3039_s25 + $0x20] sm:$0xff] %v2128_v44   ;;  %v2414_v59 = vpop.f32.mrb[28].mxu0 }
 0x153   : > { %v2641_v50 = vpop.eup %2640  ;;  %2658 = vrcp.f32 %v1569_v22  ;;  %v1570_v51 = vadd.f32 1.0, %v2639_v14  ;;  %v2034_v57 = vmul.f32 -1.442695, %v3093_v47  ;;  %v3101_v58 = vadd.f32 %v2459_v46, %v2961_v25  ;;  %v1018_v60 = vpop.f32.mrb[29].mxu1 }
 0x154   : > { %v2643_v52 = vpop.eup %2642  ;;  %2660 = vrcp.f32 %v1572_v48  ;;  %v1663_v61 = vmul.f32 %v2641_v50, %v3015_v34  ;;  %v2460_v63 = vadd.f32 %v2414_v59, %v2366_v55  ;;  %v1371_v0 = vpop.f32.mrb[29].mxu0 }
 0x155   : > { %v2645_v54 = vpop.eup %2644  ;;  %v1661_v62 = vmul.f32 %v2643_v52, %v3019_v20  ;;  %2662 = vrcp.f32 %v1570_v51  ;;  %v2367_v1 = vpop.f32.mrb[30].mxu1  ;;  %v2032_v4 = vmul.f32 -1.442695, %v3101_v58  ;;  %v2461_v5 = vadd.f32 %v1371_v0, %v1018_v60 }
 0x156   : > { %v2647_v30 = vpop.eup %2646  ;;  %v1664_v2 = vmul.f32 %v2645_v54, %v3024_v43  ;;  %2664 = vpow2.f32 %v2033_v23  ;;  %v2415_v33 = vpop.f32.mrb[30].mxu0  ;;  %v3109_v34 = vadd.f32 %v2460_v63, %v2961_v25 }
 0x157   : > { %v1021_v9 = vpop.f32.mrb[31].mxu1  ;;  %v2649_v10 = vpop.eup %2648  ;;  %v1662_v38 = vmul.f32 %v2647_v30, %v3028_v45  ;;  %2666 = vpow2.f32 %v2031_v53  ;;  %v2462_v20 = vadd.f32 %v2415_v33, %v2367_v1  ;;  %v3112_v17 = vadd.f32 %v2461_v5, %v2961_v25 }
 0x158   : > { %v1374_v13 = vpop.f32.mrb[31].mxu0  ;;  %v2651_v15 = vpop.eup %2650  ;;  %v2143_v16 = vpack.c.bf16 %v1664_v2, %v1663_v61  ;;  %v1575_v43 = vadd.f32 1.0, %v2649_v10  ;;  %2668 = vpow2.f32 %v2034_v57  ;;  %v2037_v27 = vmul.f32 -1.442695, %v3109_v34 }
 0x159   : > { %v2653_v18 = vpop.eup %2652  ;;  %v2138_v19 = vpack.c.bf16 %v1662_v38, %v1661_v62  ;;  %v1573_v24 = vadd.f32 1.0, %v2651_v15  ;;  %2670 = vpow2.f32 %v2032_v4  ;;  %v3117_v29 = vadd.f32 %v2462_v20, %v2961_v25 }
 0x15a   : > { %v2655_v3 = vpop.eup %2654  ;;  %2191 = vst [vmem:[%s3039_s25 + $0x38] sm:$0xff] %v2143_v16   ;;  %2672 = vrcp.f32 %v1575_v43  ;;  %v1576_v45 = vadd.f32 1.0, %v2653_v18  ;;  %v2035_v32 = vmul.f32 -1.442695, %v3112_v17  ;;  %v2463_v35 = vadd.f32 %v1374_v13, %v1021_v9 }
 0x15b   : > { %2190 = vst [vmem:[%s3039_s25 + $0x30] sm:$0xff] %v2138_v19   ;;  %2674 = vrcp.f32 %v1573_v24  ;;  %v1574_v31 = vadd.f32 1.0, %v2655_v3  ;;  %v2038_v39 = vmul.f32 -1.442695, %v3117_v29 }
 0x15c   : > { %v2657_v37 = vpop.eup %2656  ;;  %2676 = vrcp.f32 %v1576_v45  ;;  %v3123_v41 = vadd.f32 %v2463_v35, %v2961_v25 }
 0x15d   : > { %v2659_v40 = vpop.eup %2658  ;;  %2678 = vrcp.f32 %v1574_v31  ;;  %v1667_v44 = vmul.f32 %v2657_v37, %v3043_v6 }
 0x15e   : > { %v2661_v12 = vpop.eup %2660  ;;  %2680 = vpow2.f32 %v2037_v27  ;;  %v2036_v14 = vmul.f32 -1.442695, %v3123_v41  ;;  %v1665_v23 = vmul.f32 %v2659_v40, %v3046_v11 }
 0x15f   : > { %v2663_v42 = vpop.eup %2662  ;;  %v1668_v22 = vmul.f32 %v2661_v12, %v3053_v26  ;;  %2682 = vpow2.f32 %v2035_v32 }
 0x160   : > { %v2665_v48 = vpop.eup %2664  ;;  %v1666_v46 = vmul.f32 %v2663_v42, %v3056_v28  ;;  %2684 = vpow2.f32 %v2038_v39 }
 0x161   : > { %v2667_v25 = vpop.eup %2666  ;;  %v2153_v50 = vpack.c.bf16 %v1668_v22, %v1667_v44  ;;  %v1579_v51 = vadd.f32 1.0, %v2665_v48  ;;  %2686 = vpow2.f32 %v2036_v14 }
 0x162   : > { %v2669_v53 = vpop.eup %2668  ;;  %v2148_v55 = vpack.c.bf16 %v1666_v46, %v1665_v23  ;;  %v1577_v6 = vadd.f32 1.0, %v2667_v25 }
 0x163   : > { %v2671_v52 = vpop.eup %2670  ;;  %2193 = vst [vmem:[%s3039_s25 + $0x48] sm:$0xff] %v2153_v50   ;;  %2688 = vrcp.f32 %v1579_v51  ;;  %v1580_v26 = vadd.f32 1.0, %v2669_v53 }
 0x164   : > { %v2673_v57 = vpop.eup %2672  ;;  %2192 = vst [vmem:[%s3039_s25 + $0x40] sm:$0xff] %v2148_v55   ;;  %2690 = vrcp.f32 %v1577_v6  ;;  %v1578_v59 = vadd.f32 1.0, %v2671_v52 }
 0x165   : > { %v2675_v60 = vpop.eup %2674  ;;  %2692 = vrcp.f32 %v1580_v26  ;;  %v1671_v54 = vmul.f32 %v2673_v57, %v3065_v56 }
 0x166   : > { %v2677_v11 = vpop.eup %2676  ;;  %2694 = vrcp.f32 %v1578_v59  ;;  %v1669_v63 = vmul.f32 %v2675_v60, %v3068_v49 }
 0x167   : > { %v2679_v28 = vpop.eup %2678  ;;  %v1672_v61 = vmul.f32 %v2677_v11, %v3075_v36 }
 0x168   : > { %v2681_v62 = vpop.eup %2680  ;;  %v1670_v0 = vmul.f32 %v2679_v28, %v3079_v7 }
 0x169   : > { %v2683_v1 = vpop.eup %2682  ;;  %v2163_v30 = vpack.c.bf16 %v1672_v61, %v1671_v54  ;;  %v1583_v2 = vadd.f32 1.0, %v2681_v62 }
 0x16a   : > { %v2685_v4 = vpop.eup %2684  ;;  %v2158_v5 = vpack.c.bf16 %v1670_v0, %v1669_v63  ;;  %v1581_v33 = vadd.f32 1.0, %v2683_v1 }
 0x16b   : > { %v2687_v9 = vpop.eup %2686  ;;  %2195 = vst [vmem:[%s3039_s25 + $0x58] sm:$0xff] %v2163_v30   ;;  %2696 = vrcp.f32 %v1583_v2  ;;  %v1584_v10 = vadd.f32 1.0, %v2685_v4 }
 0x16c   : > { %2194 = vst [vmem:[%s3039_s25 + $0x50] sm:$0xff] %v2158_v5   ;;  %2698 = vrcp.f32 %v1581_v33  ;;  %v1582_v56 = vadd.f32 1.0, %v2687_v9 }
 0x16d   : > { %v2689_v36 = vpop.eup %2688  ;;  %2700 = vrcp.f32 %v1584_v10 }
 0x16e   : > { %v2691_v49 = vpop.eup %2690  ;;  %2702 = vrcp.f32 %v1582_v56  ;;  %v1675_v20 = vmul.f32 %v2689_v36, %v3087_v8 }
 0x16f   : > { %v2693_v7 = vpop.eup %2692  ;;  %v1673_v15 = vmul.f32 %v2691_v49, %v3090_v21 }
 0x170   : > { %v2695_v38 = vpop.eup %2694  ;;  %v1676_v13 = vmul.f32 %v2693_v7, %v3093_v47 }
 0x171   : > { %v1674_v16 = vmul.f32 %v2695_v38, %v3101_v58 }
 0x172   : > { %v2173_v43 = vpack.c.bf16 %v1676_v13, %v1675_v20 }
 0x173   : > { %v2168_v18 = vpack.c.bf16 %v1674_v16, %v1673_v15 }
 0x174   : > { %2197 = vst [vmem:[%s3039_s25 + $0x68] sm:$0xff] %v2173_v43  }
 0x175   : > { %v2697_v19 = vpop.eup %2696  ;;  %2196 = vst [vmem:[%s3039_s25 + $0x60] sm:$0xff] %v2168_v18  }
 0x176   : > { %v2699_v24 = vpop.eup %2698  ;;  %v1679_v27 = vmul.f32 %v2697_v19, %v3109_v34 }
 0x177   : > { %v2701_v3 = vpop.eup %2700  ;;  %v1677_v47 = vmul.f32 %v2699_v24, %v3112_v17 }
 0x178   : > { %v2703_v45 = vpop.eup %2702  ;;  %v1680_v8 = vmul.f32 %v2701_v3, %v3117_v29 }
 0x179   : > { %v1678_v21 = vmul.f32 %v2703_v45, %v3123_v41 }
 0x17a   : > { %v2183_v31 = vpack.c.bf16 %v1680_v8, %v1679_v27 }
 0x17b   : > { %v2178_v32 = vpack.c.bf16 %v1678_v21, %v1677_v47 }
 0x17c   : > { %2199 = vst [vmem:[%s3039_s25 + $0x78] sm:$0xff] %v2183_v31  }
 0x17d   : > { %2198 = vst [vmem:[%s3039_s25 + $0x70] sm:$0xff] %v2178_v32  }
 0x17e PF: > { %s17_s24 = sadd.s32 1, %s2710_s24  }
 0x17f   : > { %p14_p4 = scmp.ge.s32.totalorder %s17_s24, 4  }
 0x181   :  { %16 = sbr.rel (!%p14_p4) target bundleno = 1 (0x1), region = 84 }

// kernel: c2f_v2_forward.4
= control target key start
LH: loop header
LB: loop body
LE: loop exit
PB: predicated region body
PF: predicated region fallthrough
CT: control target
= control target key end

     0   :  { %s9582_s18 = smov 0   ;;  %s10957_s0 = inlined_call_operand.vmem [shape: bf16[2,16,16,128], index: 0, kind: input, shape index: {}]   ;;  %s10958_s1 = inlined_call_operand.vmem [shape: bf16[9,128,128], index: 1, kind: input, shape index: {}]   ;;  %s10959_s2 = inlined_call_operand.vmem [shape: f32[1,128], index: 2, kind: input, shape index: {}]   ;;  %s10960_s3 = inlined_call_operand.vmem [shape: bf16[9,128,128], index: 3, kind: input, shape index: {}]   ;;  %s10961_s4 = inlined_call_operand.vmem [shape: f32[1,128], index: 4, kind: input, shape index: {}]   ;;  %s10962_s5 = inlined_call_operand.vmem [shape: bf16[2,16,16,128], index: 5, kind: output, shape index: {}]  }
   0x1 LB: > { %s6585_s19 = sadd.s32 4294967295, %s9548_s18   ;;  %p6589_p0 = scmp.ge.s32.totalorder %s9548_s18, 1  ;;  %s9548_s18 = sphi %s9582_s18, %s15_s18  }
   0x2   : > { %p187_p1 = scmp.lt.s32.totalorder %s9548_s18, 3 }
   0x4   : > { %p188_p2 = pnand %p6589_p0, %p187_p1 }
   0x5   : > { %v9593_v0 = vld [vmem:[%s10958_s1 + $0x40] sm:$0xff] (!%p188_p2)   ;;  %v9598_v1 = vld [vmem:[%s10958_s1 + $0x48] sm:$0xff] (!%p188_p2)   ;;  %v9550_v2 = vmov (!%p188_p2), 0.0   ;;  %p215_p3 = scmp.lt.s32.totalorder (!%p188_p2), %s6585_s19, 1  ;;  %v9121_v3 = vld [vmem:[%s10958_s1 + $0x50] sm:$0xff] (!%p188_p2)  }
   0x6   : > { %191 = sbr.rel (%p188_p2) target bundleno = 1625 (0x659), region = 40  ;;  %226 = vst [vmem:[#allocation2] sm:$0xff] (!%p188_p2), %v9550_v2  ;;  %227 = vst [vmem:[#allocation2 + $0x8] sm:$0xff] (!%p188_p2), %v9550_v2  ;;  %7734 = vmatprep.subr.bf16.mxu0 (!%p188_p2), %v9593_v0  ;;  %v9122_v4 = vld [vmem:[%s10958_s1 + $0x58] sm:$0xff] (!%p188_p2)   ;;  %v9123_v15 = vld [vmem:[%s10958_s1 + $0x60] sm:$0xff] (!%p188_p2)  }
   0x7   : > { %228 = vst [vmem:[#allocation2 + $0x10] sm:$0x3] (!%p188_p2), %v9550_v2  ;;  %229 = vst [vmem:[#allocation2 + $0x18] sm:$0xff] (!%p188_p2), %v9550_v2  ;;  %7735 = vmatpush3.bf16.msra.mxu0 (!%p188_p2), %v9593_v0  ;;  %v9124_v26 = vld [vmem:[%s10958_s1 + $0x68] sm:$0xff] (!%p188_p2)   ;;  %v9125_v38 = vld [vmem:[%s10958_s1 + $0x70] sm:$0xff] (!%p188_p2)  }
   0x8   : > { %230 = vst [vmem:[#allocation2 + $0x20] sm:$0xff] (!%p188_p2), %v9550_v2  ;;  %231 = vst [vmem:[#allocation2 + $0x28] sm:$0x3] (!%p188_p2), %v9550_v2  ;;  %7736 = vmatprep.subr.bf16.mxu0 (!%p188_p2), %v9598_v1  ;;  %v9126_v50 = vld [vmem:[%s10958_s1 + $0x78] sm:$0xff] (!%p188_p2)   ;;  %v9128_v57 = vld [vmem:[%s10958_s1] sm:$0xff] (!%p188_p2)  }
   0x9   : > { %232 = vst [vmem:[#allocation2 + $0x30] sm:$0xff] (!%p188_p2), %v9550_v2  ;;  %233 = vst [vmem:[#allocation2 + $0x38] sm:$0xff] (!%p188_p2), %v9550_v2  ;;  %v9131_v60 = vld [vmem:[%s10958_s1 + $0x8] sm:$0xff] (!%p188_p2)   ;;  %v9134_v61 = vld [vmem:[%s10958_s1 + $0x10] sm:$0xff] (!%p188_p2)  }
   0xa   : > { %234 = vst [vmem:[#allocation2 + $0x40] sm:$0x3] (!%p188_p2), %v9550_v2  ;;  %235 = vst [vmem:[#allocation2 + $0x48] sm:$0xff] (!%p188_p2), %v9550_v2  ;;  %v9137_v0 = vld [vmem:[%s10958_s1 + $0x18] sm:$0xff] (!%p188_p2)  }
   0xb   : > { %236 = vst [vmem:[#allocation2 + $0x50] sm:$0xff] (!%p188_p2), %v9550_v2  ;;  %237 = vst [vmem:[#allocation2 + $0x58] sm:$0x3] (!%p188_p2), %v9550_v2  ;;  %7737 = vmatpush3.bf16.msra.mxu0 (!%p188_p2), %v9598_v1  ;;  %v9140_v1 = vld [vmem:[%s10958_s1 + $0x20] sm:$0xff] (!%p188_p2)  }
   0xc   : > { %238 = vst [vmem:[#allocation2 + $0x60] sm:$0xff] (!%p188_p2), %v9550_v2  ;;  %239 = vst [vmem:[#allocation2 + $0x68] sm:$0xff] (!%p188_p2), %v9550_v2  ;;  %7738 = vmatprep.subr.bf16.mxu0 (!%p188_p2), %v9121_v3 }
   0xd   : > { %240 = vst [vmem:[#allocation2 + $0x70] sm:$0x3] %v9550_v2  ;;  %241 = vst [vmem:[#allocation2 + $0x78] sm:$0xff] %v9550_v2  ;;  %s10964_s19 = smov (!%p215_p3, %s6585_s19), 1  ;;  %v495_v5 = vld [vmem:[#allocation2 + $0x1] sm:$0xff] }
   0xe   : > { %242 = vst [vmem:[#allocation2 + $0x80] sm:$0xff] %v9550_v2  ;;  %243 = vst [vmem:[#allocation2 + $0x88] sm:$0x3] %v9550_v2  ;;  %s7094_s26 = sshll.u32 %s10964_s19, 7  ;;  %v496_v6 = vld [vmem:[#allocation2 + $0x9] sm:$0xff] }
   0xf   : > { %244 = vst [vmem:[#allocation2 + $0x90] sm:$0xff] %v9550_v2  ;;  %245 = vst [vmem:[#allocation2 + $0x98] sm:$0xff] %v9550_v2  ;;  %s9730_s6 = scalar_lea.vmem %s10957_s0, %s7094_s26  ;;  %v527_v8 = vpack.c.bf16 %v496_v6, %v495_v5  ;;  %7739 = vmatpush3.bf16.msra.mxu0 %v9121_v3  ;;  %v9146_v6 = vld [vmem:[%s10958_s1 + $0x30] sm:$0xff]   ;;  %s10843_s11 = scalar_lea.vmem %s10962_s5, %s7094_s26 }
  0x10   : > { %246 = vst [vmem:[#allocation2 + $0xa0] sm:$0x3] %v9550_v2  ;;  %247 = vst [vmem:[#allocation2 + $0xa8] sm:$0xff] %v9550_v2  ;;  %v7129_v7 = vld [vmem:[%s9730_s6] sm:$0xff]   ;;  %v7272_v11 = vld [vmem:[%s9730_s6 + $0x8] sm:$0xff]   ;;  %7740 = vmatprep.subr.bf16.mxu0 %v9122_v4 }
  0x11   : > { %248 = vst [vmem:[#allocation2 + $0xb0] sm:$0xff] %v9550_v2  ;;  %249 = vst [vmem:[#allocation2 + $0xb8] sm:$0x3] %v9550_v2  ;;  %v7130_v9 = vunpack.c.l.bf16 %v7129_v7  ;;  %v7131_v10 = vunpack.c.h.bf16 %v7129_v7  ;;  %7750 = vmatprep.mubr.bf16.mxu0 %v527_v8  ;;  %v7134_v12 = vunpack.c.l.bf16 %v7272_v11  ;;  %v7135_v13 = vunpack.c.h.bf16 %v7272_v11  ;;  %v7273_v14 = vld [vmem:[%s9730_s6 + $0x10] sm:$0xff]   ;;  %v7274_v18 = vld [vmem:[%s9730_s6 + $0x18] sm:$0xff]  }
  0x12   : > { %250 = vst [vmem:[#allocation2 + $0xc0] sm:$0xff] %v9550_v2  ;;  %251 = vst [vmem:[#allocation2 + $0xc8] sm:$0xff] %v9550_v2  ;;  %v7138_v16 = vunpack.c.l.bf16 %v7273_v14  ;;  %v7139_v17 = vunpack.c.h.bf16 %v7273_v14  ;;  %v7142_v19 = vunpack.c.l.bf16 %v7274_v18  ;;  %v7143_v20 = vunpack.c.h.bf16 %v7274_v18  ;;  %v7275_v21 = vld [vmem:[%s9730_s6 + $0x20] sm:$0xff]   ;;  %v7276_v24 = vld [vmem:[%s9730_s6 + $0x28] sm:$0xff]  }
  0x13   : > { %252 = vst [vmem:[#allocation2 + $0xd0] sm:$0x3] %v9550_v2  ;;  %253 = vst [vmem:[#allocation2 + $0xd8] sm:$0xff] %v9550_v2  ;;  %v7146_v22 = vunpack.c.l.bf16 %v7275_v21  ;;  %v7147_v23 = vunpack.c.h.bf16 %v7275_v21  ;;  %7741 = vmatpush3.bf16.msra.mxu0 %v9122_v4  ;;  %v7277_v25 = vld [vmem:[%s9730_s6 + $0x30] sm:$0xff]   ;;  %v7150_v27 = vunpack.c.l.bf16 %v7276_v24  ;;  %v7151_v28 = vunpack.c.h.bf16 %v7276_v24  ;;  %v7278_v31 = vld [vmem:[%s9730_s6 + $0x38] sm:$0xff]  }
  0x14   : > { %254 = vst [vmem:[#allocation2 + $0xe0] sm:$0xff] %v9550_v2  ;;  %255 = vst [vmem:[#allocation2 + $0xe8] sm:$0x3] %v9550_v2  ;;  %7742 = vmatprep.subr.bf16.mxu0 %v9123_v15  ;;  %v7154_v29 = vunpack.c.l.bf16 %v7277_v25  ;;  %v7155_v30 = vunpack.c.h.bf16 %v7277_v25  ;;  %v7158_v32 = vunpack.c.l.bf16 %v7278_v31  ;;  %v7159_v33 = vunpack.c.h.bf16 %v7278_v31  ;;  %v7279_v34 = vld [vmem:[%s9730_s6 + $0x40] sm:$0xff]   ;;  %v7280_v37 = vld [vmem:[%s9730_s6 + $0x48] sm:$0xff]  }
  0x15   : > { %256 = vst [vmem:[#allocation2 + $0xf0] sm:$0xff] %v9550_v2  ;;  %257 = vst [vmem:[#allocation2 + $0xf8] sm:$0xff] %v9550_v2  ;;  %v7162_v35 = vunpack.c.l.bf16 %v7279_v34  ;;  %v7163_v36 = vunpack.c.h.bf16 %v7279_v34  ;;  %v7166_v39 = vunpack.c.l.bf16 %v7280_v37  ;;  %v7167_v40 = vunpack.c.h.bf16 %v7280_v37  ;;  %v7281_v41 = vld [vmem:[%s9730_s6 + $0x50] sm:$0xff]   ;;  %v7282_v44 = vld [vmem:[%s9730_s6 + $0x58] sm:$0xff]  }
  0x16   : > { %258 = vst [vmem:[#allocation2 + $0x100] sm:$0x3] %v9550_v2  ;;  %259 = vst [vmem:[#allocation2 + $0x108] sm:$0xff] %v9550_v2  ;;  %v7170_v42 = vunpack.c.l.bf16 %v7281_v41  ;;  %v7171_v43 = vunpack.c.h.bf16 %v7281_v41  ;;  %v7283_v45 = vld [vmem:[%s9730_s6 + $0x60] sm:$0xff]   ;;  %v7174_v46 = vunpack.c.l.bf16 %v7282_v44  ;;  %v7175_v47 = vunpack.c.h.bf16 %v7282_v44  ;;  %v7284_v51 = vld [vmem:[%s9730_s6 + $0x68] sm:$0xff]  }
  0x17   : > { %260 = vst [vmem:[#allocation2 + $0x110] sm:$0xff] %v9550_v2  ;;  %261 = vst [vmem:[#allocation2 + $0x118] sm:$0x3] %v9550_v2  ;;  %7743 = vmatpush3.bf16.msra.mxu0 %v9123_v15  ;;  %v7178_v48 = vunpack.c.l.bf16 %v7283_v45  ;;  %v7179_v49 = vunpack.c.h.bf16 %v7283_v45  ;;  %v7182_v52 = vunpack.c.l.bf16 %v7284_v51  ;;  %v7183_v53 = vunpack.c.h.bf16 %v7284_v51  ;;  %v7285_v54 = vld [vmem:[%s9730_s6 + $0x70] sm:$0xff]   ;;  %v9127_v58 = vld [vmem:[%s9730_s6] sm:$0xff] }
  0x18   : > { %262 = vst [vmem:[#allocation2 + $0x120] sm:$0xff] %v9550_v2  ;;  %263 = vst [vmem:[#allocation2 + $0x128] sm:$0xff] %v9550_v2  ;;  %7744 = vmatprep.subr.bf16.mxu0 %v9124_v26  ;;  %v7186_v55 = vunpack.c.l.bf16 %v7285_v54  ;;  %v7187_v56 = vunpack.c.h.bf16 %v7285_v54  ;;  %v9129_v59 = vld [vmem:[%s9730_s6 + $0x8] sm:$0xff]  ;;  %v9130_v62 = vld [vmem:[%s9730_s6 + $0x10] sm:$0xff]  ;;  %v9551_v21 = vmov 0.0|0.0  }
  0x19   : > { %264 = vst [vmem:[#allocation2 + $0x130] sm:$0x3] %v9550_v2  ;;  %265 = vst [vmem:[#allocation2 + $0x138] sm:$0xff] %v9550_v2  ;;  %v9132_v63 = vld [vmem:[%s9730_s6 + $0x18] sm:$0xff]  ;;  %v9135_v3 = vld [vmem:[%s9730_s6 + $0x28] sm:$0xff] }
  0x1a   : > { %266 = vst [vmem:[#allocation2 + $0x140] sm:$0xff] %v9550_v2  ;;  %267 = vst [vmem:[#allocation2 + $0x148] sm:$0x3] %v9550_v2  ;;  %v9143_v4 = vld [vmem:[%s10958_s1 + $0x28] sm:$0xff]   ;;  %v9787_v5 = vld [vmem:[%s9730_s6 + $0x30] sm:$0xff] }
  0x1b   : > { %268 = vst [vmem:[#allocation2 + $0x150] sm:$0xff] %v9550_v2  ;;  %269 = vst [vmem:[#allocation2 + $0x158] sm:$0xff] %v9550_v2  ;;  %7745 = vmatpush3.bf16.msra.mxu0 %v9124_v26  ;;  %v9793_v7 = vld [vmem:[%s9730_s6 + $0x38] sm:$0xff]  ;;  %v9807_v11 = vld [vmem:[%s9730_s6 + $0x48] sm:$0xff] }
  0x1c   : > { %270 = vst [vmem:[#allocation2 + $0x160] sm:$0x3] %v9550_v2  ;;  %271 = vst [vmem:[#allocation2 + $0x168] sm:$0xff] %v9550_v2  ;;  %7746 = vmatprep.subr.bf16.mxu0 %v9125_v38  ;;  %v9149_v8 = vld [vmem:[%s10958_s1 + $0x38] sm:$0xff]   ;;  %v9820_v14 = vld [vmem:[%s9730_s6 + $0x60] sm:$0xff] }
  0x1d   : > { %272 = vst [vmem:[#allocation2 + $0x170] sm:$0xff] %v9550_v2  ;;  %273 = vst [vmem:[#allocation2 + $0x178] sm:$0x3] %v9550_v2  ;;  %v9823_v15 = vld [vmem:[%s9730_s6 + $0x68] sm:$0xff]  ;;  %v9153_v31 = vld [vmem:[%s10958_s1 + $0x98] sm:$0xff]  }
  0x1e   : > { %274 = vst [vmem:[#allocation2 + $0x180] sm:$0xff] %v9550_v2  ;;  %275 = vst [vmem:[#allocation2 + $0x188] sm:$0xff] %v9550_v2  ;;  %v9154_v37 = vld [vmem:[%s10958_s1 + $0xa0] sm:$0xff]   ;;  %v9156_v45 = vld [vmem:[%s10958_s1 + $0xb0] sm:$0xff]  }
  0x1f   : > { %276 = vst [vmem:[#allocation2 + $0x190] sm:$0x3] %v9550_v2  ;;  %277 = vst [vmem:[#allocation2 + $0x198] sm:$0xff] %v9550_v2  ;;  %7747 = vmatpush3.bf16.msra.mxu0 %v9125_v38 }
  0x20   : > { %278 = vst [vmem:[#allocation2 + $0x1a0] sm:$0xff] %v9550_v2  ;;  %279 = vst [vmem:[#allocation2 + $0x1a8] sm:$0x3] %v9550_v2  ;;  %7748 = vmatprep.subr.bf16.mxu0 %v9126_v50 }
  0x21   : > { %280 = vst [vmem:[#allocation3] sm:$0xff] %v9550_v2  ;;  %281 = vst [vmem:[#allocation3 + $0x8] sm:$0xff] %v9550_v2 }
  0x22   : > { %282 = vst [vmem:[#allocation3 + $0x10] sm:$0x3] %v9550_v2  ;;  %283 = vst [vmem:[#allocation3 + $0x18] sm:$0xff] %v9550_v2 }
  0x23   : > { %284 = vst [vmem:[#allocation3 + $0x20] sm:$0xff] %v9550_v2  ;;  %285 = vst [vmem:[#allocation3 + $0x28] sm:$0x3] %v9550_v2  ;;  %7749 = vmatpush3.bf16.msra.mxu0 %v9126_v50 }
  0x24   : > { %286 = vst [vmem:[#allocation3 + $0x30] sm:$0xff] %v9550_v2  ;;  %287 = vst [vmem:[#allocation3 + $0x38] sm:$0xff] %v9550_v2  ;;  %7782 = vmatprep.subr.bf16.mxu0 %v9128_v57 }
  0x25   : > { %288 = vst [vmem:[#allocation3 + $0x40] sm:$0x3] %v9550_v2  ;;  %289 = vst [vmem:[#allocation3 + $0x48] sm:$0xff] %v9550_v2 }
  0x26   : > { %290 = vst [vmem:[#allocation3 + $0x50] sm:$0xff] %v9550_v2  ;;  %291 = vst [vmem:[#allocation3 + $0x58] sm:$0x3] %v9550_v2  ;;  %7751 = vmatmul.mubr.bf16.vlgmr.msra.gmra.mrb[0].mxu0 %v9127_v58 }
  0x27   : > { %292 = vst [vmem:[#allocation3 + $0x60] sm:$0xff] %v9550_v2  ;;  %293 = vst [vmem:[#allocation3 + $0x68] sm:$0xff] %v9550_v2  ;;  %7783 = vmatpush3.bf16.msra.mxu0 %v9128_v57  ;;  %7754 = vmatprep.mubr.bf16.mxu0 %v9129_v59 }
  0x28   : > { %294 = vst [vmem:[#allocation3 + $0x70] sm:$0x3] %v9550_v2  ;;  %295 = vst [vmem:[#allocation3 + $0x78] sm:$0xff] %v9550_v2  ;;  %7784 = vmatprep.subr.bf16.mxu0 %v9131_v60 }
  0x29   : > { %296 = vst [vmem:[#allocation3 + $0x80] sm:$0xff] %v9550_v2  ;;  %297 = vst [vmem:[#allocation3 + $0x88] sm:$0x3] %v9550_v2 }
  0x2a   : > { %298 = vst [vmem:[#allocation3 + $0x90] sm:$0xff] %v9550_v2  ;;  %299 = vst [vmem:[#allocation3 + $0x98] sm:$0xff] %v9550_v2 }
  0x2b   : > { %300 = vst [vmem:[#allocation3 + $0xa0] sm:$0x3] %v9550_v2  ;;  %301 = vst [vmem:[#allocation3 + $0xa8] sm:$0xff] %v9550_v2  ;;  %7785 = vmatpush3.bf16.msra.mxu0 %v9131_v60 }
  0x2c   : > { %302 = vst [vmem:[#allocation3 + $0xb0] sm:$0xff] %v9550_v2  ;;  %303 = vst [vmem:[#allocation3 + $0xb8] sm:$0x3] %v9550_v2  ;;  %7786 = vmatprep.subr.bf16.mxu0 %v9134_v61 }
  0x2d   : > { %304 = vst [vmem:[#allocation3 + $0xc0] sm:$0xff] %v9550_v2  ;;  %305 = vst [vmem:[#allocation3 + $0xc8] sm:$0xff] %v9550_v2 }
  0x2e   : > { %306 = vst [vmem:[#allocation3 + $0xd0] sm:$0x3] %v9550_v2  ;;  %307 = vst [vmem:[#allocation3 + $0xd8] sm:$0xff] %v9550_v2  ;;  %7755 = vmatmul.mubr.bf16.gmra.mrb[4].mxu0 %v9130_v62 }
  0x2f   : > { %308 = vst [vmem:[#allocation3 + $0xe0] sm:$0xff] %v9550_v2  ;;  %309 = vst [vmem:[#allocation3 + $0xe8] sm:$0x3] %v9550_v2  ;;  %7758 = vmatprep.mubr.bf16.mxu0 %v9132_v63  ;;  %7787 = vmatpush3.bf16.msra.mxu0 %v9134_v61 }
  0x30   : > { %310 = vst [vmem:[#allocation3 + $0xf0] sm:$0xff] %v9550_v2  ;;  %311 = vst [vmem:[#allocation3 + $0xf8] sm:$0xff] %v9550_v2  ;;  %7788 = vmatprep.subr.bf16.mxu0 %v9137_v0 }
  0x31   : > { %312 = vst [vmem:[#allocation3 + $0x100] sm:$0x3] %v9550_v2  ;;  %313 = vst [vmem:[#allocation3 + $0x108] sm:$0xff] %v9550_v2 }
  0x32   : > { %314 = vst [vmem:[#allocation3 + $0x110] sm:$0xff] %v9550_v2  ;;  %315 = vst [vmem:[#allocation3 + $0x118] sm:$0x3] %v9550_v2 }
  0x33   : > { %316 = vst [vmem:[#allocation3 + $0x120] sm:$0xff] %v9550_v2  ;;  %317 = vst [vmem:[#allocation3 + $0x128] sm:$0xff] %v9550_v2  ;;  %7789 = vmatpush3.bf16.msra.mxu0 %v9137_v0 }
  0x34   : > { %318 = vst [vmem:[#allocation3 + $0x130] sm:$0x3] %v9550_v2  ;;  %319 = vst [vmem:[#allocation3 + $0x138] sm:$0xff] %v9550_v2  ;;  %7790 = vmatprep.subr.bf16.mxu0 %v9140_v1 }
  0x35   : > { %320 = vst [vmem:[#allocation3 + $0x140] sm:$0xff] %v9550_v2  ;;  %321 = vst [vmem:[#allocation3 + $0x148] sm:$0x3] %v9550_v2 }
  0x36   : > { %322 = vst [vmem:[#allocation3 + $0x150] sm:$0xff] %v9550_v2  ;;  %323 = vst [vmem:[#allocation3 + $0x158] sm:$0xff] %v9550_v2 }
  0x37   : > { %324 = vst [vmem:[#allocation3 + $0x160] sm:$0x3] %v9550_v2  ;;  %325 = vst [vmem:[#allocation3 + $0x168] sm:$0xff] %v9550_v2  ;;  %7791 = vmatpush3.bf16.msra.mxu0 %v9140_v1 }
  0x38   : > { %326 = vst [vmem:[#allocation3 + $0x170] sm:$0xff] %v9550_v2  ;;  %327 = vst [vmem:[#allocation3 + $0x178] sm:$0x3] %v9550_v2  ;;  %7792 = vmatprep.subr.bf16.mxu0 %v9143_v4 }
  0x39   : > { %328 = vst [vmem:[#allocation3 + $0x180] sm:$0xff] %v9550_v2  ;;  %329 = vst [vmem:[#allocation3 + $0x188] sm:$0xff] %v9550_v2 }
  0x3a   : > { %330 = vst [vmem:[#allocation3 + $0x190] sm:$0x3] %v9550_v2  ;;  %331 = vst [vmem:[#allocation3 + $0x198] sm:$0xff] %v9550_v2 }
  0x3b   : > { %332 = vst [vmem:[#allocation3 + $0x1a0] sm:$0xff] %v9550_v2  ;;  %333 = vst [vmem:[#allocation3 + $0x1a8] sm:$0x3] %v9550_v2  ;;  %v9779_v2 = vld [vmem:[%s9730_s6 + $0x20] sm:$0xff]  ;;  %7793 = vmatpush3.bf16.msra.mxu0 %v9143_v4 }
  0x3c   : > { %399 = vst [vmem:[#allocation2 + $0x19] sm:$0xff] %v7130_v9  ;;  %400 = vst [vmem:[#allocation2 + $0x21] sm:$0xff] %v7131_v10  ;;  %7759 = vmatmul.mubr.bf16.gmra.mrb[8].mxu0 %v9779_v2  ;;  %7794 = vmatprep.subr.bf16.mxu0 %v9146_v6  ;;  %v9150_v9 = vld [vmem:[%s10958_s1 + $0x80] sm:$0xff]  }
  0x3d   : > { %401 = vst [vmem:[#allocation2 + $0x31] sm:$0xff] %v7134_v12  ;;  %402 = vst [vmem:[#allocation2 + $0x39] sm:$0xff] %v7135_v13  ;;  %7762 = vmatprep.mubr.bf16.mxu0 %v9135_v3  ;;  %v9804_v10 = vld [vmem:[%s9730_s6 + $0x40] sm:$0xff]  ;;  %v9812_v12 = vld [vmem:[%s9730_s6 + $0x50] sm:$0xff] }
  0x3e   : > { %403 = vst [vmem:[#allocation2 + $0x49] sm:$0xff] %v7138_v16  ;;  %404 = vst [vmem:[#allocation2 + $0x51] sm:$0xff] %v7139_v17  ;;  %v9815_v13 = vld [vmem:[%s9730_s6 + $0x58] sm:$0xff]  ;;  %v9828_v16 = vld [vmem:[%s9730_s6 + $0x70] sm:$0xff] }
  0x3f   : > { %405 = vst [vmem:[#allocation2 + $0x61] sm:$0xff] %v7142_v19  ;;  %406 = vst [vmem:[#allocation2 + $0x69] sm:$0xff] %v7143_v20  ;;  %7795 = vmatpush3.bf16.msra.mxu0 %v9146_v6  ;;  %v7286_v3 = vld [vmem:[%s9730_s6 + $0x78] sm:$0xff]  }
  0x40   : > { %407 = vst [vmem:[#allocation2 + $0x79] sm:$0xff] %v7146_v22  ;;  %408 = vst [vmem:[#allocation2 + $0x81] sm:$0xff] %v7147_v23  ;;  %7796 = vmatprep.subr.bf16.mxu0 %v9149_v8  ;;  %v9151_v23 = vld [vmem:[%s10958_s1 + $0x88] sm:$0xff]   ;;  %v7190_v6 = vunpack.c.l.bf16 %v7286_v3 }
  0x41   : > { %409 = vst [vmem:[#allocation2 + $0x91] sm:$0xff] %v7150_v27  ;;  %410 = vst [vmem:[#allocation2 + $0x99] sm:$0xff] %v7151_v28 }
  0x42   : > { %411 = vst [vmem:[#allocation2 + $0xa9] sm:$0xff] %v7154_v29  ;;  %412 = vst [vmem:[#allocation2 + $0xb1] sm:$0xff] %v7155_v30  ;;  %v9152_v29 = vld [vmem:[%s10958_s1 + $0x90] sm:$0xff]  }
  0x43   : > { %413 = vst [vmem:[#allocation2 + $0xc1] sm:$0xff] %v7158_v32  ;;  %414 = vst [vmem:[#allocation2 + $0xc9] sm:$0xff] %v7159_v33  ;;  %7797 = vmatpush3.bf16.msra.mxu0 %v9149_v8  ;;  %v433_v17 = vld [vmem:[#allocation2 + $0x18] sm:$0xff]  ;;  %v434_v18 = vld [vmem:[#allocation2 + $0x20] sm:$0xff]  ;;  %v7191_v8 = vunpack.c.h.bf16 %v7286_v3 }
  0x44   : > { %415 = vst [vmem:[#allocation2 + $0xd9] sm:$0xff] %v7162_v35  ;;  %416 = vst [vmem:[#allocation2 + $0xe1] sm:$0xff] %v7163_v36  ;;  %7763 = vmatmul.mubr.bf16.gmra.mrb[12].mxu0 %v9787_v5  ;;  %7830 = vmatprep.subr.bf16.mxu0 %v9150_v9  ;;  %v435_v19 = vld [vmem:[#allocation2 + $0x30] sm:$0xff]  ;;  %v436_v20 = vld [vmem:[#allocation2 + $0x38] sm:$0xff]  ;;  %v9831_v22 = vpack.c.bf16 %v434_v18, %v433_v17 }
  0x45   : > { %417 = vst [vmem:[#allocation2 + $0xf1] sm:$0xff] %v7166_v39  ;;  %418 = vst [vmem:[#allocation2 + $0xf9] sm:$0xff] %v7167_v40  ;;  %7766 = vmatprep.mubr.bf16.mxu0 %v9793_v7  ;;  %v9836_v24 = vpack.c.bf16 %v436_v20, %v435_v19  ;;  %v437_v25 = vld [vmem:[#allocation2 + $0x48] sm:$0xff]  ;;  %v438_v26 = vld [vmem:[#allocation2 + $0x50] sm:$0xff] }
  0x46   : > { %419 = vst [vmem:[#allocation2 + $0x109] sm:$0xff] %v7170_v42  ;;  %420 = vst [vmem:[#allocation2 + $0x111] sm:$0xff] %v7171_v43  ;;  %v439_v27 = vld [vmem:[#allocation2 + $0x60] sm:$0xff]  ;;  %v440_v28 = vld [vmem:[#allocation2 + $0x68] sm:$0xff]  ;;  %v9843_v30 = vpack.c.bf16 %v438_v26, %v437_v25 }
  0x47   : > { %421 = vst [vmem:[#allocation2 + $0x121] sm:$0xff] %v7174_v46  ;;  %422 = vst [vmem:[#allocation2 + $0x129] sm:$0xff] %v7175_v47  ;;  %v9848_v32 = vpack.c.bf16 %v440_v28, %v439_v27  ;;  %v441_v33 = vld [vmem:[#allocation2 + $0x78] sm:$0xff]  ;;  %v442_v34 = vld [vmem:[#allocation2 + $0x80] sm:$0xff] }
  0x48   : > { %423 = vst [vmem:[#allocation2 + $0x139] sm:$0xff] %v7178_v48  ;;  %424 = vst [vmem:[#allocation2 + $0x141] sm:$0xff] %v7179_v49  ;;  %v443_v35 = vld [vmem:[#allocation2 + $0x90] sm:$0xff]  ;;  %v444_v36 = vld [vmem:[#allocation2 + $0x98] sm:$0xff]  ;;  %v9855_v38 = vpack.c.bf16 %v442_v34, %v441_v33 }
  0x49   : > { %425 = vst [vmem:[#allocation2 + $0x151] sm:$0xff] %v7182_v52  ;;  %426 = vst [vmem:[#allocation2 + $0x159] sm:$0xff] %v7183_v53  ;;  %v9155_v39 = vld [vmem:[%s10958_s1 + $0xa8] sm:$0xff]   ;;  %v9860_v40 = vpack.c.bf16 %v444_v36, %v443_v35  ;;  %v446_v42 = vld [vmem:[#allocation2 + $0xb0] sm:$0xff] }
  0x4a   : > { %427 = vst [vmem:[#allocation2 + $0x169] sm:$0xff] %v7186_v55  ;;  %428 = vst [vmem:[#allocation2 + $0x171] sm:$0xff] %v7187_v56  ;;  %v445_v41 = vld [vmem:[#allocation2 + $0xa8] sm:$0xff]  ;;  %v447_v43 = vld [vmem:[#allocation2 + $0xc0] sm:$0xff] }
  0x4b   : > { %v448_v44 = vld [vmem:[#allocation2 + $0xc8] sm:$0xff]  ;;  %v9867_v46 = vpack.c.bf16 %v446_v42, %v445_v41  ;;  %v9157_v47 = vld [vmem:[%s10958_s1 + $0xb8] sm:$0xff]   ;;  %v450_v50 = vld [vmem:[#allocation2 + $0xe0] sm:$0xff]  ;;  %429 = vst [vmem:[#allocation2 + $0x181] sm:$0xff] %v7190_v6 }
  0x4c   : > { %7767 = vmatmul.mubr.bf16.gmra.mrb[16].mxu0 %v9804_v10  ;;  %v9872_v48 = vpack.c.bf16 %v448_v44, %v447_v43  ;;  %v449_v49 = vld [vmem:[#allocation2 + $0xd8] sm:$0xff]  ;;  %v451_v51 = vld [vmem:[#allocation2 + $0xf0] sm:$0xff]  ;;  %v9158_v53 = vld [vmem:[%s10958_s1 + $0xc0] sm:$0xff]   ;;  %430 = vst [vmem:[#allocation2 + $0x189] sm:$0xff] %v7191_v8 }
  0x4d   : > { %7770 = vmatprep.mubr.bf16.mxu0 %v9807_v11  ;;  %v452_v52 = vld [vmem:[#allocation2 + $0xf8] sm:$0xff]  ;;  %v9879_v54 = vpack.c.bf16 %v450_v50, %v449_v49  ;;  %v453_v56 = vld [vmem:[#allocation2 + $0x108] sm:$0xff]  ;;  %v454_v57 = vld [vmem:[#allocation2 + $0x110] sm:$0xff] }
  0x4e   : > { %v9881_v55 = vpack.c.bf16 %v452_v52, %v451_v51  ;;  %v455_v58 = vld [vmem:[#allocation2 + $0x120] sm:$0xff]  ;;  %v456_v59 = vld [vmem:[#allocation2 + $0x128] sm:$0xff]  ;;  %v9885_v60 = vpack.c.bf16 %v454_v57, %v453_v56  ;;  %v982_v27 = vld [vmem:[#allocation2 + $0x32] sm:$0xff] }
  0x4f   : > { %v9887_v61 = vpack.c.bf16 %v456_v59, %v455_v58  ;;  %v457_v62 = vld [vmem:[#allocation2 + $0x138] sm:$0xff]  ;;  %v458_v63 = vld [vmem:[#allocation2 + $0x140] sm:$0xff]  ;;  %v979_v20 = vld [vmem:[#allocation2 + $0xa] sm:$0xff] }
  0x50   : > { %v459_v0 = vld [vmem:[#allocation2 + $0x150] sm:$0xff]  ;;  %v460_v1 = vld [vmem:[#allocation2 + $0x158] sm:$0xff]  ;;  %v9892_v4 = vpack.c.bf16 %v458_v63, %v457_v62  ;;  %v978_v19 = vld [vmem:[#allocation2 + $0x2] sm:$0xff] }
  0x51   : > { %v461_v17 = vld [vmem:[#allocation2 + $0x168] sm:$0xff]  ;;  %v462_v18 = vld [vmem:[#allocation2 + $0x170] sm:$0xff]  ;;  %v980_v25 = vld [vmem:[#allocation2 + $0x1a] sm:$0xff] }
  0x52   : > { %v981_v26 = vld [vmem:[#allocation2 + $0x22] sm:$0xff]  ;;  %v983_v28 = vld [vmem:[#allocation2 + $0x3a] sm:$0xff]  ;;  %v984_v34 = vld [vmem:[#allocation2 + $0x4a] sm:$0xff] }
  0x53   : > { %v9159_v33 = vld [vmem:[%s10958_s1 + $0xc8] sm:$0xff]   ;;  %v985_v35 = vld [vmem:[#allocation2 + $0x52] sm:$0xff]  ;;  %v988_v44 = vld [vmem:[#allocation2 + $0x7a] sm:$0xff] }
  0x54   : > { %7771 = vmatmul.mubr.bf16.gmra.mrb[20].mxu0 %v9812_v12  ;;  %v986_v36 = vld [vmem:[#allocation2 + $0x62] sm:$0xff]  ;;  %v9913_v41 = vpack.c.bf16 %v985_v35, %v984_v34  ;;  %v9161_v43 = vld [vmem:[%s10958_s1 + $0xd8] sm:$0xff]   ;;  %v992_v56 = vld [vmem:[#allocation2 + $0xaa] sm:$0xff] }
  0x55   : > { %7774 = vmatprep.mubr.bf16.mxu0 %v9815_v13  ;;  %v991_v49 = vld [vmem:[#allocation2 + $0x9a] sm:$0xff]  ;;  %v993_v57 = vld [vmem:[#allocation2 + $0xb2] sm:$0xff]  ;;  %v994_v58 = vld [vmem:[#allocation2 + $0xc2] sm:$0xff] }
  0x56   : > { %v9162_v50 = vld [vmem:[%s10958_s1 + $0xe0] sm:$0xff]   ;;  %v995_v59 = vld [vmem:[#allocation2 + $0xca] sm:$0xff]  ;;  %v9937_v63 = vpack.c.bf16 %v993_v57, %v992_v56  ;;  %v998_v8 = vld [vmem:[#allocation2 + $0xf2] sm:$0xff] }
  0x57   : > { %v9164_v62 = vld [vmem:[%s10958_s1 + $0xf0] sm:$0xff]   ;;  %v996_v3 = vld [vmem:[#allocation2 + $0xda] sm:$0xff]  ;;  %v997_v6 = vld [vmem:[#allocation2 + $0xe2] sm:$0xff] }
  0x58   : > { %v1004_v34 = vld [vmem:[#allocation2 + $0x13a] sm:$0xff]  ;;  %v1005_v35 = vld [vmem:[#allocation2 + $0x142] sm:$0xff]  ;;  %v9172_v57 = vld [vmem:[%s10958_s1 + $0x130] sm:$0xff]  }
  0x59   : > { %v9171_v56 = vld [vmem:[%s10958_s1 + $0x128] sm:$0xff]  }
  0x5c   : > { %7775 = vmatmul.mubr.bf16.gmra.mrb[24].mxu0 %v9820_v14 }
  0x5d   : > { %7778 = vmatprep.mubr.bf16.mxu0 %v9823_v15 }
  0x64   : > { %7779 = vmatmul.mubr.bf16.gmra.mrb[28].mxu0 %v9828_v16 }
  0x65   : > { %7798 = vmatprep.mubr.bf16.mxu0 %v9551_v21  ;;  %v9898_v21 = vpack.c.bf16 %v462_v18, %v461_v17  ;;  %v999_v17 = vld [vmem:[#allocation2 + $0xfa] sm:$0xff] }
  0x66   : > { %v9166_v18 = vld [vmem:[%s10958_s1 + $0x100] sm:$0xff]  }
  0x6c   : > { %7799 = vmatmul.mubr.bf16.vlgmr.msra.gmra.mrb[0].mxu0 %v9831_v22 }
  0x6d   : > { %7831 = vmatpush3.bf16.msra.mxu0 %v9150_v9  ;;  %7802 = vmatprep.mubr.bf16.mxu0 %v9836_v24  ;;  %v9894_v9 = vpack.c.bf16 %v460_v1, %v459_v0  ;;  %v9939_v0 = vpack.c.bf16 %v995_v59, %v994_v58  ;;  %v9165_v1 = vld [vmem:[%s10958_s1 + $0xf8] sm:$0xff]   ;;  %v9174_v59 = vld [vmem:[%s10958_s1 + $0x140] sm:$0xff]  }
  0x6e   : > { %7832 = vmatprep.subr.bf16.mxu0 %v9151_v23  ;;  %v9173_v58 = vld [vmem:[%s10958_s1 + $0x138] sm:$0xff]  }
  0x71   : > { %7833 = vmatpush3.bf16.msra.mxu0 %v9151_v23  ;;  %v1010_v23 = vpack.c.bf16 %v979_v20, %v978_v19  ;;  %v9949_v19 = vpack.c.bf16 %v997_v6, %v996_v3  ;;  %v9951_v20 = vpack.c.bf16 %v999_v17, %v998_v8  ;;  %v9535_v6 = vld [vmem:[%s9730_s6] sm:$0xff]  ;;  %v9175_v8 = vld [vmem:[%s10958_s1 + $0x148] sm:$0xff]  }
  0x72   : > { %7834 = vmatprep.subr.bf16.mxu0 %v9152_v29  ;;  %v9536_v17 = vld [vmem:[%s9730_s6 + $0x8] sm:$0xff] }
  0x74   : > { %7803 = vmatmul.mubr.bf16.gmra.mrb[4].mxu0 %v9843_v30 }
  0x75   : > { %7806 = vmatprep.mubr.bf16.mxu0 %v9848_v32  ;;  %7835 = vmatpush3.bf16.msra.mxu0 %v9152_v29  ;;  %v9901_v29 = vpack.c.bf16 %v981_v26, %v980_v25  ;;  %v1001_v25 = vld [vmem:[#allocation2 + $0x112] sm:$0xff]  ;;  %v1002_v26 = vld [vmem:[#allocation2 + $0x122] sm:$0xff] }
  0x76   : > { %7836 = vmatprep.subr.bf16.mxu0 %v9153_v31 }
  0x79   : > { %7837 = vmatpush3.bf16.msra.mxu0 %v9153_v31  ;;  %v9903_v31 = vpack.c.bf16 %v983_v28, %v982_v27  ;;  %v1003_v27 = vld [vmem:[#allocation2 + $0x12a] sm:$0xff] }
  0x7a   : > { %7838 = vmatprep.subr.bf16.mxu0 %v9154_v37 }
  0x7c   : > { %7807 = vmatmul.mubr.bf16.gmra.mrb[8].mxu0 %v9855_v38 }
  0x7d   : > { %7810 = vmatprep.mubr.bf16.mxu0 %v9860_v40  ;;  %7839 = vmatpush3.bf16.msra.mxu0 %v9154_v37  ;;  %v987_v37 = vld [vmem:[#allocation2 + $0x6a] sm:$0xff] }
  0x7e   : > { %7840 = vmatprep.subr.bf16.mxu0 %v9155_v39  ;;  %v9915_v42 = vpack.c.bf16 %v987_v37, %v986_v36  ;;  %v1006_v36 = vld [vmem:[#allocation2 + $0x152] sm:$0xff]  ;;  %v1007_v37 = vld [vmem:[#allocation2 + $0x15a] sm:$0xff] }
  0x81   : > { %7841 = vmatpush3.bf16.msra.mxu0 %v9155_v39  ;;  %v9160_v39 = vld [vmem:[%s10958_s1 + $0xd0] sm:$0xff]  }
  0x82   : > { %7842 = vmatprep.subr.bf16.mxu0 %v9156_v45 }
  0x84   : > { %7811 = vmatmul.mubr.bf16.gmra.mrb[12].mxu0 %v9867_v46 }
  0x85   : > { %7814 = vmatprep.mubr.bf16.mxu0 %v9872_v48  ;;  %7843 = vmatpush3.bf16.msra.mxu0 %v9156_v45  ;;  %v989_v45 = vld [vmem:[#allocation2 + $0x82] sm:$0xff] }
  0x86   : > { %7844 = vmatprep.subr.bf16.mxu0 %v9157_v47  ;;  %v9925_v51 = vpack.c.bf16 %v989_v45, %v988_v44  ;;  %v1008_v44 = vld [vmem:[#allocation2 + $0x16a] sm:$0xff]  ;;  %v1009_v45 = vld [vmem:[#allocation2 + $0x172] sm:$0xff] }
  0x89   : > { %7845 = vmatpush3.bf16.msra.mxu0 %v9157_v47  ;;  %v990_v47 = vld [vmem:[#allocation2 + $0x92] sm:$0xff] }
  0x8a   : > { %7878 = vmatprep.subr.bf16.mxu0 %v9158_v53  ;;  %v9927_v52 = vpack.c.bf16 %v991_v49, %v990_v47  ;;  %v9967_v47 = vpack.c.bf16 %v1009_v45, %v1008_v44  ;;  %v9167_v49 = vld [vmem:[%s10958_s1 + $0x108] sm:$0xff]  }
  0x8c   : > { %7815 = vmatmul.mubr.bf16.gmra.mrb[16].mxu0 %v9879_v54 }
  0x8d   : > { %7818 = vmatprep.mubr.bf16.mxu0 %v9881_v55 }
  0x94   : > { %7819 = vmatmul.mubr.bf16.gmra.mrb[20].mxu0 %v9885_v60 }
  0x95   : > { %7822 = vmatprep.mubr.bf16.mxu0 %v9887_v61 }
  0x9c   : > { %7823 = vmatmul.mubr.bf16.gmra.mrb[24].mxu0 %v9892_v4 }
  0x9d   : > { %7826 = vmatprep.mubr.bf16.mxu0 %v9894_v9 }
  0xa4   : > { %7827 = vmatmul.mubr.bf16.gmra.mrb[28].mxu0 %v9898_v21 }
  0xa5   : > { %7846 = vmatprep.mubr.bf16.mxu0 %v1010_v23  ;;  %v1000_v23 = vld [vmem:[#allocation2 + $0x10a] sm:$0xff] }
  0xa6   : > { %v9955_v28 = vpack.c.bf16 %v1001_v25, %v1000_v23  ;;  %v9176_v23 = vld [vmem:[%s10958_s1 + $0x150] sm:$0xff]   ;;  %v9177_v25 = vld [vmem:[%s10958_s1 + $0x158] sm:$0xff]  }
  0xac   : > { %7847 = vmatmul.mubr.bf16.vlgmr.msra.gmra.mrb[0].mxu0 %v9901_v29 }
  0xad   : > { %7879 = vmatpush3.bf16.msra.mxu0 %v9158_v53  ;;  %7850 = vmatprep.mubr.bf16.mxu0 %v9903_v31  ;;  %v9163_v53 = vld [vmem:[%s10958_s1 + $0xe8] sm:$0xff]  }
  0xae   : > { %7880 = vmatprep.subr.bf16.mxu0 %v9159_v33 }
  0xb1   : > { %7881 = vmatpush3.bf16.msra.mxu0 %v9159_v33  ;;  %v9957_v33 = vpack.c.bf16 %v1003_v27, %v1002_v26  ;;  %v9538_v26 = vld [vmem:[%s9730_s6 + $0x18] sm:$0xff]  ;;  %v9178_v27 = vld [vmem:[%s10958_s1 + $0x160] sm:$0xff]  }
  0xb2   : > { %7882 = vmatprep.subr.bf16.mxu0 %v9160_v39 }
  0xb4   : > { %7851 = vmatmul.mubr.bf16.gmra.mrb[4].mxu0 %v9913_v41 }
  0xb5   : > { %7854 = vmatprep.mubr.bf16.mxu0 %v9915_v42  ;;  %7883 = vmatpush3.bf16.msra.mxu0 %v9160_v39  ;;  %v9961_v39 = vpack.c.bf16 %v1005_v35, %v1004_v34  ;;  %v9179_v34 = vld [vmem:[%s10958_s1 + $0x168] sm:$0xff]  }
  0xb6   : > { %7884 = vmatprep.subr.bf16.mxu0 %v9161_v43  ;;  %v9539_v35 = vld [vmem:[%s9730_s6 + $0x28] sm:$0xff] }
  0xb9   : > { %7885 = vmatpush3.bf16.msra.mxu0 %v9161_v43  ;;  %v9963_v43 = vpack.c.bf16 %v1007_v37, %v1006_v36  ;;  %v9182_v36 = vld [vmem:[%s10958_s1 + $0x178] sm:$0xff]  }
  0xba   : > { %7886 = vmatprep.subr.bf16.mxu0 %v9162_v50  ;;  %v2517_v37 = vld [vmem:[#allocation2 + $0x91] sm:$0xff] }
  0xbc   : > { %7855 = vmatmul.mubr.bf16.gmra.mrb[8].mxu0 %v9925_v51 }
  0xbd   : > { %7858 = vmatprep.mubr.bf16.mxu0 %v9927_v52  ;;  %7887 = vmatpush3.bf16.msra.mxu0 %v9162_v50  ;;  %v9168_v50 = vld [vmem:[%s10958_s1 + $0x110] sm:$0xff]  }
  0xbe   : > { %7888 = vmatprep.subr.bf16.mxu0 %v9163_v53 }
  0xc1   : > { %7889 = vmatpush3.bf16.msra.mxu0 %v9163_v53  ;;  %v9170_v53 = vld [vmem:[%s10958_s1 + $0x120] sm:$0xff]  }
  0xc2   : > { %7890 = vmatprep.subr.bf16.mxu0 %v9164_v62 }
  0xc4   : > { %7859 = vmatmul.mubr.bf16.gmra.mrb[12].mxu0 %v9937_v63 }
  0xc5   : > { %7862 = vmatprep.mubr.bf16.mxu0 %v9939_v0  ;;  %7891 = vmatpush3.bf16.msra.mxu0 %v9164_v62  ;;  %v1314_v62 = vld [vmem:[#allocation2 + $0x180] sm:$0xff] }
  0xc6   : > { %7892 = vmatprep.subr.bf16.mxu0 %v9165_v1 }
  0xc9   : > { %7893 = vmatpush3.bf16.msra.mxu0 %v9165_v1  ;;  %v1315_v1 = vld [vmem:[#allocation2 + $0x188] sm:$0xff] }
  0xca   : > { %7926 = vmatprep.subr.bf16.mxu0 %v9166_v18  ;;  %v10009_v3 = vpack.c.bf16 %v1315_v1, %v1314_v62  ;;  %v2523_v62 = vld [vmem:[#allocation2 + $0xd9] sm:$0xff]  ;;  %v2524_v1 = vld [vmem:[#allocation2 + $0xe1] sm:$0xff] }
  0xcc   : > { %7863 = vmatmul.mubr.bf16.gmra.mrb[16].mxu0 %v9949_v19 }
  0xcd   : > { %7866 = vmatprep.mubr.bf16.mxu0 %v9951_v20 }
  0xd4   : > { %7867 = vmatmul.mubr.bf16.gmra.mrb[20].mxu0 %v9955_v28 }
  0xd5   : > { %7870 = vmatprep.mubr.bf16.mxu0 %v9957_v33 }
  0xdc   : > { %7871 = vmatmul.mubr.bf16.gmra.mrb[24].mxu0 %v9961_v39 }
  0xdd   : > { %7874 = vmatprep.mubr.bf16.mxu0 %v9963_v43 }
  0xe4   : > { %7875 = vmatmul.mubr.bf16.gmra.mrb[28].mxu0 %v9967_v47 }
  0xe5   : > { %7894 = vmatprep.mubr.bf16.mxu0 %v9831_v22  ;;  %v9169_v22 = vld [vmem:[%s10958_s1 + $0x118] sm:$0xff]  }
  0xec   : > { %7895 = vmatmul.mubr.bf16.vlgmr.msra.gmra.mrb[0].mxu0 %v9836_v24 }
  0xed   : > { %7927 = vmatpush3.bf16.msra.mxu0 %v9166_v18  ;;  %7898 = vmatprep.mubr.bf16.mxu0 %v9843_v30  ;;  %v9537_v18 = vld [vmem:[%s9730_s6 + $0x10] sm:$0xff] }
  0xee   : > { %7928 = vmatprep.subr.bf16.mxu0 %v9167_v49 }
  0xf1   : > { %7929 = vmatpush3.bf16.msra.mxu0 %v9167_v49  ;;  %v2519_v49 = vld [vmem:[#allocation2 + $0xa9] sm:$0xff] }
  0xf2   : > { %7930 = vmatprep.subr.bf16.mxu0 %v9168_v50 }
  0xf4   : > { %7899 = vmatmul.mubr.bf16.gmra.mrb[4].mxu0 %v9848_v32 }
  0xf5   : > { %7902 = vmatprep.mubr.bf16.mxu0 %v9855_v38  ;;  %7931 = vmatpush3.bf16.msra.mxu0 %v9168_v50  ;;  %v2520_v50 = vld [vmem:[#allocation2 + $0xb1] sm:$0xff] }
  0xf6   : > { %7932 = vmatprep.subr.bf16.mxu0 %v9169_v22 }
  0xf9   : > { %7933 = vmatpush3.bf16.msra.mxu0 %v9169_v22  ;;  %v2521_v22 = vld [vmem:[#allocation2 + $0xc1] sm:$0xff] }
  0xfa   : > { %7934 = vmatprep.subr.bf16.mxu0 %v9170_v53 }
  0xfc   : > { %7903 = vmatmul.mubr.bf16.gmra.mrb[8].mxu0 %v9860_v40 }
  0xfd   : > { %7906 = vmatprep.mubr.bf16.mxu0 %v9867_v46  ;;  %7935 = vmatpush3.bf16.msra.mxu0 %v9170_v53  ;;  %v2522_v53 = vld [vmem:[#allocation2 + $0xc9] sm:$0xff] }
  0xfe   : > { %7936 = vmatprep.subr.bf16.mxu0 %v9171_v56 }
 0x101   : > { %7937 = vmatpush3.bf16.msra.mxu0 %v9171_v56  ;;  %v9203_v56 = vld [vmem:[%s10958_s1 + $0x220] sm:$0xff]  }
 0x102   : > { %7938 = vmatprep.subr.bf16.mxu0 %v9172_v57 }
 0x104   : > { %7907 = vmatmul.mubr.bf16.gmra.mrb[12].mxu0 %v9872_v48 }
 0x105   : > { %7910 = vmatprep.mubr.bf16.mxu0 %v9879_v54  ;;  %7939 = vmatpush3.bf16.msra.mxu0 %v9172_v57  ;;  %v2546_v57 = vpack.c.bf16 %v2520_v50, %v2519_v49  ;;  %v2835_v49 = vld [vmem:[#allocation2 + $0x122] sm:$0xff]  ;;  %v2836_v50 = vld [vmem:[#allocation2 + $0x12a] sm:$0xff] }
 0x106   : > { %7940 = vmatprep.subr.bf16.mxu0 %v9173_v58 }
 0x109   : > { %7941 = vmatpush3.bf16.msra.mxu0 %v9173_v58  ;;  %v2547_v58 = vpack.c.bf16 %v2522_v53, %v2521_v22  ;;  %v2857_v53 = vpack.c.bf16 %v2836_v50, %v2835_v49 }
 0x10a   : > { %7974 = vmatprep.subr.bf16.mxu0 %v9174_v59 }
 0x10c   : > { %7911 = vmatmul.mubr.bf16.gmra.mrb[16].mxu0 %v9881_v55 }
 0x10d   : > { %7914 = vmatprep.mubr.bf16.mxu0 %v9885_v60 }
 0x114   : > { %7915 = vmatmul.mubr.bf16.gmra.mrb[20].mxu0 %v9887_v61 }
 0x115   : > { %7918 = vmatprep.mubr.bf16.mxu0 %v9892_v4 }
 0x11c   : > { %7919 = vmatmul.mubr.bf16.gmra.mrb[24].mxu0 %v9894_v9 }
 0x11d   : > { %7922 = vmatprep.mubr.bf16.mxu0 %v9898_v21 }
 0x124   : > { %7923 = vmatmul.mubr.bf16.gmra.mrb[28].mxu0 %v10009_v3 }
 0x125   : > { %7942 = vmatprep.mubr.bf16.mxu0 %v9535_v6  ;;  %v2526_v6 = vld [vmem:[#allocation2 + $0xf9] sm:$0xff] }
 0x12c   : > { %7943 = vmatmul.mubr.bf16.vlgmr.msra.gmra.mrb[0].mxu0 %v9536_v17  ;;  %v2548_v17 = vpack.c.bf16 %v2524_v1, %v2523_v62 }
 0x12d   : > { %7975 = vmatpush3.bf16.msra.mxu0 %v9174_v59  ;;  %7946 = vmatprep.mubr.bf16.mxu0 %v9537_v18  ;;  %v9204_v59 = vld [vmem:[%s10958_s1 + $0x228] sm:$0xff]  }
 0x12e   : > { %7976 = vmatprep.subr.bf16.mxu0 %v9175_v8 }
 0x131   : > { %7977 = vmatpush3.bf16.msra.mxu0 %v9175_v8  ;;  %v9205_v8 = vld [vmem:[%s10958_s1 + $0x230] sm:$0xff]  }
 0x132   : > { %7978 = vmatprep.subr.bf16.mxu0 %v9176_v23 }
 0x134   : > { %7947 = vmatmul.mubr.bf16.gmra.mrb[4].mxu0 %v9538_v26  ;;  %v2528_v26 = vld [vmem:[#allocation2 + $0x111] sm:$0xff] }
 0x135   : > { %7950 = vmatprep.mubr.bf16.mxu0 %v9779_v2  ;;  %7979 = vmatpush3.bf16.msra.mxu0 %v9176_v23  ;;  %v9180_v2 = vld [vmem:[%s10958_s1 + $0x170] sm:$0xff]   ;;  %v9206_v23 = vld [vmem:[%s10958_s1 + $0x238] sm:$0xff]  }
 0x136   : > { %7980 = vmatprep.subr.bf16.mxu0 %v9177_v25 }
 0x139   : > { %7981 = vmatpush3.bf16.msra.mxu0 %v9177_v25  ;;  %v2527_v25 = vld [vmem:[#allocation2 + $0x109] sm:$0xff] }
 0x13a   : > { %7982 = vmatprep.subr.bf16.mxu0 %v9178_v27 }
 0x13c   : > { %7951 = vmatmul.mubr.bf16.gmra.mrb[8].mxu0 %v9539_v35  ;;  %v2550_v35 = vpack.c.bf16 %v2528_v26, %v2527_v25  ;;  %v9207_v25 = vld [vmem:[%s10960_s3 + $0x40] sm:$0xff]   ;;  %v9208_v26 = vld [vmem:[%s10960_s3 + $0x48] sm:$0xff]  }
 0x13d   : > { %7954 = vmatprep.mubr.bf16.mxu0 %v9787_v5  ;;  %7983 = vmatpush3.bf16.msra.mxu0 %v9178_v27  ;;  %v9183_v5 = vld [vmem:[%s10958_s1 + $0x180] sm:$0xff]  }
 0x13e   : > { %7984 = vmatprep.subr.bf16.mxu0 %v9179_v34  ;;  %v2529_v27 = vld [vmem:[#allocation2 + $0x121] sm:$0xff]  ;;  %8166 = vmatprep.subr.bf16.mxu1 %v9207_v25 }
 0x13f   : > { %8167 = vmatpush3.bf16.msra.mxu1 %v9207_v25 }
 0x140   : > { %8168 = vmatprep.subr.bf16.mxu1 %v9208_v26 }
 0x141   : > { %7985 = vmatpush3.bf16.msra.mxu0 %v9179_v34  ;;  %v2530_v34 = vld [vmem:[#allocation2 + $0x129] sm:$0xff] }
 0x142   : > { %7986 = vmatprep.subr.bf16.mxu0 %v9180_v2 }
 0x143   : > { %8169 = vmatpush3.bf16.msra.mxu1 %v9208_v26 }
 0x144   : > { %7955 = vmatmul.mubr.bf16.gmra.mrb[12].mxu0 %v9793_v7  ;;  %v10052_v7 = vld [vmem:[%s9730_s6 + $0x78] sm:$0xff] }
 0x145   : > { %7958 = vmatprep.mubr.bf16.mxu0 %v9804_v10  ;;  %7987 = vmatpush3.bf16.msra.mxu0 %v9180_v2  ;;  %v9184_v10 = vld [vmem:[%s10958_s1 + $0x188] sm:$0xff]   ;;  %v2551_v2 = vpack.c.bf16 %v2530_v34, %v2529_v27  ;;  %v9210_v27 = vld [vmem:[%s10960_s3 + $0x58] sm:$0xff]   ;;  %v9211_v34 = vld [vmem:[%s10960_s3 + $0x60] sm:$0xff]  }
 0x146   : > { %7988 = vmatprep.subr.bf16.mxu0 %v9182_v36 }
 0x149   : > { %7989 = vmatpush3.bf16.msra.mxu0 %v9182_v36  ;;  %v2531_v36 = vld [vmem:[#allocation2 + $0x139] sm:$0xff] }
 0x14a   : > { %8022 = vmatprep.subr.bf16.mxu0 %v9183_v5 }
 0x14c   : > { %7959 = vmatmul.mubr.bf16.gmra.mrb[16].mxu0 %v9807_v11  ;;  %v9185_v11 = vld [vmem:[%s10958_s1 + $0x190] sm:$0xff]  }
 0x14d   : > { %7962 = vmatprep.mubr.bf16.mxu0 %v9812_v12  ;;  %v9186_v12 = vld [vmem:[%s10958_s1 + $0x198] sm:$0xff]  }
 0x154   : > { %7963 = vmatmul.mubr.bf16.gmra.mrb[20].mxu0 %v9815_v13  ;;  %v9187_v13 = vld [vmem:[%s10958_s1 + $0x1a0] sm:$0xff]  }
 0x155   : > { %7966 = vmatprep.mubr.bf16.mxu0 %v9820_v14  ;;  %v9188_v14 = vld [vmem:[%s10958_s1 + $0x1a8] sm:$0xff]  }
 0x15c   : > { %7967 = vmatmul.mubr.bf16.gmra.mrb[24].mxu0 %v9823_v15  ;;  %v9189_v15 = vld [vmem:[%s10958_s1 + $0x1b0] sm:$0xff]  }
 0x15d   : > { %7970 = vmatprep.mubr.bf16.mxu0 %v9828_v16  ;;  %v9190_v16 = vld [vmem:[%s10958_s1 + $0x1b8] sm:$0xff]  }
 0x164   : > { %7971 = vmatmul.mubr.bf16.gmra.mrb[28].mxu0 %v10052_v7 }
 0x165   : > { %7990 = vmatprep.mubr.bf16.mxu0 %v9901_v29  ;;  %v9191_v29 = vld [vmem:[%s10958_s1 + $0x1c0] sm:$0xff]  }
 0x16c   : > { %7991 = vmatmul.mubr.bf16.vlgmr.msra.gmra.mrb[0].mxu0 %v9903_v31  ;;  %v1926_v31 = vld [vmem:[#allocation2 + $0x182] sm:$0xff] }
 0x16d   : > { %8023 = vmatpush3.bf16.msra.mxu0 %v9183_v5  ;;  %7994 = vmatprep.mubr.bf16.mxu0 %v9913_v41  ;;  %v1927_v41 = vld [vmem:[#allocation2 + $0x18a] sm:$0xff]  ;;  %v2532_v5 = vld [vmem:[#allocation2 + $0x141] sm:$0xff] }
 0x16e   : > { %8024 = vmatprep.subr.bf16.mxu0 %v9184_v10 }
 0x171   : > { %8025 = vmatpush3.bf16.msra.mxu0 %v9184_v10  ;;  %v2533_v10 = vld [vmem:[#allocation2 + $0x151] sm:$0xff] }
 0x172   : > { %8026 = vmatprep.subr.bf16.mxu0 %v9185_v11 }
 0x174   : > { %7995 = vmatmul.mubr.bf16.gmra.mrb[4].mxu0 %v9915_v42  ;;  %v10094_v42 = vpack.c.bf16 %v1927_v41, %v1926_v31  ;;  %v2540_v31 = vld [vmem:[#allocation2 + $0x1a1] sm:$0xff]  ;;  %v2815_v41 = vld [vmem:[#allocation2 + $0x32] sm:$0xff] }
 0x175   : > { %7998 = vmatprep.mubr.bf16.mxu0 %v9925_v51  ;;  %8027 = vmatpush3.bf16.msra.mxu0 %v9185_v11  ;;  %v9192_v51 = vld [vmem:[%s10958_s1 + $0x1c8] sm:$0xff]   ;;  %v2534_v11 = vld [vmem:[#allocation2 + $0x159] sm:$0xff] }
 0x176   : > { %8028 = vmatprep.subr.bf16.mxu0 %v9186_v12 }
 0x179   : > { %8029 = vmatpush3.bf16.msra.mxu0 %v9186_v12  ;;  %v2552_v12 = vpack.c.bf16 %v2532_v5, %v2531_v36  ;;  %v9214_v36 = vld [vmem:[%s10960_s3 + $0x78] sm:$0xff]  }
 0x17a   : > { %8030 = vmatprep.subr.bf16.mxu0 %v9187_v13  ;;  %v3481_v5 = vld [vmem:[#allocation3 + $0x1] sm:$0xff] }
 0x17c   : > { %7999 = vmatmul.mubr.bf16.gmra.mrb[8].mxu0 %v9927_v52  ;;  %v9193_v52 = vld [vmem:[%s10958_s1 + $0x1d0] sm:$0xff]  }
 0x17d   : > { %8002 = vmatprep.mubr.bf16.mxu0 %v9937_v63  ;;  %8031 = vmatpush3.bf16.msra.mxu0 %v9187_v13  ;;  %v2553_v13 = vpack.c.bf16 %v2534_v11, %v2533_v10  ;;  %v3482_v10 = vld [vmem:[#allocation3 + $0x9] sm:$0xff] }
 0x17e   : > { %8032 = vmatprep.subr.bf16.mxu0 %v9188_v14  ;;  %v3513_v11 = vpack.c.bf16 %v3482_v10, %v3481_v5 }
 0x180   : > { %8182 = vmatprep.mubr.bf16.mxu1 %v3513_v11 }
 0x181   : > { %8033 = vmatpush3.bf16.msra.mxu0 %v9188_v14  ;;  %v2535_v14 = vld [vmem:[#allocation2 + $0x169] sm:$0xff] }
 0x182   : > { %8034 = vmatprep.subr.bf16.mxu0 %v9189_v15 }
 0x184   : > { %8003 = vmatmul.mubr.bf16.gmra.mrb[12].mxu0 %v9939_v0 }
 0x185   : > { %8006 = vmatprep.mubr.bf16.mxu0 %v9949_v19  ;;  %8035 = vmatpush3.bf16.msra.mxu0 %v9189_v15  ;;  %v2511_v19 = vld [vmem:[#allocation2 + $0x49] sm:$0xff]  ;;  %v2536_v15 = vld [vmem:[#allocation2 + $0x171] sm:$0xff] }
 0x186   : > { %8036 = vmatprep.subr.bf16.mxu0 %v9190_v16 }
 0x189   : > { %8037 = vmatpush3.bf16.msra.mxu0 %v9190_v16  ;;  %v2554_v16 = vpack.c.bf16 %v2536_v15, %v2535_v14 }
 0x18a   : > { %8070 = vmatprep.subr.bf16.mxu0 %v9191_v29 }
 0x18c   : > { %8007 = vmatmul.mubr.bf16.gmra.mrb[16].mxu0 %v9951_v20  ;;  %v2512_v20 = vld [vmem:[#allocation2 + $0x51] sm:$0xff] }
 0x18d   : > { %8010 = vmatprep.mubr.bf16.mxu0 %v9955_v28  ;;  %v2514_v28 = vld [vmem:[#allocation2 + $0x69] sm:$0xff] }
 0x194   : > { %8011 = vmatmul.mubr.bf16.gmra.mrb[20].mxu0 %v9957_v33 }
 0x195   : > { %8014 = vmatprep.mubr.bf16.mxu0 %v9961_v39  ;;  %v2518_v39 = vld [vmem:[#allocation2 + $0x99] sm:$0xff] }
 0x196   : > { %v2545_v45 = vpack.c.bf16 %v2518_v39, %v2517_v37  ;;  %v2831_v37 = vld [vmem:[#allocation2 + $0xf2] sm:$0xff]  ;;  %v2832_v39 = vld [vmem:[#allocation2 + $0xfa] sm:$0xff] }
 0x19c   : > { %8015 = vmatmul.mubr.bf16.gmra.mrb[24].mxu0 %v9963_v43  ;;  %v9201_v43 = vld [vmem:[%s10958_s1 + $0x210] sm:$0xff]  }
 0x19d   : > { %8018 = vmatprep.mubr.bf16.mxu0 %v9967_v47  ;;  %v9202_v47 = vld [vmem:[%s10958_s1 + $0x218] sm:$0xff]  }
 0x1a4   : > { %8019 = vmatmul.mubr.bf16.gmra.mrb[28].mxu0 %v10094_v42 }
 0x1a5   : > { %8038 = vmatprep.mubr.bf16.mxu0 %v9836_v24  ;;  %v9194_v24 = vld [vmem:[%s10958_s1 + $0x1d8] sm:$0xff]  }
 0x1ac   : > { %8039 = vmatmul.mubr.bf16.vlgmr.msra.gmra.mrb[0].mxu0 %v9843_v30  ;;  %v9195_v30 = vld [vmem:[%s10958_s1 + $0x1e0] sm:$0xff]  }
 0x1ad   : > { %8071 = vmatpush3.bf16.msra.mxu0 %v9191_v29  ;;  %8042 = vmatprep.mubr.bf16.mxu0 %v9848_v32  ;;  %v9196_v32 = vld [vmem:[%s10958_s1 + $0x1e8] sm:$0xff]   ;;  %v2539_v29 = vld [vmem:[#allocation2 + $0x199] sm:$0xff] }
 0x1ae   : > { %8072 = vmatprep.subr.bf16.mxu0 %v9192_v51 }
 0x1b1   : > { %8073 = vmatpush3.bf16.msra.mxu0 %v9192_v51  ;;  %v2816_v51 = vld [vmem:[#allocation2 + $0x3a] sm:$0xff] }
 0x1b2   : > { %8074 = vmatprep.subr.bf16.mxu0 %v9193_v52 }
 0x1b4   : > { %8043 = vmatmul.mubr.bf16.gmra.mrb[4].mxu0 %v9855_v38  ;;  %v9197_v38 = vld [vmem:[%s10958_s1 + $0x1f0] sm:$0xff]  }
 0x1b5   : > { %8046 = vmatprep.mubr.bf16.mxu0 %v9860_v40  ;;  %8075 = vmatpush3.bf16.msra.mxu0 %v9193_v52  ;;  %v9198_v40 = vld [vmem:[%s10958_s1 + $0x1f8] sm:$0xff]   ;;  %v2556_v52 = vpack.c.bf16 %v2540_v31, %v2539_v29 }
 0x1b6   : > { %8076 = vmatprep.subr.bf16.mxu0 %v9194_v24 }
 0x1b9   : > { %8077 = vmatpush3.bf16.msra.mxu0 %v9194_v24  ;;  %v2847_v24 = vpack.c.bf16 %v2816_v51, %v2815_v41 }
 0x1ba   : > { %8078 = vmatprep.subr.bf16.mxu0 %v9195_v30 }
 0x1bc   : > { %8047 = vmatmul.mubr.bf16.gmra.mrb[8].mxu0 %v9867_v46  ;;  %v9199_v46 = vld [vmem:[%s10958_s1 + $0x200] sm:$0xff]  }
 0x1bd   : > { %8050 = vmatprep.mubr.bf16.mxu0 %v9872_v48  ;;  %8079 = vmatpush3.bf16.msra.mxu0 %v9195_v30  ;;  %v2509_v48 = vld [vmem:[#allocation2 + $0x31] sm:$0xff] }
 0x1be   : > { %8080 = vmatprep.subr.bf16.mxu0 %v9196_v32  ;;  %v2817_v30 = vld [vmem:[#allocation2 + $0x4a] sm:$0xff] }
 0x1c1   : > { %8081 = vmatpush3.bf16.msra.mxu0 %v9196_v32  ;;  %v2818_v32 = vld [vmem:[#allocation2 + $0x52] sm:$0xff] }
 0x1c2   : > { %8082 = vmatprep.subr.bf16.mxu0 %v9197_v38 }
 0x1c4   : > { %8051 = vmatmul.mubr.bf16.gmra.mrb[12].mxu0 %v9879_v54  ;;  %v2510_v54 = vld [vmem:[#allocation2 + $0x39] sm:$0xff] }
 0x1c5   : > { %8054 = vmatprep.mubr.bf16.mxu0 %v9881_v55  ;;  %8083 = vmatpush3.bf16.msra.mxu0 %v9197_v38  ;;  %v9540_v55 = vld [vmem:[#allocation2] sm:$0xff]  ;;  %v2541_v0 = vpack.c.bf16 %v2510_v54, %v2509_v48 }
 0x1c6   : > { %8084 = vmatprep.subr.bf16.mxu0 %v9198_v40  ;;  %v2250_v63 = vpack.c.bf16 %v9540_v55, %v9540_v55  ;;  %v2819_v38 = vld [vmem:[#allocation2 + $0x62] sm:$0xff]  ;;  %v2821_v54 = vld [vmem:[#allocation2 + $0x7a] sm:$0xff] }
 0x1c7   : > { %v2822_v55 = vld [vmem:[#allocation2 + $0x82] sm:$0xff] }
 0x1c9   : > { %8085 = vmatpush3.bf16.msra.mxu0 %v9198_v40  ;;  %v2820_v40 = vld [vmem:[#allocation2 + $0x6a] sm:$0xff] }
 0x1ca   : > { %8118 = vmatprep.subr.bf16.mxu0 %v9199_v46  ;;  %v2849_v48 = vpack.c.bf16 %v2820_v40, %v2819_v38 }
 0x1cc   : > { %8055 = vmatmul.mubr.bf16.gmra.mrb[16].mxu0 %v9885_v60  ;;  %v2513_v60 = vld [vmem:[#allocation2 + $0x61] sm:$0xff] }
 0x1cd   : > { %8058 = vmatprep.mubr.bf16.mxu0 %v9887_v61  ;;  %v2542_v61 = vpack.c.bf16 %v2512_v20, %v2511_v19  ;;  %v2543_v33 = vpack.c.bf16 %v2514_v28, %v2513_v60  ;;  %v2825_v20 = vld [vmem:[#allocation2 + $0xaa] sm:$0xff]  ;;  %v2826_v60 = vld [vmem:[#allocation2 + $0xb2] sm:$0xff]  ;;  %v2827_v28 = vld [vmem:[#allocation2 + $0xc2] sm:$0xff] }
 0x1d4   : > { %8059 = vmatmul.mubr.bf16.gmra.mrb[20].mxu0 %v9892_v4  ;;  %v9200_v4 = vld [vmem:[%s10958_s1 + $0x208] sm:$0xff]  }
 0x1d5   : > { %8062 = vmatprep.mubr.bf16.mxu0 %v9894_v9  ;;  %v2515_v9 = vld [vmem:[#allocation2 + $0x79] sm:$0xff] }
 0x1dc   : > { %8063 = vmatmul.mubr.bf16.gmra.mrb[24].mxu0 %v9898_v21  ;;  %v2516_v21 = vld [vmem:[#allocation2 + $0x81] sm:$0xff] }
 0x1dd   : > { %8066 = vmatprep.mubr.bf16.mxu0 %v10009_v3  ;;  %v2544_v44 = vpack.c.bf16 %v2516_v21, %v2515_v9  ;;  %v2525_v3 = vld [vmem:[#allocation2 + $0xf1] sm:$0xff]  ;;  %v2829_v9 = vld [vmem:[#allocation2 + $0xda] sm:$0xff]  ;;  %v2830_v21 = vld [vmem:[#allocation2 + $0xe2] sm:$0xff] }
 0x1de   : > { %v2549_v18 = vpack.c.bf16 %v2526_v6, %v2525_v3  ;;  %v2841_v3 = vld [vmem:[#allocation2 + $0x16a] sm:$0xff]  ;;  %v2842_v6 = vld [vmem:[#allocation2 + $0x172] sm:$0xff] }
 0x1e4   : > { %8067 = vmatmul.mubr.bf16.gmra.mrb[28].mxu0 %v2250_v63  ;;  %v2823_v63 = vld [vmem:[#allocation2 + $0x92] sm:$0xff] }
 0x1e5   : > { %8086 = vmatprep.mubr.bf16.mxu0 %v2541_v0  ;;  %v2850_v0 = vpack.c.bf16 %v2822_v55, %v2821_v54 }
 0x1ec   : > { %8087 = vmatmul.mubr.bf16.vlgmr.msra.gmra.mrb[0].mxu0 %v2542_v61  ;;  %v2828_v61 = vld [vmem:[#allocation2 + $0xca] sm:$0xff] }
 0x1ed   : > { %8119 = vmatpush3.bf16.msra.mxu0 %v9199_v46  ;;  %8090 = vmatprep.mubr.bf16.mxu0 %v2543_v33  ;;  %v2848_v46 = vpack.c.bf16 %v2818_v32, %v2817_v30  ;;  %v2852_v33 = vpack.c.bf16 %v2826_v60, %v2825_v20 }
 0x1ee   : > { %8120 = vmatprep.subr.bf16.mxu0 %v9200_v4 }
 0x1f1   : > { %8121 = vmatpush3.bf16.msra.mxu0 %v9200_v4  ;;  %v2853_v4 = vpack.c.bf16 %v2828_v61, %v2827_v28 }
 0x1f2   : > { %8122 = vmatprep.subr.bf16.mxu0 %v9201_v43 }
 0x1f4   : > { %8091 = vmatmul.mubr.bf16.gmra.mrb[4].mxu0 %v2544_v44  ;;  %v2855_v44 = vpack.c.bf16 %v2832_v39, %v2831_v37 }
 0x1f5   : > { %8094 = vmatprep.mubr.bf16.mxu0 %v2545_v45  ;;  %8123 = vmatpush3.bf16.msra.mxu0 %v9201_v43  ;;  %v2854_v43 = vpack.c.bf16 %v2830_v21, %v2829_v9  ;;  %v2833_v45 = vld [vmem:[#allocation2 + $0x10a] sm:$0xff] }
 0x1f6   : > { %8124 = vmatprep.subr.bf16.mxu0 %v9202_v47 }
 0x1f9   : > { %8125 = vmatpush3.bf16.msra.mxu0 %v9202_v47  ;;  %v2834_v47 = vld [vmem:[#allocation2 + $0x112] sm:$0xff] }
 0x1fa   : > { %8126 = vmatprep.subr.bf16.mxu0 %v9203_v56  ;;  %v2856_v22 = vpack.c.bf16 %v2834_v47, %v2833_v45 }
 0x1fc   : > { %8095 = vmatmul.mubr.bf16.gmra.mrb[8].mxu0 %v2546_v57  ;;  %v2838_v57 = vld [vmem:[#allocation2 + $0x142] sm:$0xff] }
 0x1fd   : > { %8098 = vmatprep.mubr.bf16.mxu0 %v2547_v58  ;;  %8127 = vmatpush3.bf16.msra.mxu0 %v9203_v56  ;;  %v2837_v56 = vld [vmem:[#allocation2 + $0x13a] sm:$0xff]  ;;  %v2839_v58 = vld [vmem:[#allocation2 + $0x152] sm:$0xff] }
 0x1fe   : > { %8128 = vmatprep.subr.bf16.mxu0 %v9204_v59  ;;  %v2858_v62 = vpack.c.bf16 %v2838_v57, %v2837_v56 }
 0x201   : > { %8129 = vmatpush3.bf16.msra.mxu0 %v9204_v59  ;;  %v2840_v59 = vld [vmem:[#allocation2 + $0x15a] sm:$0xff] }
 0x202   : > { %8130 = vmatprep.subr.bf16.mxu0 %v9205_v8  ;;  %v2859_v1 = vpack.c.bf16 %v2840_v59, %v2839_v58 }
 0x204   : > { %8099 = vmatmul.mubr.bf16.gmra.mrb[12].mxu0 %v2548_v17  ;;  %v2845_v17 = vld [vmem:[#allocation2 + $0x19a] sm:$0xff] }
 0x205   : > { %8102 = vmatprep.mubr.bf16.mxu0 %v2549_v18  ;;  %8131 = vmatpush3.bf16.msra.mxu0 %v9205_v8  ;;  %v2860_v8 = vpack.c.bf16 %v2842_v6, %v2841_v3  ;;  %v2846_v18 = vld [vmem:[#allocation2 + $0x1a2] sm:$0xff] }
 0x206   : > { %8132 = vmatprep.subr.bf16.mxu0 %v9206_v23 }
 0x209   : > { %8133 = vmatpush3.bf16.msra.mxu0 %v9206_v23  ;;  %v2862_v23 = vpack.c.bf16 %v2846_v18, %v2845_v17 }
 0x20c   : > { %8103 = vmatmul.mubr.bf16.gmra.mrb[16].mxu0 %v2550_v35  ;;  %v9212_v35 = vld [vmem:[%s10960_s3 + $0x68] sm:$0xff]  }
 0x20d   : > { %8106 = vmatprep.mubr.bf16.mxu0 %v2551_v2  ;;  %v9213_v2 = vld [vmem:[%s10960_s3 + $0x70] sm:$0xff]  }
 0x214   : > { %8107 = vmatmul.mubr.bf16.gmra.mrb[20].mxu0 %v2552_v12  ;;  %v10186_v12 = vld [vmem:[%s10960_s3] sm:$0xff]  }
 0x215   : > { %8110 = vmatprep.mubr.bf16.mxu0 %v2553_v13  ;;  %v10192_v13 = vld [vmem:[%s10959_s2] ss:$0 sm:$0xff] }
 0x21c   : > { %8111 = vmatmul.mubr.bf16.gmra.mrb[24].mxu0 %v2554_v16 }
 0x21d   : > { %8114 = vmatprep.mubr.bf16.mxu0 %v10052_v7  ;;  %v2824_v7 = vld [vmem:[#allocation2 + $0x9a] sm:$0xff] }
 0x21e   : > { %v2851_v19 = vpack.c.bf16 %v2824_v7, %v2823_v63 }
 0x224   : > { %8115 = vmatmul.mubr.bf16.gmra.mrb[28].mxu0 %v2556_v52 }
 0x225   : > { %8134 = vmatprep.mubr.bf16.mxu0 %v2847_v24 }
 0x22c   : > { %8135 = vmatmul.mubr.bf16.vlgmr.msra.gmra.mrb[0].mxu0 %v2848_v46 }
 0x22d   : > { %8138 = vmatprep.mubr.bf16.mxu0 %v2849_v48 }
 0x234   : > { %8139 = vmatmul.mubr.bf16.gmra.mrb[4].mxu0 %v2850_v0 }
 0x235   : > { %8142 = vmatprep.mubr.bf16.mxu0 %v2851_v19 }
 0x23c   : > { %8143 = vmatmul.mubr.bf16.gmra.mrb[8].mxu0 %v2852_v33 }
 0x23d   : > { %8146 = vmatprep.mubr.bf16.mxu0 %v2853_v4 }
 0x244   : > { %8147 = vmatmul.mubr.bf16.gmra.mrb[12].mxu0 %v2854_v43 }
 0x245   : > { %8150 = vmatprep.mubr.bf16.mxu0 %v2855_v44 }
 0x24c   : > { %8151 = vmatmul.mubr.bf16.gmra.mrb[16].mxu0 %v2856_v22 }
 0x24d   : > { %8154 = vmatprep.mubr.bf16.mxu0 %v2857_v53 }
 0x254   : > { %8155 = vmatmul.mubr.bf16.gmra.mrb[20].mxu0 %v2858_v62 }
 0x255   : > { %8158 = vmatprep.mubr.bf16.mxu0 %v2859_v1 }
 0x25c   : > { %8159 = vmatmul.mubr.bf16.gmra.mrb[24].mxu0 %v2860_v8 }
 0x25d   : > { %8162 = vmatprep.mubr.bf16.mxu0 %v10094_v42  ;;  %v9209_v42 = vld [vmem:[%s10960_s3 + $0x50] sm:$0xff]  }
 0x25e   : > { %8170 = vmatprep.subr.bf16.mxu1 %v9209_v42 }
 0x25f   : > { %8171 = vmatpush3.bf16.msra.mxu1 %v9209_v42 }
 0x260   : > { %8172 = vmatprep.subr.bf16.mxu1 %v9210_v27 }
 0x263   : > { %8173 = vmatpush3.bf16.msra.mxu1 %v9210_v27 }
 0x264   : > { %8163 = vmatmul.mubr.bf16.gmra.mrb[28].mxu0 %v2862_v23  ;;  %8174 = vmatprep.subr.bf16.mxu1 %v9211_v34 }
 0x267   : > { %8175 = vmatpush3.bf16.msra.mxu1 %v9211_v34 }
 0x268   : > { %8176 = vmatprep.subr.bf16.mxu1 %v9212_v35 }
 0x26b   : > { %8177 = vmatpush3.bf16.msra.mxu1 %v9212_v35 }
 0x26c   : > { %8178 = vmatprep.subr.bf16.mxu1 %v9213_v2 }
 0x26f   : > { %8179 = vmatpush3.bf16.msra.mxu1 %v9213_v2 }
 0x270   : > { %8180 = vmatprep.subr.bf16.mxu1 %v9214_v36 }
 0x273   : > { %8181 = vmatpush3.bf16.msra.mxu1 %v9214_v36 }
 0x274   : > { %8214 = vmatprep.subr.bf16.mxu1 %v10186_v12 }
 0x2ff   : > { %v8136_v14 = vpop.f32.mrb[0].mxu0 }
 0x300   : > { %v10195_v15 = vadd.f32 %v8136_v14, %v10192_v13  ;;  %v2962_v16 = vpop.f32.mrb[1].mxu0 }
 0x301   : > { %v10198_v29 = vadd.f32 %v10192_v13, %v2962_v16  ;;  %v8137_v31 = vpop.f32.mrb[2].mxu0 }
 0x302   : > { %v6797_v41 = vmul.f32 -1.442695, %v10195_v15  ;;  %v10202_v51 = vadd.f32 %v8137_v31, %v10192_v13  ;;  %v2965_v52 = vpop.f32.mrb[3].mxu0 }
 0x303   : > { %v6795_v24 = vmul.f32 -1.442695, %v10198_v29  ;;  %v10206_v30 = vadd.f32 %v10192_v13, %v2965_v52 }
 0x304   : > { %9279 = vpow2.f32 %v6797_v41  ;;  %v6798_v32 = vmul.f32 -1.442695, %v10202_v51 }
 0x305   : > { %9281 = vpow2.f32 %v6795_v24  ;;  %v6796_v38 = vmul.f32 -1.442695, %v10206_v30 }
 0x306   : > { %9283 = vpow2.f32 %v6798_v32 }
 0x307   : > { %9285 = vpow2.f32 %v6796_v38  ;;  %v8140_v40 = vpop.f32.mrb[4].mxu0 }
 0x308   : > { %v10211_v46 = vadd.f32 %v8140_v40, %v10192_v13  ;;  %v2978_v48 = vpop.f32.mrb[5].mxu0 }
 0x309   : > { %v10214_v54 = vadd.f32 %v10192_v13, %v2978_v48  ;;  %v8141_v55 = vpop.f32.mrb[6].mxu0 }
 0x30a   : > { %v6801_v63 = vmul.f32 -1.442695, %v10211_v46  ;;  %v10218_v7 = vadd.f32 %v8141_v55, %v10192_v13  ;;  %v2981_v0 = vpop.f32.mrb[7].mxu0 }
 0x30b   : > { %v6799_v19 = vmul.f32 -1.442695, %v10214_v54  ;;  %v10222_v20 = vadd.f32 %v10192_v13, %v2981_v0 }
 0x30c   : > { %9287 = vpow2.f32 %v6801_v63  ;;  %v6802_v60 = vmul.f32 -1.442695, %v10218_v7 }
 0x30d   : > { %9289 = vpow2.f32 %v6799_v19  ;;  %v6800_v28 = vmul.f32 -1.442695, %v10222_v20 }
 0x30e   : > { %v9280_v61 = vpop.eup %9279  ;;  %9291 = vpow2.f32 %v6802_v60 }
 0x30f   : > { %v9282_v33 = vpop.eup %9281  ;;  %v3258_v4 = vadd.f32 1.0, %v9280_v61  ;;  %9293 = vpow2.f32 %v6800_v28  ;;  %v8144_v9 = vpop.f32.mrb[8].mxu0 }
 0x310   : > { %v9284_v21 = vpop.eup %9283  ;;  %v3256_v37 = vadd.f32 1.0, %v9282_v33  ;;  %v10227_v39 = vadd.f32 %v8144_v9, %v10192_v13  ;;  %v2994_v43 = vpop.f32.mrb[9].mxu0 }
 0x311   : > { %v9286_v44 = vpop.eup %9285  ;;  %9295 = vrcp.f32 %v3258_v4  ;;  %v3259_v45 = vadd.f32 1.0, %v9284_v21  ;;  %v10230_v47 = vadd.f32 %v10192_v13, %v2994_v43  ;;  %v8145_v49 = vpop.f32.mrb[10].mxu0 }
 0x312   : > { %9297 = vrcp.f32 %v3256_v37  ;;  %v3257_v50 = vadd.f32 1.0, %v9286_v44  ;;  %v6805_v22 = vmul.f32 -1.442695, %v10227_v39  ;;  %v10234_v53 = vadd.f32 %v8145_v49, %v10192_v13  ;;  %v2997_v56 = vpop.f32.mrb[11].mxu0 }
 0x313   : > { %9299 = vrcp.f32 %v3259_v45  ;;  %v6803_v57 = vmul.f32 -1.442695, %v10230_v47  ;;  %v10238_v58 = vadd.f32 %v10192_v13, %v2997_v56 }
 0x314   : > { %9301 = vrcp.f32 %v3257_v50  ;;  %v6806_v59 = vmul.f32 -1.442695, %v10234_v53 }
 0x315   : > { %9303 = vpow2.f32 %v6805_v22  ;;  %v6804_v62 = vmul.f32 -1.442695, %v10238_v58 }
 0x316   : > { %v9288_v1 = vpop.eup %9287  ;;  %9305 = vpow2.f32 %v6803_v57 }
 0x317   : > { %v9290_v3 = vpop.eup %9289  ;;  %v3262_v6 = vadd.f32 1.0, %v9288_v1  ;;  %9307 = vpow2.f32 %v6806_v59  ;;  %v8148_v8 = vpop.f32.mrb[12].mxu0 }
 0x318   : > { %v9292_v17 = vpop.eup %9291  ;;  %v3260_v18 = vadd.f32 1.0, %v9290_v3  ;;  %9309 = vpow2.f32 %v6804_v62  ;;  %v10243_v23 = vadd.f32 %v8148_v8, %v10192_v13  ;;  %v3010_v25 = vpop.f32.mrb[13].mxu0 }
 0x319   : > { %v9294_v26 = vpop.eup %9293  ;;  %9311 = vrcp.f32 %v3262_v6  ;;  %v3263_v42 = vadd.f32 1.0, %v9292_v17  ;;  %v10246_v27 = vadd.f32 %v10192_v13, %v3010_v25  ;;  %v8149_v34 = vpop.f32.mrb[14].mxu0  ;;  %v9217_v6 = vld [vmem:[%s10960_s3 + $0x10] sm:$0xff]  }
 0x31a   : > { %9313 = vrcp.f32 %v3260_v18  ;;  %v3261_v35 = vadd.f32 1.0, %v9294_v26  ;;  %v6809_v2 = vmul.f32 -1.442695, %v10243_v23  ;;  %v10250_v36 = vadd.f32 %v8149_v34, %v10192_v13  ;;  %v3013_v5 = vpop.f32.mrb[15].mxu0 }
 0x31b   : > { %v9296_v10 = vpop.eup %9295  ;;  %9315 = vrcp.f32 %v3263_v42  ;;  %v6807_v11 = vmul.f32 -1.442695, %v10246_v27  ;;  %v10254_v14 = vadd.f32 %v10192_v13, %v3013_v5 }
 0x31c   : > { %v9298_v16 = vpop.eup %9297  ;;  %v3354_v31 = vmul.f32 %v9296_v10, %v10195_v15  ;;  %9317 = vrcp.f32 %v3261_v35  ;;  %v6810_v41 = vmul.f32 -1.442695, %v10250_v36  ;;  %v9218_v10 = vld [vmem:[%s10960_s3 + $0x18] sm:$0xff]  }
 0x31d   : > { %v9300_v52 = vpop.eup %9299  ;;  %v3352_v24 = vmul.f32 %v9298_v16, %v10198_v29  ;;  %9319 = vpow2.f32 %v6809_v2  ;;  %v6808_v32 = vmul.f32 -1.442695, %v10254_v14 }
 0x31e   : > { %v9302_v38 = vpop.eup %9301  ;;  %3387 = vst [vmem:[#allocation3 + $0x31] sm:$0xff] %v3354_v31  ;;  %v3355_v40 = vmul.f32 %v9300_v52, %v10202_v51  ;;  %9321 = vpow2.f32 %v6807_v11 }
 0x31f   : > { %v9304_v48 = vpop.eup %9303  ;;  %3385 = vst [vmem:[#allocation3 + $0x19] sm:$0xff] %v3352_v24  ;;  %v3353_v55 = vmul.f32 %v9302_v38, %v10206_v30  ;;  %9323 = vpow2.f32 %v6810_v41  ;;  %v8152_v15 = vpop.f32.mrb[16].mxu0  ;;  %v9216_v30 = vld [vmem:[%s10960_s3 + $0x8] sm:$0xff]  }
 0x320   : > { %v9306_v63 = vpop.eup %9305  ;;  %3388 = vst [vmem:[#allocation3 + $0x39] sm:$0xff] %v3355_v40  ;;  %v3266_v0 = vadd.f32 1.0, %v9304_v48  ;;  %9325 = vpow2.f32 %v6808_v32  ;;  %v10263_v29 = vadd.f32 %v8152_v15, %v10192_v13  ;;  %v3026_v19 = vpop.f32.mrb[17].mxu0  ;;  %v3515_v60 = vpack.c.bf16 %v3355_v40, %v3354_v31 }
 0x321   : > { %v9308_v28 = vpop.eup %9307  ;;  %3386 = vst [vmem:[#allocation3 + $0x21] sm:$0xff] %v3353_v55  ;;  %v3264_v61 = vadd.f32 1.0, %v9306_v63  ;;  %v10266_v51 = vadd.f32 %v10192_v13, %v3026_v19  ;;  %v8153_v33 = vpop.f32.mrb[18].mxu0  ;;  %v3514_v4 = vpack.c.bf16 %v3353_v55, %v3352_v24 }
 0x322   : > { %v9310_v9 = vpop.eup %9309  ;;  %9327 = vrcp.f32 %v3266_v0  ;;  %v3267_v21 = vadd.f32 1.0, %v9308_v28  ;;  %v6813_v37 = vmul.f32 -1.442695, %v10263_v29  ;;  %v10273_v43 = vadd.f32 %v8153_v33, %v10192_v13  ;;  %v3029_v44 = vpop.f32.mrb[19].mxu0  ;;  %v9219_v0 = vld [vmem:[%s10960_s3 + $0x20] sm:$0xff]  }
 0x323   : > { %v9312_v45 = vpop.eup %9311  ;;  %9329 = vrcp.f32 %v3264_v61  ;;  %v3265_v49 = vadd.f32 1.0, %v9310_v9  ;;  %v6811_v50 = vmul.f32 -1.442695, %v10266_v51  ;;  %v10277_v22 = vadd.f32 %v10192_v13, %v3029_v44  ;;  %8183 = vmatmul.mubr.bf16.vlgmr.msra.gmra.mrb[0].mxu1 %v3514_v4 }
 0x324   : > { %v9314_v56 = vpop.eup %9313  ;;  %v3358_v57 = vmul.f32 %v9312_v45, %v10211_v46  ;;  %9331 = vrcp.f32 %v3267_v21  ;;  %v6814_v59 = vmul.f32 -1.442695, %v10273_v43  ;;  %8186 = vmatprep.mubr.bf16.mxu1 %v3515_v60  ;;  %8215 = vmatpush3.bf16.msra.mxu1 %v10186_v12 }
 0x325   : > { %v9316_v62 = vpop.eup %9315  ;;  %v3356_v1 = vmul.f32 %v9314_v56, %v10214_v54  ;;  %9333 = vrcp.f32 %v3265_v49  ;;  %v6812_v3 = vmul.f32 -1.442695, %v10277_v22  ;;  %8216 = vmatprep.subr.bf16.mxu1 %v9216_v30 }
 0x326   : > { %v9318_v8 = vpop.eup %9317  ;;  %3391 = vst [vmem:[#allocation3 + $0x61] sm:$0xff] %v3358_v57  ;;  %v3359_v46 = vmul.f32 %v9316_v62, %v10218_v7  ;;  %9335 = vpow2.f32 %v6813_v37 }
 0x327   : > { %v9320_v17 = vpop.eup %9319  ;;  %3389 = vst [vmem:[#allocation3 + $0x49] sm:$0xff] %v3356_v1  ;;  %v3357_v12 = vmul.f32 %v9318_v8, %v10222_v20  ;;  %9337 = vpow2.f32 %v6811_v50  ;;  %v8156_v18 = vpop.f32.mrb[20].mxu0 }
 0x328   : > { %v9322_v54 = vpop.eup %9321  ;;  %3392 = vst [vmem:[#allocation3 + $0x69] sm:$0xff] %v3359_v46  ;;  %v3270_v25 = vadd.f32 1.0, %v9320_v17  ;;  %9339 = vpow2.f32 %v6814_v59  ;;  %v10290_v26 = vadd.f32 %v8156_v18, %v10192_v13  ;;  %v3042_v42 = vpop.f32.mrb[21].mxu0  ;;  %v3517_v34 = vpack.c.bf16 %v3359_v46, %v3358_v57  ;;  %8217 = vmatpush3.bf16.msra.mxu1 %v9216_v30  ;;  %v9220_v57 = vld [vmem:[%s10960_s3 + $0x28] sm:$0xff]  }
 0x329   : > { %v9324_v35 = vpop.eup %9323  ;;  %3390 = vst [vmem:[#allocation3 + $0x51] sm:$0xff] %v3357_v12  ;;  %v3268_v7 = vadd.f32 1.0, %v9322_v54  ;;  %9341 = vpow2.f32 %v6812_v3  ;;  %v10293_v2 = vadd.f32 %v10192_v13, %v3042_v42  ;;  %v8157_v20 = vpop.f32.mrb[22].mxu0  ;;  %v3516_v5 = vpack.c.bf16 %v3357_v12, %v3356_v1  ;;  %8218 = vmatprep.subr.bf16.mxu1 %v9217_v6 }
 0x32a   : > { %v9326_v11 = vpop.eup %9325  ;;  %9343 = vrcp.f32 %v3270_v25  ;;  %v3271_v16 = vadd.f32 1.0, %v9324_v35  ;;  %v6817_v31 = vmul.f32 -1.442695, %v10290_v26  ;;  %v10300_v41 = vadd.f32 %v8157_v20, %v10192_v13  ;;  %v3045_v52 = vpop.f32.mrb[23].mxu0 }
 0x32b   : > { %9345 = vrcp.f32 %v3268_v7  ;;  %v3269_v24 = vadd.f32 1.0, %v9326_v11  ;;  %v6815_v32 = vmul.f32 -1.442695, %v10293_v2  ;;  %v10304_v38 = vadd.f32 %v10192_v13, %v3045_v52  ;;  %8187 = vmatmul.mubr.bf16.gmra.mrb[4].mxu1 %v3516_v5 }
 0x32c   : > { %v9328_v40 = vpop.eup %9327  ;;  %9347 = vrcp.f32 %v3271_v16  ;;  %v6818_v48 = vmul.f32 -1.442695, %v10300_v41  ;;  %8190 = vmatprep.mubr.bf16.mxu1 %v3517_v34  ;;  %8219 = vmatpush3.bf16.msra.mxu1 %v9217_v6  ;;  %v9221_v34 = vld [vmem:[%s10960_s3 + $0x30] sm:$0xff]  }
 0x32d   : > { %v9330_v55 = vpop.eup %9329  ;;  %v3362_v15 = vmul.f32 %v9328_v40, %v10227_v39  ;;  %9349 = vrcp.f32 %v3269_v24  ;;  %v6816_v63 = vmul.f32 -1.442695, %v10304_v38  ;;  %8220 = vmatprep.subr.bf16.mxu1 %v9218_v10 }
 0x32e   : > { %v9332_v19 = vpop.eup %9331  ;;  %v3360_v60 = vmul.f32 %v9330_v55, %v10230_v47  ;;  %9351 = vpow2.f32 %v6817_v31 }
 0x32f   : > { %v9334_v28 = vpop.eup %9333  ;;  %3395 = vst [vmem:[#allocation3 + $0x91] sm:$0xff] %v3362_v15  ;;  %v3363_v61 = vmul.f32 %v9332_v19, %v10234_v53  ;;  %9353 = vpow2.f32 %v6815_v32  ;;  %v8160_v33 = vpop.f32.mrb[24].mxu0 }
 0x330   : > { %v9336_v4 = vpop.eup %9335  ;;  %3393 = vst [vmem:[#allocation3 + $0x79] sm:$0xff] %v3360_v60  ;;  %v3361_v39 = vmul.f32 %v9334_v28, %v10238_v58  ;;  %9355 = vpow2.f32 %v6818_v48  ;;  %v10316_v30 = vadd.f32 %v8160_v33, %v10192_v13  ;;  %v3058_v9 = vpop.f32.mrb[25].mxu0  ;;  %8221 = vmatpush3.bf16.msra.mxu1 %v9218_v10  ;;  %v9222_v48 = vld [vmem:[%s10960_s3 + $0x38] sm:$0xff]  }
 0x331   : > { %v9338_v21 = vpop.eup %9337  ;;  %3396 = vst [vmem:[#allocation3 + $0x99] sm:$0xff] %v3363_v61  ;;  %v3274_v47 = vadd.f32 1.0, %v9336_v4  ;;  %9357 = vpow2.f32 %v6816_v63  ;;  %v10319_v37 = vadd.f32 %v10192_v13, %v3058_v9  ;;  %v8161_v53 = vpop.f32.mrb[26].mxu0  ;;  %v3519_v44 = vpack.c.bf16 %v3363_v61, %v3362_v15  ;;  %8222 = vmatprep.subr.bf16.mxu1 %v9219_v0 }
 0x332   : > { %v9340_v45 = vpop.eup %9339  ;;  %3394 = vst [vmem:[#allocation3 + $0x81] sm:$0xff] %v3361_v39  ;;  %v3272_v49 = vadd.f32 1.0, %v9338_v21  ;;  %v10322_v58 = vadd.f32 %v8161_v53, %v10192_v13  ;;  %v3061_v50 = vpop.f32.mrb[27].mxu0  ;;  %v3518_v56 = vpack.c.bf16 %v3361_v39, %v3360_v60  ;;  %v6821_v1 = vmul.f32 -1.442695, %v10316_v30 }
 0x333   : > { %v9342_v59 = vpop.eup %9341  ;;  %9359 = vrcp.f32 %v3274_v47  ;;  %v3275_v62 = vadd.f32 1.0, %v9340_v45  ;;  %v10329_v3 = vadd.f32 %v10192_v13, %v3061_v50  ;;  %v6819_v46 = vmul.f32 -1.442695, %v10319_v37 }
 0x334   : > { %v9344_v6 = vpop.eup %9343  ;;  %9361 = vrcp.f32 %v3272_v49  ;;  %v3273_v8 = vadd.f32 1.0, %v9342_v59  ;;  %8191 = vmatmul.mubr.bf16.gmra.mrb[8].mxu1 %v3518_v56  ;;  %v6822_v18 = vmul.f32 -1.442695, %v10322_v58 }
 0x335   : > { %v9346_v17 = vpop.eup %9345  ;;  %v3366_v12 = vmul.f32 %v9344_v6, %v10243_v23  ;;  %9363 = vrcp.f32 %v3275_v62  ;;  %8194 = vmatprep.mubr.bf16.mxu1 %v3519_v44  ;;  %8223 = vmatpush3.bf16.msra.mxu1 %v9219_v0  ;;  %v6820_v42 = vmul.f32 -1.442695, %v10329_v3 }
 0x336   : > { %v9348_v54 = vpop.eup %9347  ;;  %v3364_v25 = vmul.f32 %v9346_v17, %v10246_v27  ;;  %9365 = vrcp.f32 %v3273_v8  ;;  %8224 = vmatprep.subr.bf16.mxu1 %v9220_v57 }
 0x337   : > { %v9350_v35 = vpop.eup %9349  ;;  %3399 = vst [vmem:[#allocation3 + $0xc1] sm:$0xff] %v3366_v12  ;;  %v3367_v23 = vmul.f32 %v9348_v54, %v10250_v36  ;;  %9367 = vpow2.f32 %v6821_v1  ;;  %v8164_v7 = vpop.f32.mrb[28].mxu0 }
 0x338   : > { %v9352_v20 = vpop.eup %9351  ;;  %3397 = vst [vmem:[#allocation3 + $0xa9] sm:$0xff] %v3364_v25  ;;  %v3365_v5 = vmul.f32 %v9350_v35, %v10254_v14  ;;  %9369 = vpow2.f32 %v6819_v46  ;;  %v10342_v27 = vadd.f32 %v8164_v7, %v10192_v13  ;;  %v3074_v10 = vpop.f32.mrb[29].mxu0 }
 0x339   : > { %v9354_v11 = vpop.eup %9353  ;;  %3400 = vst [vmem:[#allocation3 + $0xc9] sm:$0xff] %v3367_v23  ;;  %v3278_v16 = vadd.f32 1.0, %v9352_v20  ;;  %9371 = vpow2.f32 %v6822_v18  ;;  %v10345_v31 = vadd.f32 %v10192_v13, %v3074_v10  ;;  %v8165_v52 = vpop.f32.mrb[30].mxu0  ;;  %v3521_v36 = vpack.c.bf16 %v3367_v23, %v3366_v12  ;;  %8225 = vmatpush3.bf16.msra.mxu1 %v9220_v57 }
 0x33a   : > { %v9356_v24 = vpop.eup %9355  ;;  %3398 = vst [vmem:[#allocation3 + $0xb1] sm:$0xff] %v3365_v5  ;;  %v3276_v32 = vadd.f32 1.0, %v9354_v11  ;;  %9373 = vpow2.f32 %v6820_v42  ;;  %v10348_v14 = vadd.f32 %v8165_v52, %v10192_v13  ;;  %v3077_v40 = vpop.f32.mrb[31].mxu0  ;;  %8226 = vmatprep.subr.bf16.mxu1 %v9221_v34  ;;  %v6825_v63 = vmul.f32 -1.442695, %v10342_v27 }
 0x33b   : > { %v9358_v55 = vpop.eup %9357  ;;  %9375 = vrcp.f32 %v3278_v16  ;;  %v3279_v15 = vadd.f32 1.0, %v9356_v24  ;;  %v10355_v0 = vadd.f32 %v10192_v13, %v3077_v40  ;;  %v6823_v60 = vmul.f32 -1.442695, %v10345_v31  ;;  %v10364_v13 = vld [vmem:[%s10960_s3 + $0x80] sm:$0xff]  }
 0x33c   : > { %9377 = vrcp.f32 %v3276_v32  ;;  %v3277_v19 = vadd.f32 1.0, %v9358_v55  ;;  %v3520_v28 = vpack.c.bf16 %v3365_v5, %v3364_v25  ;;  %v6826_v33 = vmul.f32 -1.442695, %v10348_v14 }
 0x33d   : > { %v9360_v61 = vpop.eup %9359  ;;  %9379 = vrcp.f32 %v3279_v15  ;;  %8227 = vmatpush3.bf16.msra.mxu1 %v9221_v34  ;;  %v6824_v9 = vmul.f32 -1.442695, %v10355_v0 }
 0x33e   : > { %v9362_v4 = vpop.eup %9361  ;;  %v3370_v39 = vmul.f32 %v9360_v61, %v10263_v29  ;;  %9381 = vrcp.f32 %v3277_v19  ;;  %8195 = vmatmul.mubr.bf16.gmra.mrb[12].mxu1 %v3520_v28  ;;  %8228 = vmatprep.subr.bf16.mxu1 %v9222_v48  ;;  %v9541_v19 = vld [vmem:[#allocation2] sm:$0xff]  ;;  %v3419_v61 = vld [vmem:[#allocation3 + $0x18] sm:$0xff] }
 0x33f   : > { %v9364_v21 = vpop.eup %9363  ;;  %v3368_v47 = vmul.f32 %v9362_v4, %v10266_v51  ;;  %9383 = vpow2.f32 %v6825_v63  ;;  %8198 = vmatprep.mubr.bf16.mxu1 %v3521_v36  ;;  %v9224_v4 = vld [vmem:[%s10960_s3 + $0x88] sm:$0xff]  }
 0x340   : > { %v9366_v53 = vpop.eup %9365  ;;  %3403 = vst [vmem:[#allocation3 + $0xf1] sm:$0xff] %v3370_v39  ;;  %v3371_v44 = vmul.f32 %v9364_v21, %v10273_v43  ;;  %9385 = vpow2.f32 %v6823_v60  ;;  %v10392_v60 = vpack.c.bf16 %v9541_v19, %v9541_v19  ;;  %v3424_v21 = vld [vmem:[#allocation3 + $0x50] sm:$0xff]  ;;  %v3967_v19 = vld [vmem:[#allocation3 + $0x22] sm:$0xff] }
 0x341   : > { %v9368_v29 = vpop.eup %9367  ;;  %3401 = vst [vmem:[#allocation3 + $0xd9] sm:$0xff] %v3368_v47  ;;  %v3369_v45 = vmul.f32 %v9366_v53, %v10277_v22  ;;  %9387 = vpow2.f32 %v6826_v33  ;;  %8229 = vmatpush3.bf16.msra.mxu1 %v9222_v48  ;;  %v3423_v53 = vld [vmem:[#allocation3 + $0x48] sm:$0xff] }
 0x342   : > { %v9370_v49 = vpop.eup %9369  ;;  %3404 = vst [vmem:[#allocation3 + $0xf9] sm:$0xff] %v3371_v44  ;;  %v3282_v50 = vadd.f32 1.0, %v9368_v29  ;;  %9389 = vpow2.f32 %v6824_v9  ;;  %v3523_v56 = vpack.c.bf16 %v3371_v44, %v3370_v39  ;;  %8262 = vmatprep.subr.bf16.mxu1 %v10364_v13  ;;  %v9225_v9 = vld [vmem:[%s10960_s3 + $0x90] sm:$0xff]   ;;  %v10413_v44 = vpack.c.bf16 %v3424_v21, %v3423_v53  ;;  %v3970_v21 = vld [vmem:[#allocation3 + $0x4a] sm:$0xff] }
 0x343   : > { %v9372_v51 = vpop.eup %9371  ;;  %3402 = vst [vmem:[#allocation3 + $0xe1] sm:$0xff] %v3369_v45  ;;  %v3280_v57 = vadd.f32 1.0, %v9370_v49  ;;  %v3522_v59 = vpack.c.bf16 %v3369_v45, %v3368_v47  ;;  %v3426_v47 = vld [vmem:[#allocation3 + $0x68] sm:$0xff]  ;;  %v3425_v29 = vld [vmem:[#allocation3 + $0x60] sm:$0xff] }
 0x344   : > { %v9374_v62 = vpop.eup %9373  ;;  %9391 = vrcp.f32 %v3282_v50  ;;  %v3283_v43 = vadd.f32 1.0, %v9372_v51  ;;  %v9226_v45 = vld [vmem:[%s10960_s3 + $0x98] sm:$0xff]   ;;  %v10418_v49 = vpack.c.bf16 %v3426_v47, %v3425_v29  ;;  %v3428_v50 = vld [vmem:[#allocation3 + $0x80] sm:$0xff]  ;;  %v3427_v51 = vld [vmem:[#allocation3 + $0x78] sm:$0xff] }
 0x345   : > { %v9376_v1 = vpop.eup %9375  ;;  %9393 = vrcp.f32 %v3280_v57  ;;  %v3281_v6 = vadd.f32 1.0, %v9374_v62  ;;  %v10425_v57 = vpack.c.bf16 %v3428_v50, %v3427_v51  ;;  %v9228_v62 = vld [vmem:[%s10960_s3 + $0xa8] sm:$0xff]   ;;  %v3972_v53 = vld [vmem:[#allocation3 + $0x62] sm:$0xff]  ;;  %v3973_v29 = vld [vmem:[#allocation3 + $0x6a] sm:$0xff] }
 0x346   : > { %v9378_v22 = vpop.eup %9377  ;;  %v3374_v8 = vmul.f32 %v9376_v1, %v10290_v26  ;;  %9395 = vrcp.f32 %v3283_v43  ;;  %8199 = vmatmul.mubr.bf16.gmra.mrb[16].mxu1 %v3522_v59  ;;  %v3429_v59 = vld [vmem:[#allocation3 + $0x90] sm:$0xff]  ;;  %v9229_v1 = vld [vmem:[%s10960_s3 + $0xb0] sm:$0xff]   ;;  %v10487_v50 = vpack.c.bf16 %v3973_v29, %v3972_v53 }
 0x347   : > { %v9380_v46 = vpop.eup %9379  ;;  %v3372_v17 = vmul.f32 %v9378_v22, %v10293_v2  ;;  %9397 = vrcp.f32 %v3281_v6  ;;  %8202 = vmatprep.mubr.bf16.mxu1 %v3523_v56  ;;  %v3430_v56 = vld [vmem:[#allocation3 + $0x98] sm:$0xff]  ;;  %v3432_v6 = vld [vmem:[#allocation3 + $0xb0] sm:$0xff]  ;;  %v3434_v22 = vld [vmem:[#allocation3 + $0xc8] sm:$0xff] }
 0x348   : > { %v9382_v12 = vpop.eup %9381  ;;  %3407 = vst [vmem:[#allocation3 + $0x121] sm:$0xff] %v3374_v8  ;;  %v3375_v18 = vmul.f32 %v9380_v46, %v10300_v41  ;;  %v10430_v43 = vpack.c.bf16 %v3430_v56, %v3429_v59  ;;  %v3971_v47 = vld [vmem:[#allocation3 + $0x52] sm:$0xff]  ;;  %v3974_v51 = vld [vmem:[#allocation3 + $0x7a] sm:$0xff]  ;;  %v3975_v59 = vld [vmem:[#allocation3 + $0x82] sm:$0xff] }
 0x349   : > { %v9384_v54 = vpop.eup %9383  ;;  %3405 = vst [vmem:[#allocation3 + $0x109] sm:$0xff] %v3372_v17  ;;  %v3373_v25 = vmul.f32 %v9382_v12, %v10304_v38  ;;  %v9230_v12 = vld [vmem:[%s10960_s3 + $0xb8] sm:$0xff]   ;;  %v9235_v56 = vld [vmem:[%s10960_s3 + $0xe0] sm:$0xff]  }
 0x34a   : > { %v9386_v42 = vpop.eup %9385  ;;  %3408 = vst [vmem:[#allocation3 + $0x129] sm:$0xff] %v3375_v18  ;;  %v3286_v34 = vadd.f32 1.0, %v9384_v54  ;;  %v3525_v35 = vpack.c.bf16 %v3375_v18, %v3374_v8  ;;  %v3431_v8 = vld [vmem:[#allocation3 + $0xa8] sm:$0xff]  ;;  %v9231_v54 = vld [vmem:[%s10960_s3 + $0xc0] sm:$0xff]  }
 0x34b   : > { %v9388_v26 = vpop.eup %9387  ;;  %3406 = vst [vmem:[#allocation3 + $0x111] sm:$0xff] %v3373_v25  ;;  %v3284_v23 = vadd.f32 1.0, %v9386_v42  ;;  %v3524_v7 = vpack.c.bf16 %v3373_v25, %v3372_v17  ;;  %v10437_v46 = vpack.c.bf16 %v3432_v6, %v3431_v8  ;;  %v3433_v17 = vld [vmem:[#allocation3 + $0xc0] sm:$0xff]  ;;  %v3438_v42 = vld [vmem:[#allocation3 + $0xf8] sm:$0xff]  ;;  %v10494_v6 = vpack.c.bf16 %v3975_v59, %v3974_v51  ;;  %v9243_v51 = vld [vmem:[%s10960_s3 + $0x120] sm:$0xff]  }
 0x34c   : > { %v9390_v20 = vpop.eup %9389  ;;  %9399 = vrcp.f32 %v3286_v34  ;;  %v3287_v2 = vadd.f32 1.0, %v9388_v26  ;;  %v10442_v18 = vpack.c.bf16 %v3434_v22, %v3433_v17  ;;  %v3436_v25 = vld [vmem:[#allocation3 + $0xe0] sm:$0xff]  ;;  %v3435_v34 = vld [vmem:[#allocation3 + $0xd8] sm:$0xff]  ;;  %v3437_v26 = vld [vmem:[#allocation3 + $0xf0] sm:$0xff] }
 0x34d   : > { %9401 = vrcp.f32 %v3284_v23  ;;  %v3285_v5 = vadd.f32 1.0, %v9390_v20  ;;  %v10451_v23 = vpack.c.bf16 %v3438_v42, %v3437_v26  ;;  %v9236_v22 = vld [vmem:[%s10960_s3 + $0xe8] sm:$0xff]   ;;  %v9237_v17 = vld [vmem:[%s10960_s3 + $0xf0] sm:$0xff]   ;;  %v3981_v42 = vld [vmem:[#allocation3 + $0xca] sm:$0xff] }
 0x34e   : > { %v9392_v10 = vpop.eup %9391  ;;  %9403 = vrcp.f32 %v3287_v2  ;;  %8203 = vmatmul.mubr.bf16.gmra.mrb[20].mxu1 %v3524_v7  ;;  %v9238_v26 = vld [vmem:[%s10960_s3 + $0xf8] sm:$0xff]   ;;  %v9244_v59 = vld [vmem:[%s10960_s3 + $0x128] sm:$0xff]  }
 0x34f   : > { %v9394_v41 = vpop.eup %9393  ;;  %v3378_v11 = vmul.f32 %v9392_v10, %v10316_v30  ;;  %9405 = vrcp.f32 %v3285_v5  ;;  %8206 = vmatprep.mubr.bf16.mxu1 %v3525_v35  ;;  %v10449_v35 = vpack.c.bf16 %v3436_v25, %v3435_v34  ;;  %v3441_v10 = vld [vmem:[#allocation3 + $0x120] sm:$0xff] }
 0x350   : > { %v9396_v38 = vpop.eup %9395  ;;  %v3376_v16 = vmul.f32 %v9394_v41, %v10319_v37  ;;  %v3439_v2 = vld [vmem:[#allocation3 + $0x108] sm:$0xff] }
 0x351   : > { %v9398_v52 = vpop.eup %9397  ;;  %3411 = vst [vmem:[#allocation3 + $0x151] sm:$0xff] %v3378_v11  ;;  %v3379_v36 = vmul.f32 %v9396_v38, %v10322_v58  ;;  %v3442_v20 = vld [vmem:[#allocation3 + $0x128] sm:$0xff] }
 0x352   : > { %3409 = vst [vmem:[#allocation3 + $0x139] sm:$0xff] %v3376_v16  ;;  %v10378_v24 = vmul.f32 %v9398_v52, %v10329_v3  ;;  %v3440_v7 = vld [vmem:[#allocation3 + $0x110] sm:$0xff]  ;;  %v10457_v41 = vpack.c.bf16 %v3442_v20, %v3441_v10  ;;  %v3980_v25 = vld [vmem:[#allocation3 + $0xc2] sm:$0xff] }
 0x353   : > { %3412 = vst [vmem:[#allocation3 + $0x159] sm:$0xff] %v3379_v36  ;;  %v3527_v32 = vpack.c.bf16 %v3379_v36, %v3378_v11  ;;  %v10455_v5 = vpack.c.bf16 %v3440_v7, %v3439_v2  ;;  %v10511_v7 = vpack.c.bf16 %v3981_v42, %v3980_v25  ;;  %v9239_v20 = vld [vmem:[%s10960_s3 + $0x100] sm:$0xff]   ;;  %v3982_v2 = vld [vmem:[#allocation3 + $0xda] sm:$0xff]  ;;  %v3983_v10 = vld [vmem:[#allocation3 + $0xe2] sm:$0xff] }
 0x354   : > { %3410 = vst [vmem:[#allocation3 + $0x141] sm:$0xff] %v10378_v24  ;;  %v3526_v40 = vpack.c.bf16 %v10378_v24, %v3376_v16  ;;  %v4576_v42 = vld [vmem:[#allocation3 + $0x19] sm:$0xff] }
 0x356   : > { %v9400_v30 = vpop.eup %9399  ;;  %8207 = vmatmul.mubr.bf16.gmra.mrb[24].mxu1 %v3526_v40  ;;  %v3964_v40 = vld [vmem:[#allocation3 + $0x2] sm:$0xff] }
 0x357   : > { %v9402_v48 = vpop.eup %9401  ;;  %v10383_v55 = vmul.f32 %v9400_v30, %v10342_v27  ;;  %8210 = vmatprep.mubr.bf16.mxu1 %v3527_v32  ;;  %v3965_v30 = vld [vmem:[#allocation3 + $0xa] sm:$0xff] }
 0x358   : > { %v9404_v37 = vpop.eup %9403  ;;  %v3380_v58 = vmul.f32 %v9402_v48, %v10345_v31  ;;  %v3420_v31 = vld [vmem:[#allocation3 + $0x20] sm:$0xff]  ;;  %v3445_v36 = vld [vmem:[#allocation3 + $0x150] sm:$0xff] }
 0x359   : > { %v9406_v15 = vpop.eup %9405  ;;  %3415 = vst [vmem:[#allocation3 + $0x181] sm:$0xff] %v10383_v55  ;;  %v10388_v3 = vmul.f32 %v9404_v37, %v10348_v14  ;;  %v3422_v14 = vld [vmem:[#allocation3 + $0x38] sm:$0xff]  ;;  %v10400_v33 = vpack.c.bf16 %v3420_v31, %v3419_v61 }
 0x35a   : > { %3413 = vst [vmem:[#allocation3 + $0x169] sm:$0xff] %v3380_v58  ;;  %v3381_v63 = vmul.f32 %v9406_v15, %v10355_v0  ;;  %v3421_v0 = vld [vmem:[#allocation3 + $0x30] sm:$0xff]  ;;  %v3446_v38 = vld [vmem:[#allocation3 + $0x158] sm:$0xff] }
 0x35b   : > { %3416 = vst [vmem:[#allocation3 + $0x189] sm:$0xff] %v10388_v3  ;;  %v4623_v27 = vpack.c.bf16 %v10388_v3, %v10383_v55  ;;  %v10405_v39 = vpack.c.bf16 %v3422_v14, %v3421_v0  ;;  %v3444_v11 = vld [vmem:[#allocation3 + $0x140] sm:$0xff]  ;;  %v3443_v16 = vld [vmem:[#allocation3 + $0x138] sm:$0xff]  ;;  %v10463_v32 = vpack.c.bf16 %v3446_v38, %v3445_v36  ;;  %v9258_v55 = vld [vmem:[%s10960_s3 + $0x198] sm:$0xff]  }
 0x35c   : > { %3414 = vst [vmem:[#allocation3 + $0x171] sm:$0xff] %v3381_v63  ;;  %v10396_v28 = vpack.c.bf16 %v3381_v63, %v3380_v58  ;;  %v10461_v52 = vpack.c.bf16 %v3444_v11, %v3443_v16  ;;  %v3996_v58 = vpack.c.bf16 %v3965_v30, %v3964_v40  ;;  %v3966_v63 = vld [vmem:[#allocation3 + $0x1a] sm:$0xff]  ;;  %v3968_v31 = vld [vmem:[#allocation3 + $0x32] sm:$0xff]  ;;  %v10518_v16 = vpack.c.bf16 %v3983_v10, %v3982_v2  ;;  %v3986_v40 = vld [vmem:[#allocation3 + $0x10a] sm:$0xff] }
 0x35d   : > { %v3969_v14 = vld [vmem:[#allocation3 + $0x3a] sm:$0xff]  ;;  %v10470_v61 = vpack.c.bf16 %v3967_v19, %v3966_v63  ;;  %v3984_v11 = vld [vmem:[#allocation3 + $0xf2] sm:$0xff] }
 0x35e   : > { %8211 = vmatmul.mubr.bf16.gmra.mrb[28].mxu1 %v10396_v28  ;;  %v9232_v0 = vld [vmem:[%s10960_s3 + $0xc8] sm:$0xff]   ;;  %v9259_v3 = vld [vmem:[%s10960_s3 + $0x1a0] sm:$0xff]  }
 0x35f   : > { %8230 = vmatprep.mubr.bf16.mxu1 %v10392_v60  ;;  %v3985_v38 = vld [vmem:[#allocation3 + $0xfa] sm:$0xff]  ;;  %v3987_v30 = vld [vmem:[#allocation3 + $0x112] sm:$0xff] }
 0x360   : > { %v10520_v36 = vpack.c.bf16 %v3985_v38, %v3984_v11  ;;  %v3990_v19 = vld [vmem:[#allocation3 + $0x13a] sm:$0xff]  ;;  %v4581_v2 = vld [vmem:[#allocation3 + $0x51] sm:$0xff]  ;;  %v4580_v38 = vld [vmem:[#allocation3 + $0x49] sm:$0xff] }
 0x361   : > { %v3447_v37 = vld [vmem:[#allocation3 + $0x168] sm:$0xff]  ;;  %v4578_v10 = vld [vmem:[#allocation3 + $0x31] sm:$0xff] }
 0x363   : > { %v3448_v48 = vld [vmem:[#allocation3 + $0x170] sm:$0xff] }
 0x364   : > { %v10467_v15 = vpack.c.bf16 %v3448_v48, %v3447_v37  ;;  %v3988_v48 = vld [vmem:[#allocation3 + $0x122] sm:$0xff]  ;;  %v3989_v37 = vld [vmem:[#allocation3 + $0x12a] sm:$0xff]  ;;  %v3995_v53 = vld [vmem:[#allocation3 + $0x172] sm:$0xff] }
 0x365   : > { %v10526_v63 = vpack.c.bf16 %v3989_v37, %v3988_v48  ;;  %v9249_v48 = vld [vmem:[%s10960_s3 + $0x150] sm:$0xff]   ;;  %v4583_v37 = vld [vmem:[#allocation3 + $0x69] sm:$0xff] }
 0x366   : > { %8231 = vmatmul.mubr.bf16.vlgmr.msra.gmra.mrb[0].mxu1 %v10400_v33 }
 0x367   : > { %8234 = vmatprep.mubr.bf16.mxu1 %v10405_v39  ;;  %8263 = vmatpush3.bf16.msra.mxu1 %v10364_v13  ;;  %v9227_v13 = vld [vmem:[%s10960_s3 + $0xa0] sm:$0xff]  }
 0x368   : > { %8264 = vmatprep.subr.bf16.mxu1 %v9224_v4 }
 0x36b   : > { %8265 = vmatpush3.bf16.msra.mxu1 %v9224_v4  ;;  %v10475_v4 = vpack.c.bf16 %v3969_v14, %v3968_v31  ;;  %v3991_v31 = vld [vmem:[#allocation3 + $0x142] sm:$0xff]  ;;  %v3992_v14 = vld [vmem:[#allocation3 + $0x152] sm:$0xff] }
 0x36c   : > { %8266 = vmatprep.subr.bf16.mxu1 %v9225_v9 }
 0x36e   : > { %8235 = vmatmul.mubr.bf16.gmra.mrb[4].mxu1 %v10413_v44 }
 0x36f   : > { %8238 = vmatprep.mubr.bf16.mxu1 %v10418_v49  ;;  %8267 = vmatpush3.bf16.msra.mxu1 %v9225_v9  ;;  %v9233_v9 = vld [vmem:[%s10960_s3 + $0xd0] sm:$0xff]  }
 0x370   : > { %8268 = vmatprep.subr.bf16.mxu1 %v9226_v45 }
 0x373   : > { %8269 = vmatpush3.bf16.msra.mxu1 %v9226_v45  ;;  %v10482_v45 = vpack.c.bf16 %v3971_v47, %v3970_v21  ;;  %v3994_v47 = vld [vmem:[#allocation3 + $0x16a] sm:$0xff] }
 0x374   : > { %8270 = vmatprep.subr.bf16.mxu1 %v9227_v13  ;;  %v10536_v29 = vpack.c.bf16 %v3995_v53, %v3994_v47  ;;  %v9250_v47 = vld [vmem:[%s10960_s3 + $0x158] sm:$0xff]  }
 0x376   : > { %8239 = vmatmul.mubr.bf16.gmra.mrb[8].mxu1 %v10425_v57 }
 0x377   : > { %8242 = vmatprep.mubr.bf16.mxu1 %v10430_v43  ;;  %8271 = vmatpush3.bf16.msra.mxu1 %v9227_v13  ;;  %v9234_v13 = vld [vmem:[%s10960_s3 + $0xd8] sm:$0xff]  }
 0x378   : > { %8272 = vmatprep.subr.bf16.mxu1 %v9228_v62 }
 0x37b   : > { %8273 = vmatpush3.bf16.msra.mxu1 %v9228_v62  ;;  %v3976_v62 = vld [vmem:[#allocation3 + $0x92] sm:$0xff] }
 0x37c   : > { %8274 = vmatprep.subr.bf16.mxu1 %v9229_v1 }
 0x37e   : > { %8243 = vmatmul.mubr.bf16.gmra.mrb[12].mxu1 %v10437_v46 }
 0x37f   : > { %8246 = vmatprep.mubr.bf16.mxu1 %v10442_v18  ;;  %8275 = vmatpush3.bf16.msra.mxu1 %v9229_v1  ;;  %v3977_v1 = vld [vmem:[#allocation3 + $0x9a] sm:$0xff] }
 0x380   : > { %8276 = vmatprep.subr.bf16.mxu1 %v9230_v12  ;;  %v10499_v8 = vpack.c.bf16 %v3977_v1, %v3976_v62  ;;  %v9245_v62 = vld [vmem:[%s10960_s3 + $0x130] sm:$0xff]   ;;  %v9246_v1 = vld [vmem:[%s10960_s3 + $0x138] sm:$0xff]  }
 0x383   : > { %8277 = vmatpush3.bf16.msra.mxu1 %v9230_v12  ;;  %v3978_v12 = vld [vmem:[#allocation3 + $0xaa] sm:$0xff] }
 0x384   : > { %8310 = vmatprep.subr.bf16.mxu1 %v9231_v54 }
 0x386   : > { %8247 = vmatmul.mubr.bf16.gmra.mrb[16].mxu1 %v10449_v35 }
 0x387   : > { %8250 = vmatprep.mubr.bf16.mxu1 %v10451_v23 }
 0x38e   : > { %8251 = vmatmul.mubr.bf16.gmra.mrb[20].mxu1 %v10455_v5 }
 0x38f   : > { %8254 = vmatprep.mubr.bf16.mxu1 %v10457_v41 }
 0x396   : > { %8255 = vmatmul.mubr.bf16.gmra.mrb[24].mxu1 %v10461_v52 }
 0x397   : > { %8258 = vmatprep.mubr.bf16.mxu1 %v10463_v32 }
 0x39e   : > { %8259 = vmatmul.mubr.bf16.gmra.mrb[28].mxu1 %v10467_v15 }
 0x39f   : > { %8278 = vmatprep.mubr.bf16.mxu1 %v3996_v58  ;;  %v10524_v58 = vpack.c.bf16 %v3987_v30, %v3986_v40  ;;  %v9248_v40 = vld [vmem:[%s10960_s3 + $0x148] sm:$0xff]   ;;  %v10586_v30 = vpack.c.bf16 %v4581_v2, %v4580_v38  ;;  %v9254_v2 = vld [vmem:[%s10960_s3 + $0x178] sm:$0xff]   ;;  %v9255_v38 = vld [vmem:[%s10960_s3 + $0x180] sm:$0xff]  }
 0x3a6   : > { %8279 = vmatmul.mubr.bf16.vlgmr.msra.gmra.mrb[0].mxu1 %v10470_v61 }
 0x3a7   : > { %8282 = vmatprep.mubr.bf16.mxu1 %v10475_v4  ;;  %8311 = vmatpush3.bf16.msra.mxu1 %v9231_v54  ;;  %v3979_v54 = vld [vmem:[#allocation3 + $0xb2] sm:$0xff] }
 0x3a8   : > { %8312 = vmatprep.subr.bf16.mxu1 %v9232_v0  ;;  %v10506_v34 = vpack.c.bf16 %v3979_v54, %v3978_v12  ;;  %v4577_v12 = vld [vmem:[#allocation3 + $0x21] sm:$0xff] }
 0x3a9   : > { %v4300_v54 = vld [vmem:[#allocation3 + $0x180] sm:$0xff] }
 0x3ab   : > { %8313 = vmatpush3.bf16.msra.mxu1 %v9232_v0  ;;  %v3993_v0 = vld [vmem:[#allocation3 + $0x15a] sm:$0xff] }
 0x3ac   : > { %8314 = vmatprep.subr.bf16.mxu1 %v9233_v9  ;;  %v10532_v21 = vpack.c.bf16 %v3993_v0, %v3992_v14  ;;  %v4584_v0 = vld [vmem:[#allocation3 + $0x79] sm:$0xff] }
 0x3ae   : > { %8283 = vmatmul.mubr.bf16.gmra.mrb[4].mxu1 %v10482_v45 }
 0x3af   : > { %8286 = vmatprep.mubr.bf16.mxu1 %v10487_v50  ;;  %8315 = vmatpush3.bf16.msra.mxu1 %v9233_v9  ;;  %v10530_v9 = vpack.c.bf16 %v3991_v31, %v3990_v19  ;;  %v4585_v19 = vld [vmem:[#allocation3 + $0x81] sm:$0xff] }
 0x3b0   : > { %8316 = vmatprep.subr.bf16.mxu1 %v9234_v13  ;;  %v4582_v31 = vld [vmem:[#allocation3 + $0x61] sm:$0xff]  ;;  %v10598_v53 = vpack.c.bf16 %v4585_v19, %v4584_v0 }
 0x3b1   : > { %v10593_v14 = vpack.c.bf16 %v4583_v37, %v4582_v31  ;;  %v4594_v37 = vld [vmem:[#allocation3 + $0xf1] sm:$0xff]  ;;  %v4596_v31 = vld [vmem:[#allocation3 + $0x109] sm:$0xff] }
 0x3b3   : > { %8317 = vmatpush3.bf16.msra.mxu1 %v9234_v13  ;;  %v9240_v13 = vld [vmem:[%s10960_s3 + $0x108] sm:$0xff]  }
 0x3b4   : > { %8318 = vmatprep.subr.bf16.mxu1 %v9235_v56 }
 0x3b6   : > { %8287 = vmatmul.mubr.bf16.gmra.mrb[8].mxu1 %v10494_v6 }
 0x3b7   : > { %8290 = vmatprep.mubr.bf16.mxu1 %v10499_v8  ;;  %8319 = vmatpush3.bf16.msra.mxu1 %v9235_v56  ;;  %v9241_v56 = vld [vmem:[%s10960_s3 + $0x110] sm:$0xff]  }
 0x3b8   : > { %8320 = vmatprep.subr.bf16.mxu1 %v9236_v22 }
 0x3bb   : > { %8321 = vmatpush3.bf16.msra.mxu1 %v9236_v22  ;;  %v9247_v22 = vld [vmem:[%s10960_s3 + $0x140] sm:$0xff]  }
 0x3bc   : > { %8322 = vmatprep.subr.bf16.mxu1 %v9237_v17 }
 0x3be   : > { %8291 = vmatmul.mubr.bf16.gmra.mrb[12].mxu1 %v10506_v34 }
 0x3bf   : > { %8294 = vmatprep.mubr.bf16.mxu1 %v10511_v7  ;;  %8323 = vmatpush3.bf16.msra.mxu1 %v9237_v17  ;;  %v4301_v17 = vld [vmem:[#allocation3 + $0x188] sm:$0xff] }
 0x3c0   : > { %8324 = vmatprep.subr.bf16.mxu1 %v9238_v26  ;;  %v10578_v25 = vpack.c.bf16 %v4301_v17, %v4300_v54  ;;  %v9253_v17 = vld [vmem:[%s10960_s3 + $0x170] sm:$0xff]  }
 0x3c1   : > { %v4593_v54 = vld [vmem:[#allocation3 + $0xe1] sm:$0xff] }
 0x3c3   : > { %8325 = vmatpush3.bf16.msra.mxu1 %v9238_v26  ;;  %v4608_v26 = vpack.c.bf16 %v4577_v12, %v4576_v42  ;;  %v4591_v12 = vld [vmem:[#allocation3 + $0xc9] sm:$0xff]  ;;  %v4590_v42 = vld [vmem:[#allocation3 + $0xc1] sm:$0xff] }
 0x3c4   : > { %8358 = vmatprep.subr.bf16.mxu1 %v9239_v20 }
 0x3c6   : > { %8295 = vmatmul.mubr.bf16.gmra.mrb[16].mxu1 %v10518_v16 }
 0x3c7   : > { %8298 = vmatprep.mubr.bf16.mxu1 %v10520_v36 }
 0x3ce   : > { %8299 = vmatmul.mubr.bf16.gmra.mrb[20].mxu1 %v10524_v58 }
 0x3cf   : > { %8302 = vmatprep.mubr.bf16.mxu1 %v10526_v63 }
 0x3d6   : > { %8303 = vmatmul.mubr.bf16.gmra.mrb[24].mxu1 %v10530_v9 }
 0x3d7   : > { %8306 = vmatprep.mubr.bf16.mxu1 %v10532_v21 }
 0x3de   : > { %8307 = vmatmul.mubr.bf16.gmra.mrb[28].mxu1 %v10536_v29 }
 0x3df   : > { %8326 = vmatprep.mubr.bf16.mxu1 %v10400_v33  ;;  %v9242_v33 = vld [vmem:[%s10960_s3 + $0x118] sm:$0xff]  }
 0x3e6   : > { %8327 = vmatmul.mubr.bf16.vlgmr.msra.gmra.mrb[0].mxu1 %v10405_v39 }
 0x3e7   : > { %8330 = vmatprep.mubr.bf16.mxu1 %v10413_v44  ;;  %8359 = vmatpush3.bf16.msra.mxu1 %v9239_v20  ;;  %v4579_v20 = vld [vmem:[#allocation3 + $0x39] sm:$0xff] }
 0x3e8   : > { %8360 = vmatprep.subr.bf16.mxu1 %v9240_v13  ;;  %v10581_v11 = vpack.c.bf16 %v4579_v20, %v4578_v10  ;;  %v4592_v20 = vld [vmem:[#allocation3 + $0xd9] sm:$0xff] }
 0x3e9   : > { %v10622_v10 = vpack.c.bf16 %v4593_v54, %v4592_v20  ;;  %v5806_v54 = vld [vmem:[#allocation3 + $0x6a] sm:$0xff]  ;;  %v5807_v20 = vld [vmem:[#allocation3 + $0x7a] sm:$0xff] }
 0x3eb   : > { %8361 = vmatpush3.bf16.msra.mxu1 %v9240_v13  ;;  %v9251_v13 = vld [vmem:[%s10960_s3 + $0x160] sm:$0xff]  }
 0x3ec   : > { %8362 = vmatprep.subr.bf16.mxu1 %v9241_v56 }
 0x3ee   : > { %8331 = vmatmul.mubr.bf16.gmra.mrb[4].mxu1 %v10418_v49 }
 0x3ef   : > { %8334 = vmatprep.mubr.bf16.mxu1 %v10425_v57  ;;  %8363 = vmatpush3.bf16.msra.mxu1 %v9241_v56  ;;  %v4587_v56 = vld [vmem:[#allocation3 + $0x99] sm:$0xff] }
 0x3f0   : > { %8364 = vmatprep.subr.bf16.mxu1 %v9242_v33 }
 0x3f3   : > { %8365 = vmatpush3.bf16.msra.mxu1 %v9242_v33  ;;  %v4589_v33 = vld [vmem:[#allocation3 + $0xb1] sm:$0xff] }
 0x3f4   : > { %8366 = vmatprep.subr.bf16.mxu1 %v9243_v51 }
 0x3f6   : > { %8335 = vmatmul.mubr.bf16.gmra.mrb[8].mxu1 %v10430_v43 }
 0x3f7   : > { %8338 = vmatprep.mubr.bf16.mxu1 %v10437_v46  ;;  %8367 = vmatpush3.bf16.msra.mxu1 %v9243_v51  ;;  %v4586_v51 = vld [vmem:[#allocation3 + $0x91] sm:$0xff] }
 0x3f8   : > { %8368 = vmatprep.subr.bf16.mxu1 %v9244_v59 }
 0x3fb   : > { %8369 = vmatpush3.bf16.msra.mxu1 %v9244_v59  ;;  %v10605_v59 = vpack.c.bf16 %v4587_v56, %v4586_v51  ;;  %v4598_v56 = vld [vmem:[#allocation3 + $0x121] sm:$0xff] }
 0x3fc   : > { %8370 = vmatprep.subr.bf16.mxu1 %v9245_v62 }
 0x3fe   : > { %8339 = vmatmul.mubr.bf16.gmra.mrb[12].mxu1 %v10442_v18 }
 0x3ff   : > { %8342 = vmatprep.mubr.bf16.mxu1 %v10449_v35  ;;  %8371 = vmatpush3.bf16.msra.mxu1 %v9245_v62  ;;  %v4588_v62 = vld [vmem:[#allocation3 + $0xa9] sm:$0xff] }
 0x400   : > { %8372 = vmatprep.subr.bf16.mxu1 %v9246_v1 }
 0x403   : > { %8373 = vmatpush3.bf16.msra.mxu1 %v9246_v1  ;;  %v9252_v1 = vld [vmem:[%s10960_s3 + $0x168] sm:$0xff]  }
 0x404   : > { %8406 = vmatprep.subr.bf16.mxu1 %v9247_v22 }
 0x406   : > { %8343 = vmatmul.mubr.bf16.gmra.mrb[16].mxu1 %v10451_v23 }
 0x407   : > { %8346 = vmatprep.mubr.bf16.mxu1 %v10455_v5 }
 0x40e   : > { %8347 = vmatmul.mubr.bf16.gmra.mrb[20].mxu1 %v10457_v41 }
 0x40f   : > { %8350 = vmatprep.mubr.bf16.mxu1 %v10461_v52 }
 0x416   : > { %8351 = vmatmul.mubr.bf16.gmra.mrb[24].mxu1 %v10463_v32 }
 0x417   : > { %8354 = vmatprep.mubr.bf16.mxu1 %v10467_v15 }
 0x41e   : > { %8355 = vmatmul.mubr.bf16.gmra.mrb[28].mxu1 %v10578_v25 }
 0x41f   : > { %8374 = vmatprep.mubr.bf16.mxu1 %v4608_v26  ;;  %v10617_v26 = vpack.c.bf16 %v4591_v12, %v4590_v42  ;;  %v5805_v12 = vld [vmem:[#allocation3 + $0x62] sm:$0xff] }
 0x426   : > { %8375 = vmatmul.mubr.bf16.vlgmr.msra.gmra.mrb[0].mxu1 %v10581_v11 }
 0x427   : > { %8378 = vmatprep.mubr.bf16.mxu1 %v10586_v30  ;;  %8407 = vmatpush3.bf16.msra.mxu1 %v9247_v22  ;;  %v10610_v22 = vpack.c.bf16 %v4589_v33, %v4588_v62  ;;  %v4603_v62 = vld [vmem:[#allocation3 + $0x159] sm:$0xff] }
 0x428   : > { %8408 = vmatprep.subr.bf16.mxu1 %v9248_v40 }
 0x42b   : > { %8409 = vmatpush3.bf16.msra.mxu1 %v9248_v40  ;;  %v4595_v40 = vld [vmem:[#allocation3 + $0xf9] sm:$0xff] }
 0x42c   : > { %8410 = vmatprep.subr.bf16.mxu1 %v9249_v48  ;;  %v10629_v19 = vpack.c.bf16 %v4595_v40, %v4594_v37  ;;  %v5811_v37 = vld [vmem:[#allocation3 + $0xaa] sm:$0xff] }
 0x42e   : > { %8379 = vmatmul.mubr.bf16.gmra.mrb[4].mxu1 %v10593_v14 }
 0x42f   : > { %8382 = vmatprep.mubr.bf16.mxu1 %v10598_v53  ;;  %8411 = vmatpush3.bf16.msra.mxu1 %v9249_v48  ;;  %v4597_v48 = vld [vmem:[#allocation3 + $0x111] sm:$0xff] }
 0x430   : > { %8412 = vmatprep.subr.bf16.mxu1 %v9250_v47  ;;  %v10631_v0 = vpack.c.bf16 %v4597_v48, %v4596_v31  ;;  %v5813_v31 = vld [vmem:[#allocation3 + $0xc2] sm:$0xff] }
 0x433   : > { %8413 = vmatpush3.bf16.msra.mxu1 %v9250_v47  ;;  %v4599_v47 = vld [vmem:[#allocation3 + $0x129] sm:$0xff] }
 0x434   : > { %8414 = vmatprep.subr.bf16.mxu1 %v9251_v13  ;;  %v10637_v33 = vpack.c.bf16 %v4599_v47, %v4598_v56  ;;  %v5815_v56 = vld [vmem:[#allocation3 + $0xda] sm:$0xff] }
 0x436   : > { %8383 = vmatmul.mubr.bf16.gmra.mrb[8].mxu1 %v10605_v59 }
 0x437   : > { %8386 = vmatprep.mubr.bf16.mxu1 %v10610_v22  ;;  %8415 = vmatpush3.bf16.msra.mxu1 %v9251_v13  ;;  %v10635_v13 = vld [vmem:[#allocation3 + $0x139] sm:$0xff] }
 0x438   : > { %8416 = vmatprep.subr.bf16.mxu1 %v9252_v1  ;;  %v4620_v51 = vpack.c.bf16 %v10378_v24, %v10635_v13  ;;  %v9256_v24 = vld [vmem:[%s10960_s3 + $0x188] sm:$0xff]  }
 0x43b   : > { %8417 = vmatpush3.bf16.msra.mxu1 %v9252_v1  ;;  %v4602_v1 = vld [vmem:[#allocation3 + $0x151] sm:$0xff] }
 0x43c   : > { %8418 = vmatprep.subr.bf16.mxu1 %v9253_v17 }
 0x43e   : > { %8387 = vmatmul.mubr.bf16.gmra.mrb[12].mxu1 %v10617_v26 }
 0x43f   : > { %8390 = vmatprep.mubr.bf16.mxu1 %v10622_v10  ;;  %8419 = vmatpush3.bf16.msra.mxu1 %v9253_v17  ;;  %v10642_v17 = vpack.c.bf16 %v4603_v62, %v4602_v1  ;;  %v5818_v62 = vld [vmem:[#allocation3 + $0xfa] sm:$0xff] }
 0x440   : > { %8420 = vmatprep.subr.bf16.mxu1 %v9254_v2 }
 0x443   : > { %8421 = vmatpush3.bf16.msra.mxu1 %v9254_v2  ;;  %v5808_v2 = vld [vmem:[#allocation3 + $0x82] sm:$0xff] }
 0x444   : > { %8454 = vmatprep.subr.bf16.mxu1 %v9255_v38  ;;  %v5836_v40 = vpack.c.bf16 %v5808_v2, %v5807_v20 }
 0x446   : > { %8391 = vmatmul.mubr.bf16.gmra.mrb[16].mxu1 %v10629_v19 }
 0x447   : > { %8394 = vmatprep.mubr.bf16.mxu1 %v10631_v0 }
 0x44e   : > { %8395 = vmatmul.mubr.bf16.gmra.mrb[20].mxu1 %v10637_v33 }
 0x44f   : > { %8398 = vmatprep.mubr.bf16.mxu1 %v4620_v51  ;;  %v5817_v51 = vld [vmem:[#allocation3 + $0xf2] sm:$0xff] }
 0x456   : > { %8399 = vmatmul.mubr.bf16.gmra.mrb[24].mxu1 %v10642_v17 }
 0x457   : > { %8402 = vmatprep.mubr.bf16.mxu1 %v10396_v28  ;;  %v9257_v28 = vld [vmem:[%s10960_s3 + $0x190] sm:$0xff]  }
 0x45e   : > { %8403 = vmatmul.mubr.bf16.gmra.mrb[28].mxu1 %v4623_v27  ;;  %v9260_v27 = vld [vmem:[%s10960_s3 + $0x1a8] sm:$0xff]  }
 0x45f   : > { %8422 = vmatprep.mubr.bf16.mxu1 %v10470_v61  ;;  %v9261_v61 = vld [vmem:[%s10960_s3 + $0x1b0] sm:$0xff]  }
 0x466   : > { %8423 = vmatmul.mubr.bf16.vlgmr.msra.gmra.mrb[0].mxu1 %v10475_v4  ;;  %v9262_v4 = vld [vmem:[%s10960_s3 + $0x1b8] sm:$0xff]  }
 0x467   : > { %8426 = vmatprep.mubr.bf16.mxu1 %v10482_v45  ;;  %8455 = vmatpush3.bf16.msra.mxu1 %v9255_v38  ;;  %v9263_v45 = vld [vmem:[%s10960_s3 + $0x1c0] sm:$0xff]   ;;  %v5810_v38 = vld [vmem:[#allocation3 + $0x9a] sm:$0xff] }
 0x468   : > { %8456 = vmatprep.subr.bf16.mxu1 %v9256_v24 }
 0x46b   : > { %8457 = vmatpush3.bf16.msra.mxu1 %v9256_v24  ;;  %v5819_v24 = vld [vmem:[#allocation3 + $0x10a] sm:$0xff] }
 0x46c   : > { %8458 = vmatprep.subr.bf16.mxu1 %v9257_v28 }
 0x46e   : > { %8427 = vmatmul.mubr.bf16.gmra.mrb[4].mxu1 %v10487_v50  ;;  %v4912_v50 = vld [vmem:[#allocation3 + $0x182] sm:$0xff] }
 0x46f   : > { %8430 = vmatprep.mubr.bf16.mxu1 %v10494_v6  ;;  %8459 = vmatpush3.bf16.msra.mxu1 %v9257_v28  ;;  %v4913_v6 = vld [vmem:[#allocation3 + $0x18a] sm:$0xff]  ;;  %v5820_v28 = vld [vmem:[#allocation3 + $0x112] sm:$0xff] }
 0x470   : > { %8460 = vmatprep.subr.bf16.mxu1 %v9258_v55 }
 0x473   : > { %8461 = vmatpush3.bf16.msra.mxu1 %v9258_v55  ;;  %v5821_v55 = vld [vmem:[#allocation3 + $0x122] sm:$0xff] }
 0x474   : > { %8462 = vmatprep.subr.bf16.mxu1 %v9259_v3 }
 0x476   : > { %8431 = vmatmul.mubr.bf16.gmra.mrb[8].mxu1 %v10499_v8  ;;  %v10688_v8 = vpack.c.bf16 %v4913_v6, %v4912_v50  ;;  %v5825_v50 = vld [vmem:[#allocation3 + $0x152] sm:$0xff]  ;;  %v5826_v6 = vld [vmem:[#allocation3 + $0x15a] sm:$0xff] }
 0x477   : > { %8434 = vmatprep.mubr.bf16.mxu1 %v10506_v34  ;;  %8463 = vmatpush3.bf16.msra.mxu1 %v9259_v3  ;;  %v9264_v34 = vld [vmem:[%s10960_s3 + $0x1c8] sm:$0xff]   ;;  %v5822_v3 = vld [vmem:[#allocation3 + $0x12a] sm:$0xff] }
 0x478   : > { %8464 = vmatprep.subr.bf16.mxu1 %v9260_v27 }
 0x47b   : > { %8465 = vmatpush3.bf16.msra.mxu1 %v9260_v27  ;;  %v5842_v27 = vpack.c.bf16 %v5820_v28, %v5819_v24 }
 0x47c   : > { %8466 = vmatprep.subr.bf16.mxu1 %v9261_v61 }
 0x47e   : > { %8435 = vmatmul.mubr.bf16.gmra.mrb[12].mxu1 %v10511_v7  ;;  %v9265_v7 = vld [vmem:[%s10960_s3 + $0x1d0] sm:$0xff]  }
 0x47f   : > { %8438 = vmatprep.mubr.bf16.mxu1 %v10518_v16  ;;  %8467 = vmatpush3.bf16.msra.mxu1 %v9261_v61  ;;  %v5522_v16 = vld [vmem:[#allocation3 + $0x171] sm:$0xff]  ;;  %v5843_v61 = vpack.c.bf16 %v5822_v3, %v5821_v55 }
 0x480   : > { %8468 = vmatprep.subr.bf16.mxu1 %v9262_v4 }
 0x483   : > { %8469 = vmatpush3.bf16.msra.mxu1 %v9262_v4  ;;  %v5823_v4 = vld [vmem:[#allocation3 + $0x13a] sm:$0xff] }
 0x484   : > { %8502 = vmatprep.subr.bf16.mxu1 %v9263_v45 }
 0x486   : > { %8439 = vmatmul.mubr.bf16.gmra.mrb[16].mxu1 %v10520_v36  ;;  %v5524_v36 = vld [vmem:[#allocation3 + $0x189] sm:$0xff] }
 0x487   : > { %8442 = vmatprep.mubr.bf16.mxu1 %v10524_v58  ;;  %v5521_v58 = vld [vmem:[#allocation3 + $0x169] sm:$0xff] }
 0x48e   : > { %8443 = vmatmul.mubr.bf16.gmra.mrb[20].mxu1 %v10526_v63  ;;  %v5540_v63 = vpack.c.bf16 %v5522_v16, %v5521_v58 }
 0x48f   : > { %8446 = vmatprep.mubr.bf16.mxu1 %v10530_v9  ;;  %v5523_v9 = vld [vmem:[#allocation3 + $0x181] sm:$0xff] }
 0x496   : > { %8447 = vmatmul.mubr.bf16.gmra.mrb[24].mxu1 %v10532_v21  ;;  %v5541_v21 = vpack.c.bf16 %v5524_v36, %v5523_v9 }
 0x497   : > { %8450 = vmatprep.mubr.bf16.mxu1 %v10536_v29  ;;  %v5525_v29 = vld [vmem:[#allocation3 + $0x199] sm:$0xff] }
 0x49e   : > { %8451 = vmatmul.mubr.bf16.gmra.mrb[28].mxu1 %v10688_v8 }
 0x49f   : > { %8470 = vmatprep.mubr.bf16.mxu1 %v10405_v39  ;;  %v9266_v39 = vld [vmem:[%s10960_s3 + $0x1d8] sm:$0xff]  }
 0x4a6   : > { %8471 = vmatmul.mubr.bf16.vlgmr.msra.gmra.mrb[0].mxu1 %v10413_v44  ;;  %v9267_v44 = vld [vmem:[%s10960_s3 + $0x1e0] sm:$0xff]  }
 0x4a7   : > { %8474 = vmatprep.mubr.bf16.mxu1 %v10418_v49  ;;  %8503 = vmatpush3.bf16.msra.mxu1 %v9263_v45  ;;  %v9268_v49 = vld [vmem:[%s10960_s3 + $0x1e8] sm:$0xff]   ;;  %v5824_v45 = vld [vmem:[#allocation3 + $0x142] sm:$0xff] }
 0x4a8   : > { %8504 = vmatprep.subr.bf16.mxu1 %v9264_v34 }
 0x4ab   : > { %8505 = vmatpush3.bf16.msra.mxu1 %v9264_v34  ;;  %v5844_v34 = vpack.c.bf16 %v5824_v45, %v5823_v4 }
 0x4ac   : > { %8506 = vmatprep.subr.bf16.mxu1 %v9265_v7 }
 0x4ae   : > { %8475 = vmatmul.mubr.bf16.gmra.mrb[4].mxu1 %v10425_v57  ;;  %v9269_v57 = vld [vmem:[%s10960_s3 + $0x1f0] sm:$0xff]  }
 0x4af   : > { %8478 = vmatprep.mubr.bf16.mxu1 %v10430_v43  ;;  %8507 = vmatpush3.bf16.msra.mxu1 %v9265_v7  ;;  %v9270_v43 = vld [vmem:[%s10960_s3 + $0x1f8] sm:$0xff]   ;;  %v5845_v7 = vpack.c.bf16 %v5826_v6, %v5825_v50 }
 0x4b0   : > { %8508 = vmatprep.subr.bf16.mxu1 %v9266_v39 }
 0x4b3   : > { %8509 = vmatpush3.bf16.msra.mxu1 %v9266_v39  ;;  %v5827_v39 = vld [vmem:[#allocation3 + $0x16a] sm:$0xff] }
 0x4b4   : > { %8510 = vmatprep.subr.bf16.mxu1 %v9267_v44 }
 0x4b6   : > { %8479 = vmatmul.mubr.bf16.gmra.mrb[8].mxu1 %v10437_v46  ;;  %v9271_v46 = vld [vmem:[%s10960_s3 + $0x200] sm:$0xff]  }
 0x4b7   : > { %8482 = vmatprep.mubr.bf16.mxu1 %v10442_v18  ;;  %8511 = vmatpush3.bf16.msra.mxu1 %v9267_v44  ;;  %v9272_v18 = vld [vmem:[%s10960_s3 + $0x208] sm:$0xff]  }
 0x4b8   : > { %8512 = vmatprep.subr.bf16.mxu1 %v9268_v49  ;;  %v5828_v44 = vld [vmem:[#allocation3 + $0x172] sm:$0xff] }
 0x4bb   : > { %8513 = vmatpush3.bf16.msra.mxu1 %v9268_v49  ;;  %v5846_v49 = vpack.c.bf16 %v5828_v44, %v5827_v39 }
 0x4bc   : > { %8514 = vmatprep.subr.bf16.mxu1 %v9269_v57 }
 0x4be   : > { %8483 = vmatmul.mubr.bf16.gmra.mrb[12].mxu1 %v10449_v35  ;;  %v9273_v35 = vld [vmem:[%s10960_s3 + $0x210] sm:$0xff]  }
 0x4bf   : > { %8486 = vmatprep.mubr.bf16.mxu1 %v10451_v23  ;;  %8515 = vmatpush3.bf16.msra.mxu1 %v9269_v57  ;;  %v9275_v23 = vld [vmem:[%s10960_s3 + $0x220] sm:$0xff]   ;;  %v5831_v57 = vld [vmem:[#allocation3 + $0x19a] sm:$0xff] }
 0x4c0   : > { %8516 = vmatprep.subr.bf16.mxu1 %v9270_v43 }
 0x4c3   : > { %8517 = vmatpush3.bf16.msra.mxu1 %v9270_v43  ;;  %v5832_v43 = vld [vmem:[#allocation3 + $0x1a2] sm:$0xff] }
 0x4c4   : > { %8550 = vmatprep.subr.bf16.mxu1 %v9271_v46 }
 0x4c6   : > { %8487 = vmatmul.mubr.bf16.gmra.mrb[16].mxu1 %v10455_v5  ;;  %v9276_v5 = vld [vmem:[%s10960_s3 + $0x228] sm:$0xff]  }
 0x4c7   : > { %8490 = vmatprep.mubr.bf16.mxu1 %v10457_v41  ;;  %v9277_v41 = vld [vmem:[%s10960_s3 + $0x230] sm:$0xff]  }
 0x4ce   : > { %8491 = vmatmul.mubr.bf16.gmra.mrb[20].mxu1 %v10461_v52  ;;  %v9278_v52 = vld [vmem:[%s10960_s3 + $0x238] sm:$0xff]  }
 0x4cf   : > { %8494 = vmatprep.mubr.bf16.mxu1 %v10463_v32  ;;  %v5518_v32 = vld [vmem:[#allocation3 + $0x141] sm:$0xff] }
 0x4d6   : > { %8495 = vmatmul.mubr.bf16.gmra.mrb[24].mxu1 %v10467_v15  ;;  %v5538_v15 = vpack.c.bf16 %v5518_v32, %v10635_v13 }
 0x4d7   : > { %8498 = vmatprep.mubr.bf16.mxu1 %v10578_v25  ;;  %v5526_v25 = vld [vmem:[#allocation3 + $0x1a1] sm:$0xff] }
 0x4de   : > { %8499 = vmatmul.mubr.bf16.gmra.mrb[28].mxu1 %v10392_v60  ;;  %v9274_v60 = vld [vmem:[%s10960_s3 + $0x218] sm:$0xff]  }
 0x4df   : > { %8518 = vmatprep.mubr.bf16.mxu1 %v10581_v11  ;;  %v5542_v11 = vpack.c.bf16 %v5526_v25, %v5525_v29 }
 0x4e6   : > { %8519 = vmatmul.mubr.bf16.vlgmr.msra.gmra.mrb[0].mxu1 %v10586_v30  ;;  %v5801_v30 = vld [vmem:[#allocation3 + $0x32] sm:$0xff] }
 0x4e7   : > { %8522 = vmatprep.mubr.bf16.mxu1 %v10593_v14  ;;  %8551 = vmatpush3.bf16.msra.mxu1 %v9271_v46  ;;  %v5802_v14 = vld [vmem:[#allocation3 + $0x3a] sm:$0xff]  ;;  %v5848_v46 = vpack.c.bf16 %v5832_v43, %v5831_v57 }
 0x4e8   : > { %8552 = vmatprep.subr.bf16.mxu1 %v9272_v18 }
 0x4eb   : > { %8553 = vmatpush3.bf16.msra.mxu1 %v9272_v18  ;;  %v10769_v18 = vld [vmem:[%s10961_s4] ss:$0 sm:$0xff] }
 0x4ec   : > { %8554 = vmatprep.subr.bf16.mxu1 %v9273_v35 }
 0x4ee   : > { %8523 = vmatmul.mubr.bf16.gmra.mrb[4].mxu1 %v10598_v53  ;;  %v5833_v53 = vpack.c.bf16 %v5802_v14, %v5801_v30 }
 0x4ef   : > { %8526 = vmatprep.mubr.bf16.mxu1 %v10605_v59  ;;  %8555 = vmatpush3.bf16.msra.mxu1 %v9273_v35  ;;  %v5803_v59 = vld [vmem:[#allocation3 + $0x4a] sm:$0xff] }
 0x4f0   : > { %8556 = vmatprep.subr.bf16.mxu1 %v9274_v60 }
 0x4f3   : > { %8557 = vmatpush3.bf16.msra.mxu1 %v9274_v60 }
 0x4f4   : > { %8558 = vmatprep.subr.bf16.mxu1 %v9275_v23 }
 0x4f6   : > { %8527 = vmatmul.mubr.bf16.gmra.mrb[8].mxu1 %v10610_v22  ;;  %v5804_v22 = vld [vmem:[#allocation3 + $0x52] sm:$0xff] }
 0x4f7   : > { %8530 = vmatprep.mubr.bf16.mxu1 %v10617_v26  ;;  %8559 = vmatpush3.bf16.msra.mxu1 %v9275_v23  ;;  %v5834_v42 = vpack.c.bf16 %v5804_v22, %v5803_v59  ;;  %v5835_v26 = vpack.c.bf16 %v5806_v54, %v5805_v12 }
 0x4f8   : > { %8560 = vmatprep.subr.bf16.mxu1 %v9276_v5 }
 0x4fb   : > { %8561 = vmatpush3.bf16.msra.mxu1 %v9276_v5 }
 0x4fc   : > { %8562 = vmatprep.subr.bf16.mxu1 %v9277_v41 }
 0x4fe   : > { %8531 = vmatmul.mubr.bf16.gmra.mrb[12].mxu1 %v10622_v10  ;;  %v5809_v10 = vld [vmem:[#allocation3 + $0x92] sm:$0xff] }
 0x4ff   : > { %8534 = vmatprep.mubr.bf16.mxu1 %v10629_v19  ;;  %8563 = vmatpush3.bf16.msra.mxu1 %v9277_v41  ;;  %v5837_v48 = vpack.c.bf16 %v5810_v38, %v5809_v10  ;;  %v5812_v19 = vld [vmem:[#allocation3 + $0xb2] sm:$0xff] }
 0x500   : > { %8564 = vmatprep.subr.bf16.mxu1 %v9278_v52  ;;  %v5838_v47 = vpack.c.bf16 %v5812_v19, %v5811_v37 }
 0x503   : > { %8565 = vmatpush3.bf16.msra.mxu1 %v9278_v52 }
 0x506   : > { %8535 = vmatmul.mubr.bf16.gmra.mrb[16].mxu1 %v10631_v0  ;;  %v5814_v0 = vld [vmem:[#allocation3 + $0xca] sm:$0xff] }
 0x507   : > { %8538 = vmatprep.mubr.bf16.mxu1 %v10637_v33  ;;  %v5839_v13 = vpack.c.bf16 %v5814_v0, %v5813_v31  ;;  %v5816_v33 = vld [vmem:[#allocation3 + $0xe2] sm:$0xff] }
 0x508   : > { %v5840_v1 = vpack.c.bf16 %v5816_v33, %v5815_v56 }
 0x50e   : > { %8539 = vmatmul.mubr.bf16.gmra.mrb[20].mxu1 %v5538_v15 }
 0x50f   : > { %8542 = vmatprep.mubr.bf16.mxu1 %v10642_v17  ;;  %v5841_v17 = vpack.c.bf16 %v5818_v62, %v5817_v51 }
 0x516   : > { %8543 = vmatmul.mubr.bf16.gmra.mrb[24].mxu1 %v5540_v63 }
 0x517   : > { %8546 = vmatprep.mubr.bf16.mxu1 %v5541_v21 }
 0x51e   : > { %8547 = vmatmul.mubr.bf16.gmra.mrb[28].mxu1 %v5542_v11 }
 0x51f   : > { %8566 = vmatprep.mubr.bf16.mxu1 %v5833_v53 }
 0x526   : > { %8567 = vmatmul.mubr.bf16.vlgmr.msra.gmra.mrb[0].mxu1 %v5834_v42 }
 0x527   : > { %8570 = vmatprep.mubr.bf16.mxu1 %v5835_v26 }
 0x52e   : > { %8571 = vmatmul.mubr.bf16.gmra.mrb[4].mxu1 %v5836_v40 }
 0x52f   : > { %8574 = vmatprep.mubr.bf16.mxu1 %v5837_v48 }
 0x536   : > { %8575 = vmatmul.mubr.bf16.gmra.mrb[8].mxu1 %v5838_v47 }
 0x537   : > { %8578 = vmatprep.mubr.bf16.mxu1 %v5839_v13 }
 0x53e   : > { %8579 = vmatmul.mubr.bf16.gmra.mrb[12].mxu1 %v5840_v1 }
 0x53f   : > { %8582 = vmatprep.mubr.bf16.mxu1 %v5841_v17 }
 0x546   : > { %8583 = vmatmul.mubr.bf16.gmra.mrb[16].mxu1 %v5842_v27 }
 0x547   : > { %8586 = vmatprep.mubr.bf16.mxu1 %v5843_v61 }
 0x54e   : > { %8587 = vmatmul.mubr.bf16.gmra.mrb[20].mxu1 %v5844_v34 }
 0x54f   : > { %8590 = vmatprep.mubr.bf16.mxu1 %v5845_v7 }
 0x556   : > { %8591 = vmatmul.mubr.bf16.gmra.mrb[24].mxu1 %v5846_v49 }
 0x557   : > { %8594 = vmatprep.mubr.bf16.mxu1 %v10688_v8 }
 0x55e   : > { %8595 = vmatmul.mubr.bf16.gmra.mrb[28].mxu1 %v5848_v46 }
 0x5f9   : > { %v8568_v35 = vpop.f32.mrb[0].mxu1 }
 0x5fa   : > { %v10772_v60 = vadd.f32 %v8568_v35, %v10769_v18  ;;  %v5948_v23 = vpop.f32.mrb[1].mxu1 }
 0x5fb   : > { %v10775_v5 = vadd.f32 %v10769_v18, %v5948_v23  ;;  %v8569_v41 = vpop.f32.mrb[2].mxu1 }
 0x5fc   : > { %v7030_v8 = vmul.f32 -1.442695, %v10772_v60  ;;  %v10779_v52 = vadd.f32 %v8569_v41, %v10769_v18  ;;  %v5951_v32 = vpop.f32.mrb[3].mxu1 }
 0x5fd   : > { %v7028_v15 = vmul.f32 -1.442695, %v10775_v5  ;;  %v10783_v16 = vadd.f32 %v10769_v18, %v5951_v32 }
 0x5fe   : > { %9407 = vpow2.f32 %v7030_v8  ;;  %v7031_v36 = vmul.f32 -1.442695, %v10779_v52 }
 0x5ff   : > { %9409 = vpow2.f32 %v7028_v15  ;;  %v7029_v58 = vmul.f32 -1.442695, %v10783_v16 }
 0x600   : > { %9411 = vpow2.f32 %v7031_v36 }
 0x601   : > { %9413 = vpow2.f32 %v7029_v58  ;;  %v8572_v63 = vpop.f32.mrb[4].mxu1 }
 0x602   : > { %v10788_v9 = vadd.f32 %v8572_v63, %v10769_v18  ;;  %v5964_v21 = vpop.f32.mrb[5].mxu1 }
 0x603   : > { %v10791_v29 = vadd.f32 %v10769_v18, %v5964_v21  ;;  %v8573_v25 = vpop.f32.mrb[6].mxu1 }
 0x604   : > { %v7034_v11 = vmul.f32 -1.442695, %v10788_v9  ;;  %v10795_v30 = vadd.f32 %v8573_v25, %v10769_v18  ;;  %v5967_v14 = vpop.f32.mrb[7].mxu1 }
 0x605   : > { %v7032_v53 = vmul.f32 -1.442695, %v10791_v29  ;;  %v10799_v59 = vadd.f32 %v10769_v18, %v5967_v14 }
 0x606   : > { %9415 = vpow2.f32 %v7034_v11  ;;  %v7035_v22 = vmul.f32 -1.442695, %v10795_v30 }
 0x607   : > { %9417 = vpow2.f32 %v7032_v53  ;;  %v7033_v12 = vmul.f32 -1.442695, %v10799_v59 }
 0x608   : > { %v9408_v54 = vpop.eup %9407  ;;  %9419 = vpow2.f32 %v7035_v22 }
 0x609   : > { %v9410_v42 = vpop.eup %9409  ;;  %v6244_v26 = vadd.f32 1.0, %v9408_v54  ;;  %9421 = vpow2.f32 %v7033_v12  ;;  %v8576_v20 = vpop.f32.mrb[8].mxu1 }
 0x60a   : > { %v9412_v2 = vpop.eup %9411  ;;  %v6242_v10 = vadd.f32 1.0, %v9410_v42  ;;  %v10804_v38 = vadd.f32 %v8576_v20, %v10769_v18  ;;  %v5980_v40 = vpop.f32.mrb[9].mxu1 }
 0x60b   : > { %v9414_v48 = vpop.eup %9413  ;;  %9423 = vrcp.f32 %v6244_v26  ;;  %v6245_v37 = vadd.f32 1.0, %v9412_v2  ;;  %v10807_v19 = vadd.f32 %v10769_v18, %v5980_v40  ;;  %v8577_v31 = vpop.f32.mrb[10].mxu1 }
 0x60c   : > { %9425 = vrcp.f32 %v6242_v10  ;;  %v6243_v0 = vadd.f32 1.0, %v9414_v48  ;;  %v7038_v47 = vmul.f32 -1.442695, %v10804_v38  ;;  %v10811_v13 = vadd.f32 %v8577_v31, %v10769_v18  ;;  %v5983_v56 = vpop.f32.mrb[11].mxu1 }
 0x60d   : > { %9427 = vrcp.f32 %v6245_v37  ;;  %v7036_v33 = vmul.f32 -1.442695, %v10807_v19  ;;  %v10815_v51 = vadd.f32 %v10769_v18, %v5983_v56 }
 0x60e   : > { %9429 = vrcp.f32 %v6243_v0  ;;  %v7039_v62 = vmul.f32 -1.442695, %v10811_v13 }
 0x60f   : > { %9431 = vpow2.f32 %v7038_v47  ;;  %v7037_v1 = vmul.f32 -1.442695, %v10815_v51 }
 0x610   : > { %v9416_v17 = vpop.eup %9415  ;;  %9433 = vpow2.f32 %v7036_v33 }
 0x611   : > { %v9418_v24 = vpop.eup %9417  ;;  %v6248_v28 = vadd.f32 1.0, %v9416_v17  ;;  %9435 = vpow2.f32 %v7039_v62  ;;  %v8580_v55 = vpop.f32.mrb[12].mxu1 }
 0x612   : > { %v9420_v3 = vpop.eup %9419  ;;  %v6246_v27 = vadd.f32 1.0, %v9418_v24  ;;  %9437 = vpow2.f32 %v7037_v1  ;;  %v10820_v61 = vadd.f32 %v8580_v55, %v10769_v18  ;;  %v5996_v4 = vpop.f32.mrb[13].mxu1 }
 0x613   : > { %v9422_v45 = vpop.eup %9421  ;;  %9439 = vrcp.f32 %v6248_v28  ;;  %v6249_v50 = vadd.f32 1.0, %v9420_v3  ;;  %v10823_v6 = vadd.f32 %v10769_v18, %v5996_v4  ;;  %v8581_v34 = vpop.f32.mrb[14].mxu1 }
 0x614   : > { %9441 = vrcp.f32 %v6246_v27  ;;  %v6247_v7 = vadd.f32 1.0, %v9422_v45  ;;  %v7042_v39 = vmul.f32 -1.442695, %v10820_v61  ;;  %v10827_v44 = vadd.f32 %v8581_v34, %v10769_v18  ;;  %v5999_v49 = vpop.f32.mrb[15].mxu1 }
 0x615   : > { %v9424_v57 = vpop.eup %9423  ;;  %9443 = vrcp.f32 %v6249_v50  ;;  %v7040_v43 = vmul.f32 -1.442695, %v10823_v6  ;;  %v10831_v46 = vadd.f32 %v10769_v18, %v5999_v49 }
 0x616   : > { %v9426_v35 = vpop.eup %9425  ;;  %9445 = vrcp.f32 %v6247_v7  ;;  %v7043_v23 = vmul.f32 -1.442695, %v10827_v44  ;;  %v6340_v15 = vmul.f32 %v9424_v57, %v10772_v60 }
 0x617   : > { %v9428_v41 = vpop.eup %9427  ;;  %9447 = vpow2.f32 %v7042_v39  ;;  %v7041_v8 = vmul.f32 -1.442695, %v10831_v46  ;;  %v6338_v63 = vmul.f32 %v9426_v35, %v10775_v5 }
 0x618   : > { %v9430_v32 = vpop.eup %9429  ;;  %v6341_v36 = vmul.f32 %v9428_v41, %v10779_v52  ;;  %9449 = vpow2.f32 %v7040_v43 }
 0x619   : > { %v9432_v58 = vpop.eup %9431  ;;  %v6339_v21 = vmul.f32 %v9430_v32, %v10783_v16  ;;  %9451 = vpow2.f32 %v7043_v23  ;;  %v8584_v25 = vpop.f32.mrb[16].mxu1 }
 0x61a   : > { %v9434_v11 = vpop.eup %9433  ;;  %v7200_v14 = vpack.c.bf16 %v6341_v36, %v6340_v15  ;;  %v6252_v60 = vadd.f32 1.0, %v9432_v58  ;;  %9453 = vpow2.f32 %v7041_v8  ;;  %v10847_v52 = vadd.f32 %v8584_v25, %v10769_v18  ;;  %v6012_v5 = vpop.f32.mrb[17].mxu1 }
 0x61b   : > { %v9436_v53 = vpop.eup %9435  ;;  %v7195_v22 = vpack.c.bf16 %v6339_v21, %v6338_v63  ;;  %v6250_v12 = vadd.f32 1.0, %v9434_v11  ;;  %v10850_v54 = vadd.f32 %v10769_v18, %v6012_v5  ;;  %v8585_v42 = vpop.f32.mrb[18].mxu1 }
 0x61c   : > { %v9438_v26 = vpop.eup %9437  ;;  %7287 = vst [vmem:[%s10843_s11 + $0x8] sm:$0xff] %v7200_v14   ;;  %9455 = vrcp.f32 %v6252_v60  ;;  %v6253_v16 = vadd.f32 1.0, %v9436_v53  ;;  %v7046_v20 = vmul.f32 -1.442695, %v10847_v52  ;;  %v10855_v2 = vadd.f32 %v8585_v42, %v10769_v18  ;;  %v6015_v10 = vpop.f32.mrb[19].mxu1 }
 0x61d   : > { %v9440_v40 = vpop.eup %9439  ;;  %7196 = vst [vmem:[%s10843_s11] sm:$0xff] %v7195_v22   ;;  %9457 = vrcp.f32 %v6250_v12  ;;  %v6251_v48 = vadd.f32 1.0, %v9438_v26  ;;  %v7044_v37 = vmul.f32 -1.442695, %v10850_v54  ;;  %v10860_v31 = vadd.f32 %v10769_v18, %v6015_v10 }
 0x61e   : > { %v9442_v0 = vpop.eup %9441  ;;  %9459 = vrcp.f32 %v6253_v16  ;;  %v7047_v47 = vmul.f32 -1.442695, %v10855_v2  ;;  %v6344_v1 = vmul.f32 %v9440_v40, %v10788_v9 }
 0x61f   : > { %v9444_v56 = vpop.eup %9443  ;;  %9461 = vrcp.f32 %v6251_v48  ;;  %v7045_v33 = vmul.f32 -1.442695, %v10860_v31  ;;  %v6342_v28 = vmul.f32 %v9442_v0, %v10791_v29 }
 0x620   : > { %v9446_v62 = vpop.eup %9445  ;;  %v6345_v17 = vmul.f32 %v9444_v56, %v10795_v30  ;;  %9463 = vpow2.f32 %v7046_v20 }
 0x621   : > { %v9448_v24 = vpop.eup %9447  ;;  %v6343_v55 = vmul.f32 %v9446_v62, %v10799_v59  ;;  %9465 = vpow2.f32 %v7044_v37  ;;  %v8588_v3 = vpop.f32.mrb[20].mxu1 }
 0x622   : > { %v9450_v27 = vpop.eup %9449  ;;  %v7210_v4 = vpack.c.bf16 %v6345_v17, %v6344_v1  ;;  %v6256_v45 = vadd.f32 1.0, %v9448_v24  ;;  %9467 = vpow2.f32 %v7047_v47  ;;  %v10869_v50 = vadd.f32 %v8588_v3, %v10769_v18  ;;  %v6028_v9 = vpop.f32.mrb[21].mxu1 }
 0x623   : > { %v9452_v34 = vpop.eup %9451  ;;  %v7205_v30 = vpack.c.bf16 %v6343_v55, %v6342_v28  ;;  %v6254_v7 = vadd.f32 1.0, %v9450_v27  ;;  %9469 = vpow2.f32 %v7045_v33  ;;  %v10872_v29 = vadd.f32 %v10769_v18, %v6028_v9  ;;  %v8589_v59 = vpop.f32.mrb[22].mxu1 }
 0x624   : > { %v9454_v39 = vpop.eup %9453  ;;  %7289 = vst [vmem:[%s10843_s11 + $0x18] sm:$0xff] %v7210_v4   ;;  %9471 = vrcp.f32 %v6256_v45  ;;  %v6257_v49 = vadd.f32 1.0, %v9452_v34  ;;  %v7050_v57 = vmul.f32 -1.442695, %v10869_v50  ;;  %v10877_v43 = vadd.f32 %v8589_v59, %v10769_v18  ;;  %v6031_v35 = vpop.f32.mrb[23].mxu1 }
 0x625   : > { %7288 = vst [vmem:[%s10843_s11 + $0x10] sm:$0xff] %v7205_v30   ;;  %9473 = vrcp.f32 %v6254_v7  ;;  %v6255_v23 = vadd.f32 1.0, %v9454_v39  ;;  %v7048_v41 = vmul.f32 -1.442695, %v10872_v29  ;;  %v10882_v8 = vadd.f32 %v10769_v18, %v6031_v35 }
 0x626   : > { %v9456_v32 = vpop.eup %9455  ;;  %9475 = vrcp.f32 %v6257_v49  ;;  %v7051_v15 = vmul.f32 -1.442695, %v10877_v43 }
 0x627   : > { %v9458_v36 = vpop.eup %9457  ;;  %9477 = vrcp.f32 %v6255_v23  ;;  %v7049_v58 = vmul.f32 -1.442695, %v10882_v8  ;;  %v6348_v25 = vmul.f32 %v9456_v32, %v10804_v38 }
 0x628   : > { %v9460_v63 = vpop.eup %9459  ;;  %9479 = vpow2.f32 %v7050_v57  ;;  %v6346_v5 = vmul.f32 %v9458_v36, %v10807_v19 }
 0x629   : > { %v9462_v21 = vpop.eup %9461  ;;  %v6349_v11 = vmul.f32 %v9460_v63, %v10811_v13  ;;  %9481 = vpow2.f32 %v7048_v41  ;;  %v8592_v14 = vpop.f32.mrb[24].mxu1 }
 0x62a   : > { %v9464_v60 = vpop.eup %9463  ;;  %v6347_v53 = vmul.f32 %v9462_v21, %v10815_v51  ;;  %9483 = vpow2.f32 %v7051_v15  ;;  %v10891_v22 = vadd.f32 %v8592_v14, %v10769_v18  ;;  %v6044_v12 = vpop.f32.mrb[25].mxu1 }
 0x62b   : > { %v9466_v42 = vpop.eup %9465  ;;  %v7220_v26 = vpack.c.bf16 %v6349_v11, %v6348_v25  ;;  %v6260_v16 = vadd.f32 1.0, %v9464_v60  ;;  %9485 = vpow2.f32 %v7049_v58  ;;  %v10894_v38 = vadd.f32 %v10769_v18, %v6044_v12  ;;  %v8593_v13 = vpop.f32.mrb[26].mxu1 }
 0x62c   : > { %v9468_v20 = vpop.eup %9467  ;;  %v7215_v10 = vpack.c.bf16 %v6347_v53, %v6346_v5  ;;  %v6258_v19 = vadd.f32 1.0, %v9466_v42  ;;  %v10897_v51 = vadd.f32 %v8593_v13, %v10769_v18  ;;  %v6047_v40 = vpop.f32.mrb[27].mxu1  ;;  %v7054_v0 = vmul.f32 -1.442695, %v10891_v22 }
 0x62d   : > { %v9470_v48 = vpop.eup %9469  ;;  %7291 = vst [vmem:[%s10843_s11 + $0x28] sm:$0xff] %v7220_v26   ;;  %9487 = vrcp.f32 %v6260_v16  ;;  %v6261_v37 = vadd.f32 1.0, %v9468_v20  ;;  %v10902_v47 = vadd.f32 %v10769_v18, %v6047_v40  ;;  %v7052_v62 = vmul.f32 -1.442695, %v10894_v38 }
 0x62e   : > { %v9472_v56 = vpop.eup %9471  ;;  %7290 = vst [vmem:[%s10843_s11 + $0x20] sm:$0xff] %v7215_v10   ;;  %9489 = vrcp.f32 %v6258_v19  ;;  %v6259_v33 = vadd.f32 1.0, %v9470_v48  ;;  %v7055_v17 = vmul.f32 -1.442695, %v10897_v51 }
 0x62f   : > { %v9474_v1 = vpop.eup %9473  ;;  %9491 = vrcp.f32 %v6261_v37  ;;  %v7053_v28 = vmul.f32 -1.442695, %v10902_v47  ;;  %v6352_v3 = vmul.f32 %v9472_v56, %v10820_v61 }
 0x630   : > { %v9476_v24 = vpop.eup %9475  ;;  %9493 = vrcp.f32 %v6259_v33  ;;  %v6350_v9 = vmul.f32 %v9474_v1, %v10823_v6 }
 0x631   : > { %v9478_v55 = vpop.eup %9477  ;;  %v6353_v27 = vmul.f32 %v9476_v24, %v10827_v44  ;;  %9495 = vpow2.f32 %v7054_v0  ;;  %v8596_v4 = vpop.f32.mrb[28].mxu1 }
 0x632   : > { %v9480_v45 = vpop.eup %9479  ;;  %v6351_v34 = vmul.f32 %v9478_v55, %v10831_v46  ;;  %9497 = vpow2.f32 %v7052_v62  ;;  %v10913_v30 = vadd.f32 %v8596_v4, %v10769_v18  ;;  %v6060_v7 = vpop.f32.mrb[29].mxu1 }
 0x633   : > { %v9482_v59 = vpop.eup %9481  ;;  %v7230_v39 = vpack.c.bf16 %v6353_v27, %v6352_v3  ;;  %v6264_v49 = vadd.f32 1.0, %v9480_v45  ;;  %9499 = vpow2.f32 %v7055_v17  ;;  %v10916_v61 = vadd.f32 %v10769_v18, %v6060_v7  ;;  %v8597_v44 = vpop.f32.mrb[30].mxu1 }
 0x634   : > { %v9484_v57 = vpop.eup %9483  ;;  %v7225_v35 = vpack.c.bf16 %v6351_v34, %v6350_v9  ;;  %v6262_v6 = vadd.f32 1.0, %v9482_v59  ;;  %9501 = vpow2.f32 %v7053_v28  ;;  %v6063_v46 = vpop.f32.mrb[31].mxu1  ;;  %v7058_v32 = vmul.f32 -1.442695, %v10913_v30 }
 0x635   : > { %v9486_v23 = vpop.eup %9485  ;;  %7293 = vst [vmem:[%s10843_s11 + $0x38] sm:$0xff] %v7230_v39   ;;  %9503 = vrcp.f32 %v6264_v49  ;;  %v6265_v41 = vadd.f32 1.0, %v9484_v57  ;;  %v10921_v15 = vadd.f32 %v8597_v44, %v10769_v18  ;;  %v7056_v58 = vmul.f32 -1.442695, %v10916_v61 }
 0x636   : > { %7292 = vst [vmem:[%s10843_s11 + $0x30] sm:$0xff] %v7225_v35   ;;  %9505 = vrcp.f32 %v6262_v6  ;;  %v6263_v36 = vadd.f32 1.0, %v9486_v23  ;;  %v10926_v63 = vadd.f32 %v10769_v18, %v6063_v46 }
 0x637   : > { %v9488_v21 = vpop.eup %9487  ;;  %9507 = vrcp.f32 %v6265_v41  ;;  %v7059_v25 = vmul.f32 -1.442695, %v10921_v15 }
 0x638   : > { %v9490_v11 = vpop.eup %9489  ;;  %9509 = vrcp.f32 %v6263_v36  ;;  %v7057_v14 = vmul.f32 -1.442695, %v10926_v63  ;;  %v6356_v53 = vmul.f32 %v9488_v21, %v10847_v52 }
 0x639   : > { %v9492_v60 = vpop.eup %9491  ;;  %9511 = vpow2.f32 %v7058_v32  ;;  %v6354_v18 = vmul.f32 %v9490_v11, %v10850_v54 }
 0x63a   : > { %v9494_v5 = vpop.eup %9493  ;;  %v6357_v12 = vmul.f32 %v9492_v60, %v10855_v2  ;;  %9513 = vpow2.f32 %v7056_v58 }
 0x63b   : > { %v9496_v42 = vpop.eup %9495  ;;  %v6355_v26 = vmul.f32 %v9494_v5, %v10860_v31  ;;  %9515 = vpow2.f32 %v7059_v25 }
 0x63c   : > { %v9498_v16 = vpop.eup %9497  ;;  %v7240_v13 = vpack.c.bf16 %v6357_v12, %v6356_v53  ;;  %v6268_v20 = vadd.f32 1.0, %v9496_v42  ;;  %9517 = vpow2.f32 %v7057_v14 }
 0x63d   : > { %v9500_v10 = vpop.eup %9499  ;;  %v7235_v19 = vpack.c.bf16 %v6355_v26, %v6354_v18  ;;  %v6266_v40 = vadd.f32 1.0, %v9498_v16 }
 0x63e   : > { %v9502_v48 = vpop.eup %9501  ;;  %7295 = vst [vmem:[%s10843_s11 + $0x48] sm:$0xff] %v7240_v13   ;;  %9519 = vrcp.f32 %v6268_v20  ;;  %v6269_v52 = vadd.f32 1.0, %v9500_v10 }
 0x63f   : > { %v9504_v2 = vpop.eup %9503  ;;  %7294 = vst [vmem:[%s10843_s11 + $0x40] sm:$0xff] %v7235_v19   ;;  %9521 = vrcp.f32 %v6266_v40  ;;  %v6267_v37 = vadd.f32 1.0, %v9502_v48 }
 0x640   : > { %v9506_v0 = vpop.eup %9505  ;;  %9523 = vrcp.f32 %v6269_v52  ;;  %v6360_v56 = vmul.f32 %v9504_v2, %v10869_v50 }
 0x641   : > { %v9508_v54 = vpop.eup %9507  ;;  %9525 = vrcp.f32 %v6267_v37  ;;  %v6358_v1 = vmul.f32 %v9506_v0, %v10872_v29 }
 0x642   : > { %v9510_v31 = vpop.eup %9509  ;;  %v6361_v33 = vmul.f32 %v9508_v54, %v10877_v43 }
 0x643   : > { %v9512_v62 = vpop.eup %9511  ;;  %v6359_v17 = vmul.f32 %v9510_v31, %v10882_v8 }
 0x644   : > { %v9514_v24 = vpop.eup %9513  ;;  %v7250_v28 = vpack.c.bf16 %v6361_v33, %v6360_v56  ;;  %v6272_v55 = vadd.f32 1.0, %v9512_v62 }
 0x645   : > { %v9516_v3 = vpop.eup %9515  ;;  %v7245_v27 = vpack.c.bf16 %v6359_v17, %v6358_v1  ;;  %v6270_v4 = vadd.f32 1.0, %v9514_v24 }
 0x646   : > { %v9518_v45 = vpop.eup %9517  ;;  %7297 = vst [vmem:[%s10843_s11 + $0x58] sm:$0xff] %v7250_v28   ;;  %9527 = vrcp.f32 %v6272_v55  ;;  %v6273_v9 = vadd.f32 1.0, %v9516_v3 }
 0x647   : > { %7296 = vst [vmem:[%s10843_s11 + $0x50] sm:$0xff] %v7245_v27   ;;  %9529 = vrcp.f32 %v6270_v4  ;;  %v6271_v50 = vadd.f32 1.0, %v9518_v45 }
 0x648   : > { %v9520_v43 = vpop.eup %9519  ;;  %9531 = vrcp.f32 %v6273_v9 }
 0x649   : > { %v9522_v29 = vpop.eup %9521  ;;  %9533 = vrcp.f32 %v6271_v50  ;;  %v6364_v7 = vmul.f32 %v9520_v43, %v10891_v22 }
 0x64a   : > { %v9524_v8 = vpop.eup %9523  ;;  %v6362_v39 = vmul.f32 %v9522_v29, %v10894_v38 }
 0x64b   : > { %v9526_v34 = vpop.eup %9525  ;;  %v6365_v59 = vmul.f32 %v9524_v8, %v10897_v51 }
 0x64c   : > { %v6363_v49 = vmul.f32 %v9526_v34, %v10902_v47 }
 0x64d   : > { %v7260_v44 = vpack.c.bf16 %v6365_v59, %v6364_v7 }
 0x64e   : > { %v7255_v57 = vpack.c.bf16 %v6363_v49, %v6362_v39 }
 0x64f   : > { %7299 = vst [vmem:[%s10843_s11 + $0x68] sm:$0xff] %v7260_v44  }
 0x650   : > { %v9528_v35 = vpop.eup %9527  ;;  %7298 = vst [vmem:[%s10843_s11 + $0x60] sm:$0xff] %v7255_v57  }
 0x651   : > { %v9530_v6 = vpop.eup %9529  ;;  %v6368_v41 = vmul.f32 %v9528_v35, %v10913_v30 }
 0x652   : > { %v9532_v46 = vpop.eup %9531  ;;  %v6366_v51 = vmul.f32 %v9530_v6, %v10916_v61 }
 0x653   : > { %v9534_v23 = vpop.eup %9533  ;;  %v6369_v22 = vmul.f32 %v9532_v46, %v10921_v15 }
 0x654   : > { %v6367_v38 = vmul.f32 %v9534_v23, %v10926_v63 }
 0x655   : > { %v7270_v32 = vpack.c.bf16 %v6369_v22, %v6368_v41 }
 0x656   : > { %v7265_v36 = vpack.c.bf16 %v6367_v38, %v6366_v51 }
 0x657   : > { %7301 = vst [vmem:[%s10843_s11 + $0x78] sm:$0xff] %v7270_v32  }
 0x658   : > { %7300 = vst [vmem:[%s10843_s11 + $0x70] sm:$0xff] %v7265_v36  }
 0x659 PF: > { %s15_s18 = sadd.s32 1, %s9548_s18  }
 0x65a   : > { %p12_p4 = scmp.ge.s32.totalorder %s15_s18, 4  }
 0x65c   :  { %14 = sbr.rel (!%p12_p4) target bundleno = 1 (0x1), region = 90 }

</bundles_post_ra>
